<compile_context>
chip_gen: v5e
topology: v5e:2x2
jax: 0.10.0
libtpu: 0.0.40
codegen_flags: <defaults>
</compile_context>

<pallas_src>
import functools

import jax
import jax.numpy as jnp
from jax import lax
from jax.experimental import pallas as pl
from jax.experimental.pallas import tpu as pltpu


# ----------------------------- in-kernel helpers ---------------------------

def _conv3x3_phases(src_ref, w_ref, stride, Ho, Wo):
    """3x3 conv as 9 tap matmuls over contiguous windows of a phase-split tile.

    src_ref : (P, Hq, Wq, Cin) bf16 VMEM ref, P = stride*stride phases of the
              spatially zero-padded input (P=1, Hq=Ho+2 for stride 1).
    w_ref   : (9, Cin, Cout) bf16, tap-major (kh*3+kw).
    Returns an fp32 (Ho*Wo, Cout) accumulator.
    """
    s = stride
    cout = w_ref.shape[-1]
    acc = jnp.zeros((Ho * Wo, cout), jnp.float32)
    for kh in range(3):
        for kw in range(3):
            p = (kh % s) * s + (kw % s)          # phase holding the stride-s samples
            tap = src_ref[p, pl.ds(kh // s, Ho), pl.ds(kw // s, Wo), :]
            acc = acc + jnp.dot(tap.reshape(Ho * Wo, -1), w_ref[kh * 3 + kw],
                                preferred_element_type=jnp.float32)
    return acc


def _block_body(xph_ref, mask_ref, w1_ref, w2_ref, s1_ref, b1_ref, s2_ref, b2_ref,
                h_scr, y_scr, stride, Ho, Wo):
    """BN1+ReLU -> conv1 -> BN2+ReLU -> conv2 for one image; returns fp32 acc."""
    cout = w1_ref.shape[-1]

    # --- BN1 + ReLU prologue (fp32 math, single bf16 cast at the store).
    # The mask restores exact zeros on the conv zero-padding ring.
    h_scr[...] = (jnp.maximum(xph_ref[...] * s1_ref[...] + b1_ref[...], 0.0)
                  * mask_ref[...]).astype(h_scr.dtype)

    # --- conv1: 3x3 / stride over the phase-split windows.
    acc = _conv3x3_phases(h_scr, w1_ref, stride, Ho, Wo)

    # --- BN2 + ReLU epilogue; Dropout is identity in eval mode.
    # TODO(synk): training-mode dropout would need pltpu.prng_seed / prng_random_bits.
    y = jnp.maximum(acc * s2_ref[...] + b2_ref[...], 0.0)

    # Stage conv2's zero-padded input entirely in VMEM (no HBM round trip).
    y_scr[...] = jnp.zeros_like(y_scr)
    y_scr[:, pl.ds(1, Ho), pl.ds(1, Wo), :] = (
        y.reshape(1, Ho, Wo, cout).astype(y_scr.dtype))

    # --- conv2: 3x3 / 1 from the staged padded tile.
    return _conv3x3_phases(y_scr, w2_ref, 1, Ho, Wo)


def _wide_block_proj_kernel(xph_ref, mask_ref, xs_ref, w1_ref, w2_ref, ws_ref,
                            s1_ref, b1_ref, s2_ref, b2_ref, o_ref, h_scr, y_scr,
                            *, stride, Ho, Wo):
    """Full block with fused 1x1/stride projection shortcut (one batch image)."""
    cout = o_ref.shape[-1]
    acc = _block_body(xph_ref, mask_ref, w1_ref, w2_ref, s1_ref, b1_ref,
                      s2_ref, b2_ref, h_scr, y_scr, stride, Ho, Wo)
    xs = xs_ref[...].reshape(Ho * Wo, -1)                       # already bf16
    acc = acc + jnp.dot(xs, ws_ref[...], preferred_element_type=jnp.float32)
    o_ref[...] = acc.reshape(1, Ho, Wo, cout).astype(o_ref.dtype)


def _wide_block_ident_kernel(xph_ref, mask_ref, sc_ref, w1_ref, w2_ref,
                             s1_ref, b1_ref, s2_ref, b2_ref, o_ref, h_scr, y_scr,
                             *, stride, Ho, Wo):
    """Full block with fused identity shortcut (one batch image)."""
    cout = o_ref.shape[-1]
    acc = _block_body(xph_ref, mask_ref, w1_ref, w2_ref, s1_ref, b1_ref,
                      s2_ref, b2_ref, h_scr, y_scr, stride, Ho, Wo)
    acc = acc + sc_ref[...].reshape(Ho * Wo, -1).astype(jnp.float32)
    o_ref[...] = acc.reshape(1, Ho, Wo, cout).astype(o_ref.dtype)


# ----------------------------- host-side helpers ---------------------------

def _fold_bn(gamma, beta, mean, var, eps=1e-5):
    scale = gamma / jnp.sqrt(var + eps)
    shift = beta - mean * scale
    return scale.astype(jnp.float32), shift.astype(jnp.float32)


def _phase_split_padded(x_nhwc, s):
    """Zero-pad H/W by 1 (conv padding) and split into the s*s stride phases.

    Returns (N*s*s, Hq, Wq, C); image n occupies rows [n*s*s, (n+1)*s*s) with
    phase p = ph*s + pw holding xpad[n, ph::s, pw::s, :].  Total bytes ~1x input
    (NOT the 9x of im2col)."""
    N, H, W, C = x_nhwc.shape
    Hp, Wp = H + 2, W + 2
    Hq, Wq = -(-Hp // s), -(-Wp // s)
    xp = jnp.pad(x_nhwc, ((0, 0), (1, Hq * s - Hp + 1), (1, Wq * s - Wp + 1), (0, 0)))
    xr = xp.reshape(N, Hq, s, Wq, s, C)
    xr = jnp.transpose(xr, (0, 2, 4, 1, 3, 5)).reshape(N * s * s, Hq, Wq, C)
    return xr, Hq, Wq


def _phase_pad_mask(s, Hq, Wq, H, W):
    """(s*s, Hq, Wq, 1) float mask: 1.0 where a phase element maps to a real pixel."""
    i = jnp.arange(Hq)[:, None]
    j = jnp.arange(Wq)[None, :]
    ms = []
    for ph in range(s):
        for pw in range(s):
            rr, cc = s * i + ph, s * j + pw
            ms.append((rr >= 1) & (rr <= H) & (cc >= 1) & (cc <= W))
    return jnp.stack(ms).astype(jnp.float32)[..., None]


# ----------------------------- forward pass --------------------------------

def wide_basic_block_forward(x_nchw, params, stride):
    """x_nchw: (N, Cin, H, W) fp32 -> (N, Cout, Ho, Wo) fp32 (PyTorch-compatible)."""
    N, Cin, H, W = x_nchw.shape
    Cout = params["conv1_w"].shape[0]
    s = stride
    Ho = (H - 1) // s + 1
    Wo = (W - 1) // s + 1
    P = s * s

    # One NCHW -> NHWC layout change (channels land on the 128-lane axis).
    x = jnp.transpose(x_nchw, (0, 2, 3, 1)).astype(jnp.float32)

    s1, b1 = _fold_bn(params["bn1_gamma"], params["bn1_beta"],
                      params["bn1_mean"], params["bn1_var"])
    s2, b2 = _fold_bn(params["bn2_gamma"], params["bn2_beta"],
                      params["bn2_mean"], params["bn2_var"])
    s1, b1 = s1.reshape(1, Cin), b1.reshape(1, Cin)
    s2, b2 = s2.reshape(1, Cout), b2.reshape(1, Cout)

    xph, Hq, Wq = _phase_split_padded(x, s)          # (N*P, Hq, Wq, Cin)
    mask = _phase_pad_mask(s, Hq, Wq, H, W)          # (P, Hq, Wq, 1), tiny

    # Conv weights, tap-major (kh*3+kw, Cin, Cout), bf16 for the MXU.
    w1 = jnp.transpose(params["conv1_w"], (2, 3, 1, 0)).reshape(9, Cin, Cout)
    w1 = w1.astype(jnp.bfloat16)
    w2 = jnp.transpose(params["conv2_w"], (2, 3, 1, 0)).reshape(9, Cout, Cout)
    w2 = w2.astype(jnp.bfloat16)

    project = (s != 1) or (Cin != Cout)
    if project:
        # Strided 1x1-shortcut input (bf16: halves its HBM traffic; MXU is bf16 anyway).
        xs = x[:, 0:(Ho - 1) * s + 1:s, 0:(Wo - 1) * s + 1:s, :].astype(jnp.bfloat16)
        ws = params["short_w"].reshape(Cout, Cin).T.astype(jnp.bfloat16)   # (Cin, Cout)
        kernel = functools.partial(_wide_block_proj_kernel, stride=s, Ho=Ho, Wo=Wo)
        operands = (xph, mask, xs, w1, w2, ws, s1, b1, s2, b2)
        in_specs = [
            pl.BlockSpec((P, Hq, Wq, Cin), lambda b: (b, 0, 0, 0)),      # phases of img b
            pl.BlockSpec((P, Hq, Wq, 1), lambda b: (0, 0, 0, 0)),        # pad mask
            pl.BlockSpec((1, Ho, Wo, Cin), lambda b: (b, 0, 0, 0)),      # shortcut input
            pl.BlockSpec((9, Cin, Cout), lambda b: (0, 0, 0)),           # conv1 w
            pl.BlockSpec((9, Cout, Cout), lambda b: (0, 0, 0)),          # conv2 w
            pl.BlockSpec((Cin, Cout), lambda b: (0, 0)),                 # shortcut w
            pl.BlockSpec((1, Cin), lambda b: (0, 0)),                    # bn1 scale
            pl.BlockSpec((1, Cin), lambda b: (0, 0)),                    # bn1 shift
            pl.BlockSpec((1, Cout), lambda b: (0, 0)),                   # bn2 scale
            pl.BlockSpec((1, Cout), lambda b: (0, 0)),                   # bn2 shift
        ]
    else:
        kernel = functools.partial(_wide_block_ident_kernel, stride=s, Ho=Ho, Wo=Wo)
        operands = (xph, mask, x, w1, w2, s1, b1, s2, b2)
        in_specs = [
            pl.BlockSpec((P, Hq, Wq, Cin), lambda b: (b, 0, 0, 0)),
            pl.BlockSpec((P, Hq, Wq, 1), lambda b: (0, 0, 0, 0)),
            pl.BlockSpec((1, H, W, Cin), lambda b: (b, 0, 0, 0)),        # identity shortcut
            pl.BlockSpec((9, Cin, Cout), lambda b: (0, 0, 0)),
            pl.BlockSpec((9, Cout, Cout), lambda b: (0, 0, 0)),
            pl.BlockSpec((1, Cin), lambda b: (0, 0)),
            pl.BlockSpec((1, Cin), lambda b: (0, 0)),
            pl.BlockSpec((1, Cout), lambda b: (0, 0)),
            pl.BlockSpec((1, Cout), lambda b: (0, 0)),
        ]

    out = pl.pallas_call(
        kernel,
        out_shape=jax.ShapeDtypeStruct((N, Ho, Wo, Cout), jnp.float32),
        grid=(N,),
        in_specs=in_specs,
        out_specs=pl.BlockSpec((1, Ho, Wo, Cout), lambda b: (b, 0, 0, 0)),
        scratch_shapes=[
            pltpu.VMEM((P, Hq, Wq, Cin), jnp.bfloat16),                  # relu(bn1(x)) padded
            pltpu.VMEM((1, Ho + 2, Wo + 2, Cout), jnp.bfloat16),         # padded conv2 input
        ],
        compiler_params=pltpu.CompilerParams(dimension_semantics=("parallel",)),
    )(*operands)

    return jnp.transpose(out, (0, 3, 1, 2))          # back to NCHW


# ----------------------------- reference (pure JAX) -------------------------

def _reference_forward(x_nchw, params, stride):
    """Pure-XLA reference with identical eval-mode semantics (fp32)."""
    eps = 1e-5

    def bn(x, prefix):
        g = params[prefix + "_gamma"][None, :, None, None]
        b = params[prefix + "_beta"][None, :, None, None]
        m = params[prefix + "_mean"][None, :, None, None]
        v = params[prefix + "_var"][None, :, None, None]
        return (x - m) / jnp.sqrt(v + eps) * g + b

    dn = ("NCHW", "OIHW", "NCHW")
    hp = lax.Precision.HIGHEST
    h = jax.nn.relu(bn(x_nchw, "bn1"))
    y = lax.conv_general_dilated(h, params["conv1_w"], (stride, stride),
                                 ((1, 1), (1, 1)), dimension_numbers=dn, precision=hp)
    y = jax.nn.relu(bn(y, "bn2"))
    out = lax.conv_general_dilated(y, params["conv2_w"], (1, 1),
                                   ((1, 1), (1, 1)), dimension_numbers=dn, precision=hp)
    if "short_w" in params:
        sc = lax.conv_general_dilated(x_nchw, params["short_w"], (stride, stride),
                                      ((0, 0), (0, 0)), dimension_numbers=dn, precision=hp)
    else:
        sc = x_nchw
    return out + sc


# ----------------------------- main ----------------------------------------

def make_params(key, in_dims, out_dims, stride):
    ks = jax.random.split(key, 12)
    p = {
        "bn1_gamma": jax.random.normal(ks[0], (in_dims,), jnp.float32) * 0.1 + 1.0,
        "bn1_beta": jax.random.normal(ks[1], (in_dims,), jnp.float32) * 0.1,
        "bn1_mean": jax.random.normal(ks[2], (in_dims,), jnp.float32) * 0.1,
        "bn1_var": jnp.abs(jax.random.normal(ks[3], (in_dims,), jnp.float32)) * 0.1 + 1.0,
        "conv1_w": jax.random.normal(ks[4], (out_dims, in_dims, 3, 3), jnp.float32) * 0.1,
        "bn2_gamma": jax.random.normal(ks[5], (out_dims,), jnp.float32) * 0.1 + 1.0,
        "bn2_beta": jax.random.normal(ks[6], (out_dims,), jnp.float32) * 0.1,
        "bn2_mean": jax.random.normal(ks[7], (out_dims,), jnp.float32) * 0.1,
        "bn2_var": jnp.abs(jax.random.normal(ks[8], (out_dims,), jnp.float32)) * 0.1 + 1.0,
        "conv2_w": jax.random.normal(ks[9], (out_dims, out_dims, 3, 3), jnp.float32) * 0.1,
    }
    if stride != 1 or in_dims != out_dims:
        p["short_w"] = jax.random.normal(ks[10], (out_dims, in_dims, 1, 1), jnp.float32) * 0.1
    return p


def _run_case(key, n, in_dims, out_dims, stride, hw):
    kx, kp = jax.random.split(key)
    x = jax.random.normal(kx, (n, in_dims, hw, hw), jnp.float32)   # NCHW like PyTorch
    params = make_params(kp, in_dims, out_dims, stride)

    fwd = jax.jit(functools.partial(wide_basic_block_forward, stride=stride))
    out = fwd(x, params)
    jax.block_until_ready(out)
    ho = (hw - 1) // stride + 1
    assert out.shape == (n, out_dims, ho, ho), out.shape

    ref = _reference_forward(x, params, stride)
    diff = jnp.abs(out - ref)
    err_max = float(jnp.max(diff))
    err_mean = float(jnp.mean(diff))
    assert err_max < 0.25 and err_mean < 0.02, (err_max, err_mean)


if __name__ == "__main__":
    key = jax.random.PRNGKey(0)
    k1, k2 = jax.random.split(key)

    # Case 1: projection shortcut (stride 2, channel expansion) — primary spec shapes.
    _run_case(k1, n=2, in_dims=4, out_dims=8, stride=2, hw=16)
    # Case 2: identity shortcut (stride 1, same channels).
    _run_case(k2, n=2, in_dims=8, out_dims=8, stride=1, hw=16)

    print("KERNEL_OK")
</pallas_src>

<mosaic_0001>
module attributes {stable_mosaic.version = 11 : i64} {
  func.func @_wide_block_proj_kernel(%arg0: i32, %arg1: memref<4x9x9x4xf32, #tpu.memory_space<vmem>>, %arg2: memref<4x9x9x1xf32, #tpu.memory_space<vmem>>, %arg3: memref<1x8x8x4xbf16, #tpu.memory_space<vmem>>, %arg4: memref<9x4x8xbf16, #tpu.memory_space<vmem>>, %arg5: memref<9x8x8xbf16, #tpu.memory_space<vmem>>, %arg6: memref<4x8xbf16, #tpu.memory_space<vmem>>, %arg7: memref<1x4xf32, #tpu.memory_space<vmem>>, %arg8: memref<1x4xf32, #tpu.memory_space<vmem>>, %arg9: memref<1x8xf32, #tpu.memory_space<vmem>>, %arg10: memref<1x8xf32, #tpu.memory_space<vmem>>, %arg11: memref<1x8x8x8xf32, #tpu.memory_space<vmem>>, %arg12: memref<4x9x9x4xbf16, #tpu.memory_space<vmem>>, %arg13: memref<1x10x10x8xbf16, #tpu.memory_space<vmem>>) attributes {dimension_semantics = [#tpu.dimension_semantics<parallel>], iteration_bounds = array<i64: 2>, scalar_prefetch = 0 : i64, scratch_operands = 2 : i64, tpu.core_type = #tpu.core_type<tc>, window_params = [{transform_indices = @transform_0, window_bounds = array<i64: 4, 9, 9, 4>}, {pipeline_mode = #tpu.pipeline_mode<synchronous>, transform_indices = @transform_1, window_bounds = array<i64: 4, 9, 9, 1>}, {transform_indices = @transform_2, window_bounds = array<i64: 1, 8, 8, 4>}, {pipeline_mode = #tpu.pipeline_mode<synchronous>, transform_indices = @transform_3, window_bounds = array<i64: 9, 4, 8>}, {pipeline_mode = #tpu.pipeline_mode<synchronous>, transform_indices = @transform_4, window_bounds = array<i64: 9, 8, 8>}, {pipeline_mode = #tpu.pipeline_mode<synchronous>, transform_indices = @transform_5, window_bounds = array<i64: 4, 8>}, {pipeline_mode = #tpu.pipeline_mode<synchronous>, transform_indices = @transform_6, window_bounds = array<i64: 1, 4>}, {pipeline_mode = #tpu.pipeline_mode<synchronous>, transform_indices = @transform_7, window_bounds = array<i64: 1, 4>}, {pipeline_mode = #tpu.pipeline_mode<synchronous>, transform_indices = @transform_8, window_bounds = array<i64: 1, 8>}, {pipeline_mode = #tpu.pipeline_mode<synchronous>, transform_indices = @transform_9, window_bounds = array<i64: 1, 8>}, {transform_indices = @transform_10, window_bounds = array<i64: 1, 8, 8, 8>}]} {
    %c0 = arith.constant 0 : index
    %c0_0 = arith.constant 0 : index
    %c0_1 = arith.constant 0 : index
    %c0_2 = arith.constant 0 : index
    %0 = vector.load %arg1[%c0, %c0_0, %c0_1, %c0_2] : memref<4x9x9x4xf32, #tpu.memory_space<vmem>>, vector<4x9x9x4xf32>
    %c0_3 = arith.constant 0 : index
    %c0_4 = arith.constant 0 : index
    %1 = vector.load %arg7[%c0_3, %c0_4] : memref<1x4xf32, #tpu.memory_space<vmem>>, vector<1x4xf32>
    %2 = vector.shape_cast %1 : vector<1x4xf32> to vector<1x1x1x4xf32>
    %3 = vector.broadcast %2 : vector<1x1x1x4xf32> to vector<4x9x9x4xf32>
    %4 = arith.mulf %0, %3 : vector<4x9x9x4xf32>
    %c0_5 = arith.constant 0 : index
    %c0_6 = arith.constant 0 : index
    %5 = vector.load %arg8[%c0_5, %c0_6] : memref<1x4xf32, #tpu.memory_space<vmem>>, vector<1x4xf32>
    %6 = vector.shape_cast %5 : vector<1x4xf32> to vector<1x1x1x4xf32>
    %7 = vector.broadcast %6 : vector<1x1x1x4xf32> to vector<4x9x9x4xf32>
    %8 = arith.addf %4, %7 : vector<4x9x9x4xf32>
    %cst = arith.constant 0.000000e+00 : f32
    %9 = vector.broadcast %cst : f32 to vector<4x9x9x4xf32>
    %10 = arith.maximumf %8, %9 : vector<4x9x9x4xf32>
    %c0_7 = arith.constant 0 : index
    %c0_8 = arith.constant 0 : index
    %c0_9 = arith.constant 0 : index
    %c0_10 = arith.constant 0 : index
    %11 = vector.load %arg2[%c0_7, %c0_8, %c0_9, %c0_10] : memref<4x9x9x1xf32, #tpu.memory_space<vmem>>, vector<4x9x9x1xf32>
    %12 = vector.broadcast %11 : vector<4x9x9x1xf32> to vector<4x9x9x4xf32>
    %13 = arith.mulf %10, %12 : vector<4x9x9x4xf32>
    %14 = arith.truncf %13 : vector<4x9x9x4xf32> to vector<4x9x9x4xbf16>
    %c0_11 = arith.constant 0 : index
    %c0_12 = arith.constant 0 : index
    %c0_13 = arith.constant 0 : index
    %c0_14 = arith.constant 0 : index
    %15 = vector.load %arg12[%c0_11, %c0_12, %c0_13, %c0_14] : memref<4x9x9x4xbf16, #tpu.memory_space<vmem>>, vector<4x9x9x4xbf16>
    tpu.vector_store %arg12[%c0_11, %c0_12, %c0_13, %c0_14], %14 {strides = array<i32>} : memref<4x9x9x4xbf16, #tpu.memory_space<vmem>>, vector<4x9x9x4xbf16>,
    %cst_15 = arith.constant 0.000000e+00 : f32
    %16 = vector.broadcast %cst_15 : f32 to vector<64x8xf32>
    %c0_16 = arith.constant 0 : index
    %c0_17 = arith.constant 0 : index
    %c0_18 = arith.constant 0 : index
    %c0_19 = arith.constant 0 : index
    %17 = vector.load %arg12[%c0_16, %c0_17, %c0_18, %c0_19] : memref<4x9x9x4xbf16, #tpu.memory_space<vmem>>, vector<1x8x8x4xbf16>
    %18 = vector.shape_cast %17 : vector<1x8x8x4xbf16> to vector<8x8x4xbf16>
    %19 = vector.shape_cast %18 : vector<8x8x4xbf16> to vector<64x4xbf16>
    %c0_20 = arith.constant 0 : index
    %c0_21 = arith.constant 0 : index
    %c0_22 = arith.constant 0 : index
    %20 = vector.load %arg4[%c0_20, %c0_21, %c0_22] : memref<9x4x8xbf16, #tpu.memory_space<vmem>>, vector<1x4x8xbf16>
    %21 = vector.shape_cast %20 : vector<1x4x8xbf16> to vector<4x8xbf16>
    %cst_23 = arith.constant dense<0.000000e+00> : vector<64x8xf32>
    %22 = tpu.matmul %19, %21, %cst_23 {dimension_numbers = #tpu.dot_dimension_numbers<[1], [0], [0], [1], [0, 0, 1, 1], [], []>} : vector<64x4xbf16>, vector<4x8xbf16>, vector<64x8xf32> -> vector<64x8xf32>
    %23 = arith.addf %16, %22 : vector<64x8xf32>
    %c1 = arith.constant 1 : index
    %c0_24 = arith.constant 0 : index
    %c0_25 = arith.constant 0 : index
    %c0_26 = arith.constant 0 : index
    %24 = vector.load %arg12[%c1, %c0_24, %c0_25, %c0_26] : memref<4x9x9x4xbf16, #tpu.memory_space<vmem>>, vector<1x8x8x4xbf16>
    %25 = vector.shape_cast %24 : vector<1x8x8x4xbf16> to vector<8x8x4xbf16>
    %26 = vector.shape_cast %25 : vector<8x8x4xbf16> to vector<64x4xbf16>
    %c1_27 = arith.constant 1 : index
    %c0_28 = arith.constant 0 : index
    %c0_29 = arith.constant 0 : index
    %27 = vector.load %arg4[%c1_27, %c0_28, %c0_29] : memref<9x4x8xbf16, #tpu.memory_space<vmem>>, vector<1x4x8xbf16>
    %28 = vector.shape_cast %27 : vector<1x4x8xbf16> to vector<4x8xbf16>
    %cst_30 = arith.constant dense<0.000000e+00> : vector<64x8xf32>
    %29 = tpu.matmul %26, %28, %cst_30 {dimension_numbers = #tpu.dot_dimension_numbers<[1], [0], [0], [1], [0, 0, 1, 1], [], []>} : vector<64x4xbf16>, vector<4x8xbf16>, vector<64x8xf32> -> vector<64x8xf32>
    %30 = arith.addf %23, %29 : vector<64x8xf32>
    %c0_31 = arith.constant 0 : index
    %c0_32 = arith.constant 0 : index
    %c1_33 = arith.constant 1 : index
    %c0_34 = arith.constant 0 : index
    %31 = vector.load %arg12[%c0_31, %c0_32, %c1_33, %c0_34] : memref<4x9x9x4xbf16, #tpu.memory_space<vmem>>, vector<1x8x8x4xbf16>
    %32 = vector.shape_cast %31 : vector<1x8x8x4xbf16> to vector<8x8x4xbf16>
    %33 = vector.shape_cast %32 : vector<8x8x4xbf16> to vector<64x4xbf16>
    %c2 = arith.constant 2 : index
    %c0_35 = arith.constant 0 : index
    %c0_36 = arith.constant 0 : index
    %34 = vector.load %arg4[%c2, %c0_35, %c0_36] : memref<9x4x8xbf16, #tpu.memory_space<vmem>>, vector<1x4x8xbf16>
    %35 = vector.shape_cast %34 : vector<1x4x8xbf16> to vector<4x8xbf16>
    %cst_37 = arith.constant dense<0.000000e+00> : vector<64x8xf32>
    %36 = tpu.matmul %33, %35, %cst_37 {dimension_numbers = #tpu.dot_dimension_numbers<[1], [0], [0], [1], [0, 0, 1, 1], [], []>} : vector<64x4xbf16>, vector<4x8xbf16>, vector<64x8xf32> -> vector<64x8xf32>
    %37 = arith.addf %30, %36 : vector<64x8xf32>
    %c2_38 = arith.constant 2 : index
    %c0_39 = arith.constant 0 : index
    %c0_40 = arith.constant 0 : index
    %c0_41 = arith.constant 0 : index
    %38 = vector.load %arg12[%c2_38, %c0_39, %c0_40, %c0_41] : memref<4x9x9x4xbf16, #tpu.memory_space<vmem>>, vector<1x8x8x4xbf16>
    %39 = vector.shape_cast %38 : vector<1x8x8x4xbf16> to vector<8x8x4xbf16>
    %40 = vector.shape_cast %39 : vector<8x8x4xbf16> to vector<64x4xbf16>
    %c3 = arith.constant 3 : index
    %c0_42 = arith.constant 0 : index
    %c0_43 = arith.constant 0 : index
    %41 = vector.load %arg4[%c3, %c0_42, %c0_43] : memref<9x4x8xbf16, #tpu.memory_space<vmem>>, vector<1x4x8xbf16>
    %42 = vector.shape_cast %41 : vector<1x4x8xbf16> to vector<4x8xbf16>
    %cst_44 = arith.constant dense<0.000000e+00> : vector<64x8xf32>
    %43 = tpu.matmul %40, %42, %cst_44 {dimension_numbers = #tpu.dot_dimension_numbers<[1], [0], [0], [1], [0, 0, 1, 1], [], []>} : vector<64x4xbf16>, vector<4x8xbf16>, vector<64x8xf32> -> vector<64x8xf32>
    %44 = arith.addf %37, %43 : vector<64x8xf32>
    %c3_45 = arith.constant 3 : index
    %c0_46 = arith.constant 0 : index
    %c0_47 = arith.constant 0 : index
    %c0_48 = arith.constant 0 : index
    %45 = vector.load %arg12[%c3_45, %c0_46, %c0_47, %c0_48] : memref<4x9x9x4xbf16, #tpu.memory_space<vmem>>, vector<1x8x8x4xbf16>
    %46 = vector.shape_cast %45 : vector<1x8x8x4xbf16> to vector<8x8x4xbf16>
    %47 = vector.shape_cast %46 : vector<8x8x4xbf16> to vector<64x4xbf16>
    %c4 = arith.constant 4 : index
    %c0_49 = arith.constant 0 : index
    %c0_50 = arith.constant 0 : index
    %48 = vector.load %arg4[%c4, %c0_49, %c0_50] : memref<9x4x8xbf16, #tpu.memory_space<vmem>>, vector<1x4x8xbf16>
    %49 = vector.shape_cast %48 : vector<1x4x8xbf16> to vector<4x8xbf16>
    %cst_51 = arith.constant dense<0.000000e+00> : vector<64x8xf32>
    %50 = tpu.matmul %47, %49, %cst_51 {dimension_numbers = #tpu.dot_dimension_numbers<[1], [0], [0], [1], [0, 0, 1, 1], [], []>} : vector<64x4xbf16>, vector<4x8xbf16>, vector<64x8xf32> -> vector<64x8xf32>
    %51 = arith.addf %44, %50 : vector<64x8xf32>
    %c2_52 = arith.constant 2 : index
    %c0_53 = arith.constant 0 : index
    %c1_54 = arith.constant 1 : index
    %c0_55 = arith.constant 0 : index
    %52 = vector.load %arg12[%c2_52, %c0_53, %c1_54, %c0_55] : memref<4x9x9x4xbf16, #tpu.memory_space<vmem>>, vector<1x8x8x4xbf16>
    %53 = vector.shape_cast %52 : vector<1x8x8x4xbf16> to vector<8x8x4xbf16>
    %54 = vector.shape_cast %53 : vector<8x8x4xbf16> to vector<64x4xbf16>
    %c5 = arith.constant 5 : index
    %c0_56 = arith.constant 0 : index
    %c0_57 = arith.constant 0 : index
    %55 = vector.load %arg4[%c5, %c0_56, %c0_57] : memref<9x4x8xbf16, #tpu.memory_space<vmem>>, vector<1x4x8xbf16>
    %56 = vector.shape_cast %55 : vector<1x4x8xbf16> to vector<4x8xbf16>
    %cst_58 = arith.constant dense<0.000000e+00> : vector<64x8xf32>
    %57 = tpu.matmul %54, %56, %cst_58 {dimension_numbers = #tpu.dot_dimension_numbers<[1], [0], [0], [1], [0, 0, 1, 1], [], []>} : vector<64x4xbf16>, vector<4x8xbf16>, vector<64x8xf32> -> vector<64x8xf32>
    %58 = arith.addf %51, %57 : vector<64x8xf32>
    %c0_59 = arith.constant 0 : index
    %c1_60 = arith.constant 1 : index
    %c0_61 = arith.constant 0 : index
    %c0_62 = arith.constant 0 : index
    %59 = vector.load %arg12[%c0_59, %c1_60, %c0_61, %c0_62] : memref<4x9x9x4xbf16, #tpu.memory_space<vmem>>, vector<1x8x8x4xbf16>
    %60 = vector.shape_cast %59 : vector<1x8x8x4xbf16> to vector<8x8x4xbf16>
    %61 = vector.shape_cast %60 : vector<8x8x4xbf16> to vector<64x4xbf16>
    %c6 = arith.constant 6 : index
    %c0_63 = arith.constant 0 : index
    %c0_64 = arith.constant 0 : index
    %62 = vector.load %arg4[%c6, %c0_63, %c0_64] : memref<9x4x8xbf16, #tpu.memory_space<vmem>>, vector<1x4x8xbf16>
    %63 = vector.shape_cast %62 : vector<1x4x8xbf16> to vector<4x8xbf16>
    %cst_65 = arith.constant dense<0.000000e+00> : vector<64x8xf32>
    %64 = tpu.matmul %61, %63, %cst_65 {dimension_numbers = #tpu.dot_dimension_numbers<[1], [0], [0], [1], [0, 0, 1, 1], [], []>} : vector<64x4xbf16>, vector<4x8xbf16>, vector<64x8xf32> -> vector<64x8xf32>
    %65 = arith.addf %58, %64 : vector<64x8xf32>
    %c1_66 = arith.constant 1 : index
    %c1_67 = arith.constant 1 : index
    %c0_68 = arith.constant 0 : index
    %c0_69 = arith.constant 0 : index
    %66 = vector.load %arg12[%c1_66, %c1_67, %c0_68, %c0_69] : memref<4x9x9x4xbf16, #tpu.memory_space<vmem>>, vector<1x8x8x4xbf16>
    %67 = vector.shape_cast %66 : vector<1x8x8x4xbf16> to vector<8x8x4xbf16>
    %68 = vector.shape_cast %67 : vector<8x8x4xbf16> to vector<64x4xbf16>
    %c7 = arith.constant 7 : index
    %c0_70 = arith.constant 0 : index
    %c0_71 = arith.constant 0 : index
    %69 = vector.load %arg4[%c7, %c0_70, %c0_71] : memref<9x4x8xbf16, #tpu.memory_space<vmem>>, vector<1x4x8xbf16>
    %70 = vector.shape_cast %69 : vector<1x4x8xbf16> to vector<4x8xbf16>
    %cst_72 = arith.constant dense<0.000000e+00> : vector<64x8xf32>
    %71 = tpu.matmul %68, %70, %cst_72 {dimension_numbers = #tpu.dot_dimension_numbers<[1], [0], [0], [1], [0, 0, 1, 1], [], []>} : vector<64x4xbf16>, vector<4x8xbf16>, vector<64x8xf32> -> vector<64x8xf32>
    %72 = arith.addf %65, %71 : vector<64x8xf32>
    %c0_73 = arith.constant 0 : index
    %c1_74 = arith.constant 1 : index
    %c1_75 = arith.constant 1 : index
    %c0_76 = arith.constant 0 : index
    %73 = vector.load %arg12[%c0_73, %c1_74, %c1_75, %c0_76] : memref<4x9x9x4xbf16, #tpu.memory_space<vmem>>, vector<1x8x8x4xbf16>
    %74 = vector.shape_cast %73 : vector<1x8x8x4xbf16> to vector<8x8x4xbf16>
    %75 = vector.shape_cast %74 : vector<8x8x4xbf16> to vector<64x4xbf16>
    %c8 = arith.constant 8 : index
    %c0_77 = arith.constant 0 : index
    %c0_78 = arith.constant 0 : index
    %76 = vector.load %arg4[%c8, %c0_77, %c0_78] : memref<9x4x8xbf16, #tpu.memory_space<vmem>>, vector<1x4x8xbf16>
    %77 = vector.shape_cast %76 : vector<1x4x8xbf16> to vector<4x8xbf16>
    %cst_79 = arith.constant dense<0.000000e+00> : vector<64x8xf32>
    %78 = tpu.matmul %75, %77, %cst_79 {dimension_numbers = #tpu.dot_dimension_numbers<[1], [0], [0], [1], [0, 0, 1, 1], [], []>} : vector<64x4xbf16>, vector<4x8xbf16>, vector<64x8xf32> -> vector<64x8xf32>
    %79 = arith.addf %72, %78 : vector<64x8xf32>
    %c0_80 = arith.constant 0 : index
    %c0_81 = arith.constant 0 : index
    %80 = vector.load %arg9[%c0_80, %c0_81] : memref<1x8xf32, #tpu.memory_space<vmem>>, vector<1x8xf32>
    %81 = vector.broadcast %80 : vector<1x8xf32> to vector<64x8xf32>
    %82 = arith.mulf %79, %81 : vector<64x8xf32>
    %c0_82 = arith.constant 0 : index
    %c0_83 = arith.constant 0 : index
    %83 = vector.load %arg10[%c0_82, %c0_83] : memref<1x8xf32, #tpu.memory_space<vmem>>, vector<1x8xf32>
    %84 = vector.broadcast %83 : vector<1x8xf32> to vector<64x8xf32>
    %85 = arith.addf %82, %84 : vector<64x8xf32>
    %cst_84 = arith.constant 0.000000e+00 : f32
    %86 = vector.broadcast %cst_84 : f32 to vector<64x8xf32>
    %87 = arith.maximumf %85, %86 : vector<64x8xf32>
    %cst_85 = arith.constant 0.000000e+00 : bf16
    %88 = vector.broadcast %cst_85 : bf16 to vector<1x10x10x8xbf16>
    %c0_86 = arith.constant 0 : index
    %c0_87 = arith.constant 0 : index
    %c0_88 = arith.constant 0 : index
    %c0_89 = arith.constant 0 : index
    %89 = vector.load %arg13[%c0_86, %c0_87, %c0_88, %c0_89] : memref<1x10x10x8xbf16, #tpu.memory_space<vmem>>, vector<1x10x10x8xbf16>
    tpu.vector_store %arg13[%c0_86, %c0_87, %c0_88, %c0_89], %88 {strides = array<i32>} : memref<1x10x10x8xbf16, #tpu.memory_space<vmem>>, vector<1x10x10x8xbf16>,
    %90 = vector.shape_cast %87 : vector<64x8xf32> to vector<1x8x8x8xf32>
    %91 = arith.truncf %90 : vector<1x8x8x8xf32> to vector<1x8x8x8xbf16>
    %c0_90 = arith.constant 0 : index
    %c1_91 = arith.constant 1 : index
    %c1_92 = arith.constant 1 : index
    %c0_93 = arith.constant 0 : index
    %92 = vector.load %arg13[%c0_90, %c1_91, %c1_92, %c0_93] : memref<1x10x10x8xbf16, #tpu.memory_space<vmem>>, vector<1x8x8x8xbf16>
    tpu.vector_store %arg13[%c0_90, %c1_91, %c1_92, %c0_93], %91 {strides = array<i32>} : memref<1x10x10x8xbf16, #tpu.memory_space<vmem>>, vector<1x8x8x8xbf16>,
    %cst_94 = arith.constant 0.000000e+00 : f32
    %93 = vector.broadcast %cst_94 : f32 to vector<64x8xf32>
    %c0_95 = arith.constant 0 : index
    %c0_96 = arith.constant 0 : index
    %c0_97 = arith.constant 0 : index
    %c0_98 = arith.constant 0 : index
    %94 = vector.load %arg13[%c0_95, %c0_96, %c0_97, %c0_98] : memref<1x10x10x8xbf16, #tpu.memory_space<vmem>>, vector<1x8x8x8xbf16>
    %95 = vector.shape_cast %94 : vector<1x8x8x8xbf16> to vector<8x8x8xbf16>
    %96 = vector.shape_cast %95 : vector<8x8x8xbf16> to vector<64x8xbf16>
    %c0_99 = arith.constant 0 : index
    %c0_100 = arith.constant 0 : index
    %c0_101 = arith.constant 0 : index
    %97 = vector.load %arg5[%c0_99, %c0_100, %c0_101] : memref<9x8x8xbf16, #tpu.memory_space<vmem>>, vector<1x8x8xbf16>
    %98 = vector.shape_cast %97 : vector<1x8x8xbf16> to vector<8x8xbf16>
    %cst_102 = arith.constant dense<0.000000e+00> : vector<64x8xf32>
    %99 = tpu.matmul %96, %98, %cst_102 {dimension_numbers = #tpu.dot_dimension_numbers<[1], [0], [0], [1], [0, 0, 1, 1], [], []>} : vector<64x8xbf16>, vector<8x8xbf16>, vector<64x8xf32> -> vector<64x8xf32>
    %100 = arith.addf %93, %99 : vector<64x8xf32>
    %c0_103 = arith.constant 0 : index
    %c0_104 = arith.constant 0 : index
    %c1_105 = arith.constant 1 : index
    %c0_106 = arith.constant 0 : index
    %101 = vector.load %arg13[%c0_103, %c0_104, %c1_105, %c0_106] : memref<1x10x10x8xbf16, #tpu.memory_space<vmem>>, vector<1x8x8x8xbf16>
    %102 = vector.shape_cast %101 : vector<1x8x8x8xbf16> to vector<8x8x8xbf16>
    %103 = vector.shape_cast %102 : vector<8x8x8xbf16> to vector<64x8xbf16>
    %c1_107 = arith.constant 1 : index
    %c0_108 = arith.constant 0 : index
    %c0_109 = arith.constant 0 : index
    %104 = vector.load %arg5[%c1_107, %c0_108, %c0_109] : memref<9x8x8xbf16, #tpu.memory_space<vmem>>, vector<1x8x8xbf16>
    %105 = vector.shape_cast %104 : vector<1x8x8xbf16> to vector<8x8xbf16>
    %cst_110 = arith.constant dense<0.000000e+00> : vector<64x8xf32>
    %106 = tpu.matmul %103, %105, %cst_110 {dimension_numbers = #tpu.dot_dimension_numbers<[1], [0], [0], [1], [0, 0, 1, 1], [], []>} : vector<64x8xbf16>, vector<8x8xbf16>, vector<64x8xf32> -> vector<64x8xf32>
    %107 = arith.addf %100, %106 : vector<64x8xf32>
    %c0_111 = arith.constant 0 : index
    %c0_112 = arith.constant 0 : index
    %c2_113 = arith.constant 2 : index
    %c0_114 = arith.constant 0 : index
    %108 = vector.load %arg13[%c0_111, %c0_112, %c2_113, %c0_114] : memref<1x10x10x8xbf16, #tpu.memory_space<vmem>>, vector<1x8x8x8xbf16>
    %109 = vector.shape_cast %108 : vector<1x8x8x8xbf16> to vector<8x8x8xbf16>
    %110 = vector.shape_cast %109 : vector<8x8x8xbf16> to vector<64x8xbf16>
    %c2_115 = arith.constant 2 : index
    %c0_116 = arith.constant 0 : index
    %c0_117 = arith.constant 0 : index
    %111 = vector.load %arg5[%c2_115, %c0_116, %c0_117] : memref<9x8x8xbf16, #tpu.memory_space<vmem>>, vector<1x8x8xbf16>
    %112 = vector.shape_cast %111 : vector<1x8x8xbf16> to vector<8x8xbf16>
    %cst_118 = arith.constant dense<0.000000e+00> : vector<64x8xf32>
    %113 = tpu.matmul %110, %112, %cst_118 {dimension_numbers = #tpu.dot_dimension_numbers<[1], [0], [0], [1], [0, 0, 1, 1], [], []>} : vector<64x8xbf16>, vector<8x8xbf16>, vector<64x8xf32> -> vector<64x8xf32>
    %114 = arith.addf %107, %113 : vector<64x8xf32>
    %c0_119 = arith.constant 0 : index
    %c1_120 = arith.constant 1 : index
    %c0_121 = arith.constant 0 : index
    %c0_122 = arith.constant 0 : index
    %115 = vector.load %arg13[%c0_119, %c1_120, %c0_121, %c0_122] : memref<1x10x10x8xbf16, #tpu.memory_space<vmem>>, vector<1x8x8x8xbf16>
    %116 = vector.shape_cast %115 : vector<1x8x8x8xbf16> to vector<8x8x8xbf16>
    %117 = vector.shape_cast %116 : vector<8x8x8xbf16> to vector<64x8xbf16>
    %c3_123 = arith.constant 3 : index
    %c0_124 = arith.constant 0 : index
    %c0_125 = arith.constant 0 : index
    %118 = vector.load %arg5[%c3_123, %c0_124, %c0_125] : memref<9x8x8xbf16, #tpu.memory_space<vmem>>, vector<1x8x8xbf16>
    %119 = vector.shape_cast %118 : vector<1x8x8xbf16> to vector<8x8xbf16>
    %cst_126 = arith.constant dense<0.000000e+00> : vector<64x8xf32>
    %120 = tpu.matmul %117, %119, %cst_126 {dimension_numbers = #tpu.dot_dimension_numbers<[1], [0], [0], [1], [0, 0, 1, 1], [], []>} : vector<64x8xbf16>, vector<8x8xbf16>, vector<64x8xf32> -> vector<64x8xf32>
    %121 = arith.addf %114, %120 : vector<64x8xf32>
    %c0_127 = arith.constant 0 : index
    %c1_128 = arith.constant 1 : index
    %c1_129 = arith.constant 1 : index
    %c0_130 = arith.constant 0 : index
    %122 = vector.load %arg13[%c0_127, %c1_128, %c1_129, %c0_130] : memref<1x10x10x8xbf16, #tpu.memory_space<vmem>>, vector<1x8x8x8xbf16>
    %123 = vector.shape_cast %122 : vector<1x8x8x8xbf16> to vector<8x8x8xbf16>
    %124 = vector.shape_cast %123 : vector<8x8x8xbf16> to vector<64x8xbf16>
    %c4_131 = arith.constant 4 : index
    %c0_132 = arith.constant 0 : index
    %c0_133 = arith.constant 0 : index
    %125 = vector.load %arg5[%c4_131, %c0_132, %c0_133] : memref<9x8x8xbf16, #tpu.memory_space<vmem>>, vector<1x8x8xbf16>
    %126 = vector.shape_cast %125 : vector<1x8x8xbf16> to vector<8x8xbf16>
    %cst_134 = arith.constant dense<0.000000e+00> : vector<64x8xf32>
    %127 = tpu.matmul %124, %126, %cst_134 {dimension_numbers = #tpu.dot_dimension_numbers<[1], [0], [0], [1], [0, 0, 1, 1], [], []>} : vector<64x8xbf16>, vector<8x8xbf16>, vector<64x8xf32> -> vector<64x8xf32>
    %128 = arith.addf %121, %127 : vector<64x8xf32>
    %c0_135 = arith.constant 0 : index
    %c1_136 = arith.constant 1 : index
    %c2_137 = arith.constant 2 : index
    %c0_138 = arith.constant 0 : index
    %129 = vector.load %arg13[%c0_135, %c1_136, %c2_137, %c0_138] : memref<1x10x10x8xbf16, #tpu.memory_space<vmem>>, vector<1x8x8x8xbf16>
    %130 = vector.shape_cast %129 : vector<1x8x8x8xbf16> to vector<8x8x8xbf16>
    %131 = vector.shape_cast %130 : vector<8x8x8xbf16> to vector<64x8xbf16>
    %c5_139 = arith.constant 5 : index
    %c0_140 = arith.constant 0 : index
    %c0_141 = arith.constant 0 : index
    %132 = vector.load %arg5[%c5_139, %c0_140, %c0_141] : memref<9x8x8xbf16, #tpu.memory_space<vmem>>, vector<1x8x8xbf16>
    %133 = vector.shape_cast %132 : vector<1x8x8xbf16> to vector<8x8xbf16>
    %cst_142 = arith.constant dense<0.000000e+00> : vector<64x8xf32>
    %134 = tpu.matmul %131, %133, %cst_142 {dimension_numbers = #tpu.dot_dimension_numbers<[1], [0], [0], [1], [0, 0, 1, 1], [], []>} : vector<64x8xbf16>, vector<8x8xbf16>, vector<64x8xf32> -> vector<64x8xf32>
    %135 = arith.addf %128, %134 : vector<64x8xf32>
    %c0_143 = arith.constant 0 : index
    %c2_144 = arith.constant 2 : index
    %c0_145 = arith.constant 0 : index
    %c0_146 = arith.constant 0 : index
    %136 = vector.load %arg13[%c0_143, %c2_144, %c0_145, %c0_146] : memref<1x10x10x8xbf16, #tpu.memory_space<vmem>>, vector<1x8x8x8xbf16>
    %137 = vector.shape_cast %136 : vector<1x8x8x8xbf16> to vector<8x8x8xbf16>
    %138 = vector.shape_cast %137 : vector<8x8x8xbf16> to vector<64x8xbf16>
    %c6_147 = arith.constant 6 : index
    %c0_148 = arith.constant 0 : index
    %c0_149 = arith.constant 0 : index
    %139 = vector.load %arg5[%c6_147, %c0_148, %c0_149] : memref<9x8x8xbf16, #tpu.memory_space<vmem>>, vector<1x8x8xbf16>
    %140 = vector.shape_cast %139 : vector<1x8x8xbf16> to vector<8x8xbf16>
    %cst_150 = arith.constant dense<0.000000e+00> : vector<64x8xf32>
    %141 = tpu.matmul %138, %140, %cst_150 {dimension_numbers = #tpu.dot_dimension_numbers<[1], [0], [0], [1], [0, 0, 1, 1], [], []>} : vector<64x8xbf16>, vector<8x8xbf16>, vector<64x8xf32> -> vector<64x8xf32>
    %142 = arith.addf %135, %141 : vector<64x8xf32>
    %c0_151 = arith.constant 0 : index
    %c2_152 = arith.constant 2 : index
    %c1_153 = arith.constant 1 : index
    %c0_154 = arith.constant 0 : index
    %143 = vector.load %arg13[%c0_151, %c2_152, %c1_153, %c0_154] : memref<1x10x10x8xbf16, #tpu.memory_space<vmem>>, vector<1x8x8x8xbf16>
    %144 = vector.shape_cast %143 : vector<1x8x8x8xbf16> to vector<8x8x8xbf16>
    %145 = vector.shape_cast %144 : vector<8x8x8xbf16> to vector<64x8xbf16>
    %c7_155 = arith.constant 7 : index
    %c0_156 = arith.constant 0 : index
    %c0_157 = arith.constant 0 : index
    %146 = vector.load %arg5[%c7_155, %c0_156, %c0_157] : memref<9x8x8xbf16, #tpu.memory_space<vmem>>, vector<1x8x8xbf16>
    %147 = vector.shape_cast %146 : vector<1x8x8xbf16> to vector<8x8xbf16>
    %cst_158 = arith.constant dense<0.000000e+00> : vector<64x8xf32>
    %148 = tpu.matmul %145, %147, %cst_158 {dimension_numbers = #tpu.dot_dimension_numbers<[1], [0], [0], [1], [0, 0, 1, 1], [], []>} : vector<64x8xbf16>, vector<8x8xbf16>, vector<64x8xf32> -> vector<64x8xf32>
    %149 = arith.addf %142, %148 : vector<64x8xf32>
    %c0_159 = arith.constant 0 : index
    %c2_160 = arith.constant 2 : index
    %c2_161 = arith.constant 2 : index
    %c0_162 = arith.constant 0 : index
    %150 = vector.load %arg13[%c0_159, %c2_160, %c2_161, %c0_162] : memref<1x10x10x8xbf16, #tpu.memory_space<vmem>>, vector<1x8x8x8xbf16>
    %151 = vector.shape_cast %150 : vector<1x8x8x8xbf16> to vector<8x8x8xbf16>
    %152 = vector.shape_cast %151 : vector<8x8x8xbf16> to vector<64x8xbf16>
    %c8_163 = arith.constant 8 : index
    %c0_164 = arith.constant 0 : index
    %c0_165 = arith.constant 0 : index
    %153 = vector.load %arg5[%c8_163, %c0_164, %c0_165] : memref<9x8x8xbf16, #tpu.memory_space<vmem>>, vector<1x8x8xbf16>
    %154 = vector.shape_cast %153 : vector<1x8x8xbf16> to vector<8x8xbf16>
    %cst_166 = arith.constant dense<0.000000e+00> : vector<64x8xf32>
    %155 = tpu.matmul %152, %154, %cst_166 {dimension_numbers = #tpu.dot_dimension_numbers<[1], [0], [0], [1], [0, 0, 1, 1], [], []>} : vector<64x8xbf16>, vector<8x8xbf16>, vector<64x8xf32> -> vector<64x8xf32>
    %156 = arith.addf %149, %155 : vector<64x8xf32>
    %c0_167 = arith.constant 0 : index
    %c0_168 = arith.constant 0 : index
    %c0_169 = arith.constant 0 : index
    %c0_170 = arith.constant 0 : index
    %157 = vector.load %arg3[%c0_167, %c0_168, %c0_169, %c0_170] : memref<1x8x8x4xbf16, #tpu.memory_space<vmem>>, vector<1x8x8x4xbf16>
    %158 = vector.shape_cast %157 : vector<1x8x8x4xbf16> to vector<64x4xbf16>
    %c0_171 = arith.constant 0 : index
    %c0_172 = arith.constant 0 : index
    %159 = vector.load %arg6[%c0_171, %c0_172] : memref<4x8xbf16, #tpu.memory_space<vmem>>, vector<4x8xbf16>
    %cst_173 = arith.constant dense<0.000000e+00> : vector<64x8xf32>
    %160 = tpu.matmul %158, %159, %cst_173 {dimension_numbers = #tpu.dot_dimension_numbers<[1], [0], [0], [1], [0, 0, 1, 1], [], []>} : vector<64x4xbf16>, vector<4x8xbf16>, vector<64x8xf32> -> vector<64x8xf32>
    %161 = arith.addf %156, %160 : vector<64x8xf32>
    %162 = vector.shape_cast %161 : vector<64x8xf32> to vector<1x8x8x8xf32>
    %c0_174 = arith.constant 0 : index
    %c0_175 = arith.constant 0 : index
    %c0_176 = arith.constant 0 : index
    %c0_177 = arith.constant 0 : index
    %163 = vector.load %arg11[%c0_174, %c0_175, %c0_176, %c0_177] : memref<1x8x8x8xf32, #tpu.memory_space<vmem>>, vector<1x8x8x8xf32>
    tpu.vector_store %arg11[%c0_174, %c0_175, %c0_176, %c0_177], %162 {strides = array<i32>} : memref<1x8x8x8xf32, #tpu.memory_space<vmem>>, vector<1x8x8x8xf32>,
    return
  }
  func.func @transform_0(%arg0: i32) -> (i32, i32, i32, i32) {
    %c0_i32 = arith.constant 0 : i32
    %c0_i32_0 = arith.constant 0 : i32
    %c0_i32_1 = arith.constant 0 : i32
    %c0_i32_2 = arith.constant 0 : i32
    return %arg0, %c0_i32, %c0_i32_0, %c0_i32_1 : i32, i32, i32, i32
  }
  func.func @transform_1(%arg0: i32) -> (i32, i32, i32, i32) {
    %c0_i32 = arith.constant 0 : i32
    %c0_i32_0 = arith.constant 0 : i32
    %c0_i32_1 = arith.constant 0 : i32
    %c0_i32_2 = arith.constant 0 : i32
    %c0_i32_3 = arith.constant 0 : i32
    return %c0_i32, %c0_i32_0, %c0_i32_1, %c0_i32_2 : i32, i32, i32, i32
  }
  func.func @transform_2(%arg0: i32) -> (i32, i32, i32, i32) {
    %c0_i32 = arith.constant 0 : i32
    %c0_i32_0 = arith.constant 0 : i32
    %c0_i32_1 = arith.constant 0 : i32
    %c0_i32_2 = arith.constant 0 : i32
    return %arg0, %c0_i32, %c0_i32_0, %c0_i32_1 : i32, i32, i32, i32
  }
  func.func @transform_3(%arg0: i32) -> (i32, i32, i32) {
    %c0_i32 = arith.constant 0 : i32
    %c0_i32_0 = arith.constant 0 : i32
    %c0_i32_1 = arith.constant 0 : i32
    %c0_i32_2 = arith.constant 0 : i32
    return %c0_i32, %c0_i32_0, %c0_i32_1 : i32, i32, i32
  }
  func.func @transform_4(%arg0: i32) -> (i32, i32, i32) {
    %c0_i32 = arith.constant 0 : i32
    %c0_i32_0 = arith.constant 0 : i32
    %c0_i32_1 = arith.constant 0 : i32
    %c0_i32_2 = arith.constant 0 : i32
    return %c0_i32, %c0_i32_0, %c0_i32_1 : i32, i32, i32
  }
  func.func @transform_5(%arg0: i32) -> (i32, i32) {
    %c0_i32 = arith.constant 0 : i32
    %c0_i32_0 = arith.constant 0 : i32
    %c0_i32_1 = arith.constant 0 : i32
    return %c0_i32, %c0_i32_0 : i32, i32
  }
  func.func @transform_6(%arg0: i32) -> (i32, i32) {
    %c0_i32 = arith.constant 0 : i32
    %c0_i32_0 = arith.constant 0 : i32
    %c0_i32_1 = arith.constant 0 : i32
    return %c0_i32, %c0_i32_0 : i32, i32
  }
  func.func @transform_7(%arg0: i32) -> (i32, i32) {
    %c0_i32 = arith.constant 0 : i32
    %c0_i32_0 = arith.constant 0 : i32
    %c0_i32_1 = arith.constant 0 : i32
    return %c0_i32, %c0_i32_0 : i32, i32
  }
  func.func @transform_8(%arg0: i32) -> (i32, i32) {
    %c0_i32 = arith.constant 0 : i32
    %c0_i32_0 = arith.constant 0 : i32
    %c0_i32_1 = arith.constant 0 : i32
    return %c0_i32, %c0_i32_0 : i32, i32
  }
  func.func @transform_9(%arg0: i32) -> (i32, i32) {
    %c0_i32 = arith.constant 0 : i32
    %c0_i32_0 = arith.constant 0 : i32
    %c0_i32_1 = arith.constant 0 : i32
    return %c0_i32, %c0_i32_0 : i32, i32
  }
  func.func @transform_10(%arg0: i32) -> (i32, i32, i32, i32) {
    %c0_i32 = arith.constant 0 : i32
    %c0_i32_0 = arith.constant 0 : i32
    %c0_i32_1 = arith.constant 0 : i32
    %c0_i32_2 = arith.constant 0 : i32
    return %arg0, %c0_i32, %c0_i32_0, %c0_i32_1 : i32, i32, i32, i32
  }
}

</mosaic_0001>

<bundles_post_ra>
// kernel: wide_basic_block_forward.1
= control target key start
LH: loop header
LB: loop body
LE: loop exit
PB: predicated region body
PF: predicated region fallthrough
CT: control target
= control target key end

     0   :  { %s4419_s13 = smov 0   ;;  %s6094_s0 = inlined_call_operand.vmem [shape: f32[8,9,9,4], index: 0, kind: input, shape index: {}]   ;;  %s6095_s1 = inlined_call_operand.vmem [shape: f32[4,9,9,1], index: 1, kind: input, shape index: {}]   ;;  %s6096_s2 = inlined_call_operand.vmem [shape: bf16[2,8,8,4], index: 2, kind: input, shape index: {}]   ;;  %s6097_s3 = inlined_call_operand.vmem [shape: bf16[9,4,8], index: 3, kind: input, shape index: {}]   ;;  %s6098_s4 = inlined_call_operand.vmem [shape: bf16[9,8,8], index: 4, kind: input, shape index: {}]   ;;  %s6099_s5 = inlined_call_operand.vmem [shape: bf16[4,8], index: 5, kind: input, shape index: {}]   ;;  %s6100_s6 = inlined_call_operand.vmem [shape: f32[1,4], index: 6, kind: input, shape index: {}]   ;;  %s6101_s7 = inlined_call_operand.vmem [shape: f32[1,4], index: 7, kind: input, shape index: {}]   ;;  %s6102_s8 = inlined_call_operand.vmem [shape: f32[1,8], index: 8, kind: input, shape index: {}]   ;;  %s6103_s9 = inlined_call_operand.vmem [shape: f32[1,8], index: 9, kind: input, shape index: {}]   ;;  %s6104_s10 = inlined_call_operand.vmem [shape: f32[2,8,8,8], index: 10, kind: output, shape index: {}]  }
   0x1 LB: > { %s4425_s14 = sadd.s32 4294967295, %s4361_s13   ;;  %p4004_p0 = scmp.ge.s32.totalorder %s4361_s13, 1  ;;  %s4361_s13 = sphi %s4419_s13, %s20_s13  }
   0x2   : > { %p324_p1 = scmp.lt.s32.totalorder %s4361_s13, 3 }
   0x4   : > { %p325_p2 = pnand %p4004_p0, %p324_p1 }
   0x5   : > { %s4005_s27 = sshll.u32 (!%p325_p2), %s4425_s14, 2  ;;  %p375_p4 = scmp.lt.s32.totalorder (!%p325_p2), %s4425_s14, 1 }
   0x6   : > { %328 = sbr.rel (%p325_p2) target bundleno = 759 (0x2f7), region = 60  ;;  %p369_p3 = scmp.lt.s32.totalorder (!%p325_p2), %s4005_s27, 7 }
   0xb   : > { %v708_v0 = vld [vmem:[%s6095_s1 + $0xd0] sm:$0xff]  ;;  %v4363_v3 = vmov 0   ;;  %v710_v4 = vld [vmem:[%s6095_s1 + $0xe0] sm:$0xff]  ;;  %v683_v7 = vld [vmem:[%s6095_s1 + $0x8] sm:$0x1]  ;;  %s6116_s27 = smov (!%p369_p3, %s4005_s27), 7 }
   0xc   : > { %v704_v1 = vld [vmem:[%s6095_s1 + $0xb0] sm:$0xff]  ;;  %4346 = vset.pattern.permute.xlu2 %v4363_v3  ;;  %4345 = vset.pattern.permute.xlu1 %v4363_v3  ;;  %v706_v5 = vld [vmem:[%s6095_s1 + $0xc0] sm:$0xff]  ;;  %v685_v12 = vld [vmem:[%s6095_s1 + $0x18] sm:$0x1]  ;;  %s4334_s22 = smul.u32 144, %s6116_s27  ;;  %vm1258_vm0 = vcmask 27648  }
   0xd   : > { %v700_v2 = vld [vmem:[%s6095_s1 + $0x90] sm:$0xff]  ;;  %4344 = vset.pattern.permute.xlu0 %v4363_v3  ;;  %886 = vperm.xlu2 %4346, %v708_v0   ;;  %v702_v6 = vld [vmem:[%s6095_s1 + $0xa0] sm:$0xff]  ;;  %v689_v16 = vld [vmem:[%s6095_s1 + $0x38] sm:$0x1]  ;;  %vm1459_vm1 = vcmask 1041408   ;;  %vm1260_vm2 = vcmask 24576  }
   0xe   : > { %866 = vperm.xlu0 %4344, %v704_v1   ;;  %846 = vperm.xlu1 %4345, %v700_v2   ;;  %v684_v8 = vld [vmem:[%s6095_s1 + $0x10] sm:$0xff]  ;;  %v682_v9 = vld [vmem:[%s6095_s1] sm:$0xff]  ;;  %v687_v17 = vld [vmem:[%s6095_s1 + $0x28] sm:$0x1]  ;;  %s4526_s25 = scalar_lea.vmem %s6094_s0, %s4334_s22  ;;  %vm1261_vm3 = vsmask.f32 256 }
   0xf   : > { %v714_v10 = vld [vmem:[%s6095_s1 + $0x100] sm:$0xff]  ;;  %v712_v11 = vld [vmem:[%s6095_s1 + $0xf0] sm:$0xff]  ;;  %v693_v26 = vld [vmem:[%s6095_s1 + $0x58] sm:$0x1]  ;;  %vm1446_vm5 = vcmask 31744   ;;  %vm2825_vm9 = vcmask 1043456  }
  0x10   : > { %v686_v13 = vld [vmem:[%s6095_s1 + $0x20] sm:$0xff]  ;;  %v720_v14 = vld [vmem:[%s6095_s1 + $0x130] sm:$0xff]  ;;  %v691_v27 = vld [vmem:[%s6095_s1 + $0x48] sm:$0x1]  ;;  %vm1572_vm6 = vsmask.f32 3328 }
  0x11   : > { %v718_v15 = vld [vmem:[%s6095_s1 + $0x120] sm:$0xff]  ;;  %v688_v18 = vld [vmem:[%s6095_s1 + $0x30] sm:$0xff]  ;;  %v695_v32 = vld [vmem:[%s6095_s1 + $0x68] sm:$0x1]  ;;  %vm1573_vm7 = vsmask.f32 7440 }
  0x12   : > { %v722_v19 = vld [vmem:[%s6095_s1 + $0x140] sm:$0xff]  ;;  %v736_v21 = vld [vmem:[%s6095_s1 + $0x1b0] sm:$0xff]  ;;  %v697_v42 = vld [vmem:[%s6095_s1 + $0x78] sm:$0x1]  ;;  %vm2505_vm10 = vcmask 60416   ;;  %vm2507_vm11 = vcmask 57344  }
  0x13   : > { %v738_v20 = vld [vmem:[%s6095_s1 + $0x1c0] sm:$0xff]  ;;  %v692_v22 = vld [vmem:[%s6095_s1 + $0x50] sm:$0xff]  ;;  %v387_v48 = vld [vmem:[%s4526_s25 + $0x8] sm:$0x1]  ;;  %2509 = vst.msk [vmem:[#allocation3 + $0x8] sm:$0xf] %vm2505_vm10, %v4363_v3 }
  0x14   : > { %v690_v23 = vld [vmem:[%s6095_s1 + $0x40] sm:$0xff]  ;;  %v724_v24 = vld [vmem:[%s6095_s1 + $0x150] sm:$0xff]  ;;  %v721_v60 = vld [vmem:[%s6095_s1 + $0x138] sm:$0x1]  ;;  %2510 = vst.msk [vmem:[#allocation3 + $0xc] sm:$0x1] %vm2507_vm11, %v4363_v3 }
  0x15   : > { %896 = vperm.xlu2 %4346, %v710_v4   ;;  %v740_v25 = vld [vmem:[%s6095_s1 + $0x1d0] sm:$0xff]  ;;  %v726_v29 = vld [vmem:[%s6095_s1 + $0x160] sm:$0xff]  ;;  %v719_v63 = vld [vmem:[%s6095_s1 + $0x128] sm:$0x1]  ;;  %2506 = vst.msk [vmem:[#allocation3] sm:$0xf] %vm2505_vm10, %v4363_v3 }
  0x16   : > { %876 = vperm.xlu0 %4344, %v706_v5   ;;  %856 = vperm.xlu1 %4345, %v702_v6   ;;  %v728_v28 = vld [vmem:[%s6095_s1 + $0x170] sm:$0xff]  ;;  %v742_v30 = vld [vmem:[%s6095_s1 + $0x1e0] sm:$0xff]  ;;  %vm4600_vm4 = vmand %vm1260_vm2, %vm1261_vm3  ;;  %2508 = vst.msk [vmem:[#allocation3 + $0x4] sm:$0x1] %vm2507_vm11, %v4363_v3  ;;  %vm2617_vm12 = vsmask.f32 7938 }
  0x17   : > { %v412_v31 = vld [vmem:[%s4526_s25 + $0xd0] sm:$0xff]  ;;  %v4535_v33 = vld [vmem:[%s6100_s6] ss:$0 sm:$0xff]  ;;  %v4011_v4 = vld [vmem:[%s6097_s3 + $0x2] sm:$0x3]  ;;  %vm2946_vm15 = vcmask 1042432  }
  0x18   : > { %v696_v34 = vld [vmem:[%s6095_s1 + $0x70] sm:$0xff]  ;;  %v694_v35 = vld [vmem:[%s6095_s1 + $0x60] sm:$0xff]  ;;  %v488_v36 = vmul.f32 %v4535_v33, %v412_v31  ;;  %v463_v54 = vmul.f32 %v4535_v33, %v387_v48  ;;  %vm4823_vm8 = vmor %vm1572_vm6, %vm1573_vm7  ;;  %2511 = vst.msk [vmem:[#allocation3 + $0x10] sm:$0xf] %vm2505_vm10, %v4363_v3  ;;  %s6118_s14 = smov (!%p375_p4, %s4425_s14), 1 }
  0x19   : > { %v4547_v37 = vld [vmem:[%s6101_s7] ss:$0 sm:$0xff]  ;;  %v744_v41 = vld [vmem:[%s6095_s1 + $0x1f0] sm:$0xff]  ;;  %2512 = vst.msk [vmem:[#allocation3 + $0x14] sm:$0x1] %vm2507_vm11, %v4363_v3  ;;  %vm5647_vm13 = vmand %vm2505_vm10, %vm2617_vm12  ;;  %s4289_s26 = sshll.u32 %s6118_s14, 5 }
  0x1a   : > { %v564_v38 = vadd.f32 %v4547_v37, %v488_v36  ;;  %v414_v39 = vld [vmem:[%s4526_s25 + $0xe0] sm:$0xff]  ;;  %v748_v50 = vld [vmem:[%s6095_s1 + $0x210] sm:$0xff]  ;;  %v539_v57 = vadd.f32 %v4547_v37, %v463_v54  ;;  %2513 = vst.msk [vmem:[#allocation3 + $0x18] sm:$0xf] %vm2505_vm10, %v4363_v3  ;;  %vm5656_vm14 = vmand %vm2507_vm11, %vm1261_vm3  ;;  %vm2812_vm3 = vcmask 64512   ;;  %s5982_s30 = scalar_lea.vmem %s6096_s2, %s4289_s26  ;;  %s4290_s27 = sshll.u32 %s6118_s14, 6 }
  0x1b   : > { %v746_v40 = vld [vmem:[%s6095_s1 + $0x200] sm:$0xff]  ;;  %v490_v44 = vmul.f32 %v4535_v33, %v414_v39  ;;  %v732_v51 = vld [vmem:[%s6095_s1 + $0x190] sm:$0xff]  ;;  %2514 = vst.msk [vmem:[#allocation3 + $0x1c] sm:$0x1] %vm2507_vm11, %v4363_v3  ;;  %s6054_s15 = scalar_lea.vmem %s6104_s10, %s4290_s27 }
  0x1c   : > { %v636_v43 = vmax.f32 %v564_v38, 0.0  ;;  %v730_v52 = vld [vmem:[%s6095_s1 + $0x180] sm:$0xff]  ;;  %v408_v61 = vld [vmem:[%s4526_s25 + $0xb0] sm:$0xff]  ;;  %v611_v1 = vmax.f32 %v539_v57, 0.0  ;;  %2515 = vst.msk [vmem:[#allocation3 + $0x20] sm:$0xf] %vm2505_vm10, %v4363_v3 }
  0x1d   : > { %761 = vperm.xlu2 %4346, %v683_v7   ;;  %v566_v47 = vadd.f32 %v4547_v37, %v490_v44  ;;  %v418_v58 = vld [vmem:[%s4526_s25 + $0x100] sm:$0xff]  ;;  %v404_v62 = vld [vmem:[%s4526_s25 + $0x90] sm:$0xff]  ;;  %v484_v5 = vmul.f32 %v4535_v33, %v408_v61  ;;  %v1461_v7 = vsel %vm1459_vm1, %v4011_v4, 0  ;;  %v393_v44 = vld [vmem:[%s4526_s25 + $0x38] sm:$0x1] }
  0x1e   : > { %766 = vperm.xlu1 %4345, %v684_v8   ;;  %756 = vperm.xlu0 %4344, %v682_v9   ;;  %v750_v0 = vld [vmem:[%s6095_s1 + $0x220] sm:$0xff]  ;;  %v494_v2 = vmul.f32 %v4535_v33, %v418_v58  ;;  %v480_v6 = vmul.f32 %v4535_v33, %v404_v62  ;;  %v469_v54 = vmul.f32 %v4535_v33, %v393_v44 }
  0x1f   : > { %v638_v53 = vmax.f32 %v566_v47, 0.0  ;;  %1470 = vmatpush.bf16.msra.mxu0 %v1461_v7  ;;  %4331 = vmatpush.bf16.msra.mxu3 %v1461_v7  ;;  %v1263_v9 = vld [vmem:[#allocation2 + $0x4] sm:$0x1]  ;;  %v388_v47 = vld [vmem:[%s4526_s25 + $0x10] sm:$0xff]  ;;  %2516 = vst.msk [vmem:[#allocation3 + $0x24] sm:$0x1] %vm2507_vm11, %v4363_v3 }
  0x20   : > { %v386_v48 = vld [vmem:[%s4526_s25] sm:$0xff]  ;;  %v464_v57 = vmul.f32 %v4535_v33, %v388_v47  ;;  %v716_v7 = vld [vmem:[%s6095_s1 + $0x110] sm:$0xff]  ;;  %2517 = vst.msk [vmem:[#allocation3 + $0x28] sm:$0xf] %vm2505_vm10, %v4363_v3 }
  0x21   : > { %v462_v58 = vmul.f32 %v4535_v33, %v386_v48  ;;  %2518 = vst.msk [vmem:[#allocation3 + $0x2c] sm:$0x1] %vm2507_vm11, %v4363_v3 }
  0x22   : > { %v540_v4 = vadd.f32 %v4547_v37, %v464_v57  ;;  %2519 = vst.msk [vmem:[#allocation3 + $0x30] sm:$0xf] %vm2505_vm10, %v4363_v3 }
  0x23   : > { %2520 = vst.msk [vmem:[#allocation3 + $0x34] sm:$0x1] %vm2507_vm11, %v4363_v3 }
  0x24   : > { %2521 = vst.msk [vmem:[#allocation3 + $0x38] sm:$0xf] %vm2505_vm10, %v4363_v3 }
  0x25   : > { %916 = vperm.xlu2 %4346, %v714_v10   ;;  %2522 = vst.msk [vmem:[#allocation3 + $0x3c] sm:$0x1] %vm2507_vm11, %v4363_v3 }
  0x26   : > { %906 = vperm.xlu1 %4345, %v712_v11   ;;  %771 = vperm.xlu0 %4344, %v685_v12   ;;  %v570_v11 = vadd.f32 %v4547_v37, %v494_v2  ;;  %v4057_v12 = vld [vmem:[%s6097_s3 + $0x6] sm:$0x3]  ;;  %2523 = vst.msk [vmem:[#allocation3 + $0x40] sm:$0xf] %vm2505_vm10, %v4363_v3 }
  0x27   : > { %2524 = vst.msk [vmem:[#allocation3 + $0x44] sm:$0x1] %vm2507_vm11, %v4363_v3 }
  0x28   : > { %2525 = vst.msk [vmem:[#allocation3 + $0x48] sm:$0xf] %vm2505_vm10, %v4363_v3 }
  0x29   : > { %2526 = vst.msk [vmem:[#allocation3 + $0x4c] sm:$0x1] %vm2507_vm11, %v4363_v3  ;;  %v5630_v3 = vld [vmem:[%s6103_s9] ss:$0 sm:$0xff] }
  0x2d   : > { %776 = vperm.xlu2 %4346, %v686_v13  }
  0x2e   : > { %946 = vperm.xlu1 %4345, %v720_v14   ;;  %936 = vperm.xlu0 %4344, %v718_v15   ;;  %v560_v14 = vadd.f32 %v4547_v37, %v484_v5  ;;  %v556_v15 = vadd.f32 %v4547_v37, %v480_v6  ;;  %v538_v5 = vadd.f32 %v4547_v37, %v462_v58  ;;  %v444_v58 = vld [vmem:[%s4526_s25 + $0x1d0] sm:$0xff] }
  0x35   : > { %791 = vperm.xlu2 %4346, %v689_v16   ;;  %v410_v16 = vld [vmem:[%s4526_s25 + $0xc0] sm:$0xff] }
  0x36   : > { %781 = vperm.xlu1 %4345, %v687_v17   ;;  %786 = vperm.xlu0 %4344, %v688_v18   ;;  %v390_v17 = vld [vmem:[%s4526_s25 + $0x20] sm:$0xff]  ;;  %v1797_v18 = vsel %vm1459_vm1, %v4057_v12, 0  ;;  %v699_v12 = vld [vmem:[%s6095_s1 + $0x88] sm:$0x1] }
  0x37   : > { %1806 = vmatpush.bf16.msrb.mxu3 %v1797_v18  ;;  %v610_v18 = vmax.f32 %v538_v5, 0.0 }
  0x3d   : > { %956 = vperm.xlu2 %4346, %v722_v19  }
  0x3e   : > { %1036 = vperm.xlu1 %4345, %v738_v20   ;;  %1026 = vperm.xlu0 %4344, %v736_v21   ;;  %v727_v20 = vld [vmem:[%s6095_s1 + $0x168] sm:$0x1]  ;;  %v406_v21 = vld [vmem:[%s4526_s25 + $0xa0] sm:$0xff] }
  0x45   : > { %806 = vperm.xlu2 %4346, %v692_v22   ;;  %v725_v22 = vld [vmem:[%s6095_s1 + $0x158] sm:$0x1] }
  0x46   : > { %796 = vperm.xlu1 %4345, %v690_v23   ;;  %966 = vperm.xlu0 %4344, %v724_v24   ;;  %v723_v23 = vld [vmem:[%s6095_s1 + $0x148] sm:$0x1] }
  0x4d   : > { %1046 = vperm.xlu2 %4346, %v740_v25   ;;  %v642_v25 = vmax.f32 %v570_v11, 0.0 }
  0x4e   : > { %811 = vperm.xlu1 %4345, %v693_v26   ;;  %801 = vperm.xlu0 %4344, %v691_v27   ;;  %v486_v26 = vmul.f32 %v4535_v33, %v410_v16  ;;  %v466_v27 = vmul.f32 %v4535_v33, %v390_v17  ;;  %v612_v17 = vmax.f32 %v540_v4, 0.0 }
  0x50   : > { %v562_v38 = vadd.f32 %v4547_v37, %v486_v26  ;;  %v542_v39 = vadd.f32 %v4547_v37, %v466_v27  ;;  %v396_v27 = vld [vmem:[%s4526_s25 + $0x50] sm:$0xff] }
  0x55   : > { %986 = vperm.xlu2 %4346, %v728_v28   ;;  %v632_v28 = vmax.f32 %v560_v14, 0.0  ;;  %v698_v14 = vld [vmem:[%s6095_s1 + $0x80] sm:$0xff] }
  0x56   : > { %976 = vperm.xlu1 %4345, %v726_v29   ;;  %1056 = vperm.xlu0 %4344, %v742_v30   ;;  %v628_v29 = vmax.f32 %v556_v15, 0.0  ;;  %v482_v30 = vmul.f32 %v4535_v33, %v406_v21 }
  0x5d   : > { %821 = vperm.xlu2 %4346, %v695_v32   ;;  %v1414_v32 = vld [vmem:[%s6097_s3] sm:$0x3] }
  0x5e   : > { %826 = vperm.xlu1 %4345, %v696_v34   ;;  %816 = vperm.xlu0 %4344, %v694_v35  }
  0x65   : > { %1076 = vperm.xlu2 %4346, %v746_v40   ;;  %v1525_v40 = vsel %vm1459_vm1, %v1414_v32, 0 }
  0x66   : > { %1066 = vperm.xlu1 %4345, %v744_v41   ;;  %831 = vperm.xlu0 %4344, %v697_v42  }
  0x67   : > { %v887_v45 = vpop.permute.xlu2 %886  ;;  %1534 = vmatpush.bf16.msrb.mxu0 %v1525_v40  ;;  %4332 = vmatpush.bf16.msra.mxu1 %v1525_v40  ;;  %v422_v40 = vld [vmem:[%s4526_s25 + $0x120] sm:$0xff] }
  0x68   : > { %v1140_v46 = vmul.f32 %v887_v45, %v636_v43  ;;  %v558_v43 = vadd.f32 %v4547_v37, %v482_v30  ;;  %v1275_v30 = vld [vmem:[#allocation2 + $0x1c] sm:$0x1] }
  0x6a   : > { %v1212_v49 = vpack.c.bf16 %v1140_v46, %v1140_v46  ;;  %v733_v46 = vld [vmem:[%s6095_s1 + $0x198] sm:$0x1] }
  0x6c   : > { %1314 = vst.msk [vmem:[#allocation2 + $0x68] sm:$0xf] %vm1258_vm0, %v1212_v49 }
  0x6d   : > { %1086 = vperm.xlu2 %4346, %v748_v50  }
  0x6e   : > { %1006 = vperm.xlu1 %4345, %v732_v51   ;;  %996 = vperm.xlu0 %4344, %v730_v52   ;;  %v731_v51 = vld [vmem:[%s6095_s1 + $0x188] sm:$0x1]  ;;  %v729_v52 = vld [vmem:[%s6095_s1 + $0x178] sm:$0x1] }
  0x6f   : > { %v897_v55 = vpop.permute.xlu2 %896 }
  0x70   : > { %v1142_v56 = vmul.f32 %v897_v55, %v638_v53  ;;  %v614_v53 = vmax.f32 %v542_v39, 0.0  ;;  %v634_v55 = vmax.f32 %v562_v38, 0.0  ;;  %v703_v38 = vld [vmem:[%s6095_s1 + $0xa8] sm:$0x1]  ;;  %v705_v39 = vld [vmem:[%s6095_s1 + $0xb8] sm:$0x1] }
  0x72   : > { %v1214_v59 = vpack.c.bf16 %v1142_v56, %v1142_v56  ;;  %v630_v56 = vmax.f32 %v558_v43, 0.0  ;;  %v701_v43 = vld [vmem:[%s6095_s1 + $0x98] sm:$0x1] }
  0x74   : > { %1318 = vst.msk [vmem:[#allocation2 + $0x70] sm:$0xf] %vm1258_vm0, %v1214_v59 }
  0x75   : > { %951 = vperm.xlu2 %4346, %v721_v60  }
  0x76   : > { %941 = vperm.xlu1 %4345, %v719_v63   ;;  %1096 = vperm.xlu0 %4344, %v750_v0   ;;  %v545_v63 = vadd.f32 %v4547_v37, %v469_v54  ;;  %v426_v0 = vld [vmem:[%s4526_s25 + $0x140] sm:$0xff] }
  0x77   : > { %v762_v8 = vpop.permute.xlu2 %761  ;;  %v502_v15 = vmul.f32 %v4535_v33, %v426_v0 }
  0x78   : > { %v1115_v10 = vmul.f32 %v762_v8, %v611_v1  ;;  %v416_v8 = vld [vmem:[%s4526_s25 + $0xf0] sm:$0xff]  ;;  %v617_v16 = vmax.f32 %v545_v63, 0.0 }
  0x7a   : > { %v1187_v19 = vpack.c.bf16 %v1115_v10, %v1115_v10 }
  0x7c   : > { %v1264_v24 = vsel %vm4600_vm4, %v1187_v19, %v1263_v9  ;;  %v389_v9 = vld [vmem:[%s4526_s25 + $0x18] sm:$0x1]  ;;  %v492_v19 = vmul.f32 %v4535_v33, %v416_v8 }
  0x7d   : > { %1265 = vst [vmem:[#allocation2 + $0x4] sm:$0x1] %v1264_v24  ;;  %981 = vperm.xlu2 %4346, %v727_v20   ;;  %v465_v20 = vmul.f32 %v4535_v33, %v389_v9  ;;  %v1267_v9 = vld [vmem:[#allocation2 + $0xc] sm:$0x1] }
  0x7e   : > { %971 = vperm.xlu1 %4345, %v725_v22   ;;  %961 = vperm.xlu0 %4344, %v723_v23   ;;  %v578_v22 = vadd.f32 %v4547_v37, %v502_v15  ;;  %v4052_v23 = vld [vmem:[%s6097_s3 + $0x4] sm:$0x3]  ;;  %v568_v32 = vadd.f32 %v4547_v37, %v492_v19  ;;  %v709_v15 = vld [vmem:[%s6095_s1 + $0xd8] sm:$0x1] }
  0x7f   : > { %v917_v31 = vpop.permute.xlu2 %916  ;;  %v442_v19 = vld [vmem:[%s4526_s25 + $0x1c0] sm:$0xff] }
  0x80   : > { %v867_v34 = vpop.permute.xlu0 %866  ;;  %v847_v35 = vpop.permute.xlu1 %846  ;;  %v1146_v36 = vmul.f32 %v917_v31, %v642_v25  ;;  %v640_v54 = vmax.f32 %v568_v32, 0.0 }
  0x81   : > { %v1136_v41 = vmul.f32 %v867_v34, %v632_v28  ;;  %v1132_v42 = vmul.f32 %v847_v35, %v628_v29  ;;  %v1714_v28 = vsel %vm1459_vm1, %v4052_v23, 0  ;;  %v541_v34 = vadd.f32 %v4547_v37, %v465_v20  ;;  %v424_v35 = vld [vmem:[%s4526_s25 + $0x130] sm:$0xff] }
  0x82   : > { %v1218_v45 = vpack.c.bf16 %v1146_v36, %v1146_v36  ;;  %4333 = vmatpush.bf16.msra.mxu2 %v1714_v28  ;;  %v432_v20 = vld [vmem:[%s4526_s25 + $0x170] sm:$0xff] }
  0x83   : > { %v1208_v49 = vpack.c.bf16 %v1136_v41, %v1136_v41  ;;  %v1204_v50 = vpack.c.bf16 %v1132_v42, %v1132_v42 }
  0x84   : > { %1326 = vst.msk [vmem:[#allocation2 + $0x80] sm:$0xf] %vm1258_vm0, %v1218_v45  ;;  %v650_v45 = vmax.f32 %v578_v22, 0.0 }
  0x85   : > { %1306 = vst.msk [vmem:[#allocation2 + $0x58] sm:$0xf] %vm1258_vm0, %v1208_v49  ;;  %1011 = vperm.xlu2 %4346, %v733_v46   ;;  %v472_v46 = vmul.f32 %v4535_v33, %v396_v27 }
  0x86   : > { %1298 = vst.msk [vmem:[#allocation2 + $0x48] sm:$0xf] %vm1258_vm0, %v1204_v50  ;;  %1001 = vperm.xlu1 %4345, %v731_v51   ;;  %991 = vperm.xlu0 %4344, %v729_v52   ;;  %v500_v50 = vmul.f32 %v4535_v33, %v424_v35  ;;  %v391_v51 = vld [vmem:[%s4526_s25 + $0x28] sm:$0x1]  ;;  %v508_v35 = vmul.f32 %v4535_v33, %v432_v20  ;;  %v397_v20 = vld [vmem:[%s4526_s25 + $0x58] sm:$0x1] }
  0x87   : > { %v777_v59 = vpop.permute.xlu2 %776 }
  0x88   : > { %v877_v60 = vpop.permute.xlu0 %876  ;;  %v857_v61 = vpop.permute.xlu1 %856  ;;  %v1118_v62 = vmul.f32 %v777_v59, %v614_v53 }
  0x89   : > { %v1138_v1 = vmul.f32 %v877_v60, %v634_v55  ;;  %v1134_v2 = vmul.f32 %v857_v61, %v630_v56  ;;  %v613_v55 = vmax.f32 %v541_v34, 0.0  ;;  %v498_v56 = vmul.f32 %v4535_v33, %v422_v40 }
  0x8a   : > { %v1190_v6 = vpack.c.bf16 %v1118_v62, %v1118_v62  ;;  %v548_v60 = vadd.f32 %v4547_v37, %v472_v46  ;;  %v467_v61 = vmul.f32 %v4535_v33, %v391_v51  ;;  %v392_v62 = vld [vmem:[%s4526_s25 + $0x30] sm:$0xff]  ;;  %v518_v34 = vmul.f32 %v4535_v33, %v442_v19 }
  0x8b   : > { %v1210_v10 = vpack.c.bf16 %v1138_v1, %v1138_v1  ;;  %v1206_v11 = vpack.c.bf16 %v1134_v2, %v1134_v2  ;;  %v576_v2 = vadd.f32 %v4547_v37, %v500_v50 }
  0x8c   : > { %1270 = vst.msk [vmem:[#allocation2 + $0x10] sm:$0xf] %vm1258_vm0, %v1190_v6  ;;  %v4018_v48 = vld [vmem:[#allocation2 + $0x58] sm:$0xf]  ;;  %v574_v6 = vadd.f32 %v4547_v37, %v498_v56  ;;  %v399_v56 = vld [vmem:[%s4526_s25 + $0x68] sm:$0x1] }
  0x8d   : > { %1310 = vst.msk [vmem:[#allocation2 + $0x60] sm:$0xf] %vm1258_vm0, %v1210_v10  ;;  %926 = vperm.xlu2 %4346, %v716_v7   ;;  %v4014_v44 = vld [vmem:[#allocation2 + $0x48] sm:$0xf]  ;;  %v520_v7 = vmul.f32 %v4535_v33, %v444_v58  ;;  %v648_v23 = vmax.f32 %v576_v2, 0.0 }
  0x8e   : > { %1302 = vst.msk [vmem:[#allocation2 + $0x50] sm:$0xf] %vm1258_vm0, %v1206_v11  ;;  %841 = vperm.xlu1 %4345, %v699_v12   ;;  %836 = vperm.xlu0 %4344, %v698_v14   ;;  %v711_v10 = vld [vmem:[%s6095_s1 + $0xe8] sm:$0x1]  ;;  %v468_v11 = vmul.f32 %v4535_v33, %v392_v62 }
  0x8f   : > { %v792_v21 = vpop.permute.xlu2 %791  ;;  %v4078_v2 = vld [vmem:[%s6097_s3 + $0x8] sm:$0x3] }
  0x90   : > { %v767_v24 = vpop.permute.xlu1 %766  ;;  %v1121_v25 = vmul.f32 %v792_v21, %v617_v16  ;;  %v757_v26 = vpop.permute.xlu0 %756  ;;  %v707_v16 = vld [vmem:[%s6095_s1 + $0xc8] sm:$0x1]  ;;  %v4731_v27 = vadd.f32 %v4547_v37, %v468_v11  ;;  %v1880_v19 = vsel %vm1459_vm1, %v4078_v2, 0 }
  0x91   : > { %v1116_v29 = vmul.f32 %v767_v24, %v612_v17  ;;  %v1114_v31 = vmul.f32 %v757_v26, %v610_v18  ;;  %v620_v17 = vmax.f32 %v548_v60, 0.0  ;;  %v4717_v18 = vadd.f32 %v4547_v37, %v467_v61 }
  0x92   : > { %v1193_v36 = vpack.c.bf16 %v1121_v25, %v1121_v25  ;;  %v646_v24 = vmax.f32 %v574_v6, 0.0  ;;  %v4725_v25 = vld [vmem:[#allocation2 + $0x68] sm:$0xf]  ;;  %v4728_v26 = vadd.f32 %v4547_v37, %v520_v7 }
  0x93   : > { %v1188_v41 = vpack.c.bf16 %v1116_v29, %v1116_v29  ;;  %v1186_v42 = vpack.c.bf16 %v1114_v31, %v1114_v31  ;;  %v4297_v31 = vld [vmem:[#allocation2 + $0x6c] sm:$0xf0]  ;;  %v615_v32 = vmax.f32 %v4717_v18, 0.0 }
  0x94   : > { %v1276_v47 = vsel %vm4600_vm4, %v1193_v36, %v1275_v30  ;;  %v4296_v49 = vld [vmem:[#allocation2 + $0x5c] sm:$0xf0]  ;;  %v668_v50 = vmax.f32 %v4728_v26, 0.0 }
  0x95   : > { %1266 = vst.msk [vmem:[#allocation2 + $0x8] sm:$0xf] %vm1258_vm0, %v1188_v41  ;;  %871 = vperm.xlu2 %4346, %v705_v39   ;;  %v4295_v52 = vld [vmem:[#allocation2 + $0x4c] sm:$0xf0]  ;;  %v4019_v53 = vor.u32 %v4296_v49, %v4018_v48  ;;  %v717_v48 = vld [vmem:[%s6095_s1 + $0x118] sm:$0x1] }
  0x96   : > { %1277 = vst [vmem:[#allocation2 + $0x1c] sm:$0x1] %v1276_v47  ;;  %861 = vperm.xlu1 %4345, %v703_v38   ;;  %851 = vperm.xlu0 %4344, %v701_v43   ;;  %v4015_v57 = vor.u32 %v4295_v52, %v4014_v44  ;;  %v1560_v38 = vld [vmem:[#allocation2 + $0x10] sm:$0xf]  ;;  %v715_v47 = vld [vmem:[%s6095_s1 + $0x108] sm:$0x1] }
  0x97   : > { %1259 = vst.msk [vmem:[#allocation2] sm:$0xf] %vm1258_vm0, %v1186_v42  ;;  %4029 = vmatmul.msk.bf16.vlgmr.msra.gmra.mxu3 %vm1446_vm5, %v4019_v53  ;;  %v957_v59 = vpop.permute.xlu2 %956  ;;  %v713_v49 = vld [vmem:[%s6095_s1 + $0xf8] sm:$0x1]  ;;  %v4748_v52 = vld [vmem:[#allocation2 + $0x4] sm:$0x1] }
  0x98   : > { %4028 = vmatmul.msk.bf16.vlgmr.msra.gmra.mxu0 %vm1446_vm5, %v4015_v57  ;;  %v907_v63 = vpop.permute.xlu1 %906  ;;  %v1154_v0 = vmul.f32 %v957_v59, %v650_v45  ;;  %v772_v1 = vpop.permute.xlu0 %771  ;;  %v428_v57 = vld [vmem:[%s4526_s25 + $0x150] sm:$0xff]  ;;  %v1604_v58 = vshrl.u32 %v1560_v38, 16  ;;  %v1607_v59 = vshll.u32 %v1560_v38, 16  ;;  %v473_v38 = vmul.f32 %v4535_v33, %v397_v20 }
  0x99   : > { %v1144_v4 = vmul.f32 %v907_v63, %v640_v54  ;;  %v1117_v5 = vmul.f32 %v772_v1, %v613_v55  ;;  %1723 = vmatpush.bf16.msra.mxu0 %v1714_v28  ;;  %v440_v28 = vld [vmem:[%s4526_s25 + $0x1b0] sm:$0xff]  ;;  %v4023_v54 = vor.u32 %v4297_v31, %v4725_v25  ;;  %v394_v55 = vld [vmem:[%s4526_s25 + $0x40] sm:$0xff]  ;;  %v4758_v1 = vadd.f32 %v4547_v37, %v508_v35 }
  0x9a   : > { %v1226_v8 = vpack.c.bf16 %v1154_v0, %v1154_v0  ;;  %v516_v51 = vmul.f32 %v4535_v33, %v440_v28  ;;  %v4755_v0 = vadd.f32 %v4547_v37, %v518_v34  ;;  %v470_v11 = vmul.f32 %v4535_v33, %v394_v55  ;;  %v4125_v34 = vld [vmem:[%s6097_s3 + $0xe] sm:$0x3] }
  0x9b   : > { %v1216_v12 = vpack.c.bf16 %v1144_v4, %v1144_v4  ;;  %v1189_v14 = vpack.c.bf16 %v1117_v5, %v1117_v5  ;;  %v1609_v25 = vrot.slane %v1607_v59, 5 }
  0x9c   : > { %1342 = vst.msk [vmem:[#allocation2 + $0xa0] sm:$0xf] %vm1258_vm0, %v1226_v8  ;;  %v1558_v21 = vld [vmem:[#allocation2 + $0x8] sm:$0xf]  ;;  %v616_v8 = vmax.f32 %v4731_v27, 0.0 }
  0x9d   : > { %1322 = vst.msk [vmem:[#allocation2 + $0x78] sm:$0xf] %vm1258_vm0, %v1216_v12  ;;  %v1268_v22 = vsel %vm4600_vm4, %v1189_v14, %v1267_v9  ;;  %901 = vperm.xlu2 %4346, %v711_v10   ;;  %v1590_v36 = vshrl.u32 %v1558_v21, 16  ;;  %v1593_v44 = vshll.u32 %v1558_v21, 16  ;;  %v4291_v63 = vld [vmem:[#allocation2 + $0x4] sm:$0xf0]  ;;  %v4767_v9 = vadd.f32 %v4547_v37, %v516_v51 }
  0x9e   : > { %1269 = vst [vmem:[#allocation2 + $0xc] sm:$0x1] %v1268_v22  ;;  %891 = vperm.xlu1 %4345, %v709_v15   ;;  %881 = vperm.xlu0 %4344, %v707_v16   ;;  %v1556_v29 = vld [vmem:[#allocation2] sm:$0xf]  ;;  %v475_v12 = vmul.f32 %v4535_v33, %v399_v56  ;;  %v1585_v16 = vshll.u32 %v4748_v52, 16  ;;  %v666_v22 = vmax.f32 %v4755_v0, 0.0 }
  0x9f   : > { %v807_v30 = vpop.permute.xlu2 %806  ;;  %v1576_v42 = vshrl.u32 %v1556_v29, 16  ;;  %v1579_v43 = vshll.u32 %v1556_v29, 16  ;;  %v4034_v62 = vld [vmem:[#allocation2] sm:$0xf]  ;;  %v1592_v6 = vrot.slane %v1590_v36, 4  ;;  %v1595_v7 = vrot.slane %v1593_v44, 5 }
  0xa0   : > { %v947_v39 = vpop.permute.xlu1 %946  ;;  %v1124_v40 = vmul.f32 %v807_v30, %v620_v17  ;;  %v937_v41 = vpop.permute.xlu0 %936  ;;  %v450_v14 = vld [vmem:[%s4526_s25 + $0x200] sm:$0xff]  ;;  %v4035_v15 = vor.u32 %v4291_v63, %v4034_v62  ;;  %v504_v17 = vmul.f32 %v4535_v33, %v428_v57  ;;  %v4795_v44 = vadd.f32 %v4547_v37, %v475_v12 }
  0xa1   : > { %v1152_v45 = vmul.f32 %v947_v39, %v648_v23  ;;  %v1150_v46 = vmul.f32 %v937_v41, %v646_v24  ;;  %v1578_v4 = vrot.slane %v1576_v42, 4  ;;  %v1581_v5 = vrot.slane %v1579_v43, 5  ;;  %v737_v42 = vld [vmem:[%s6095_s1 + $0x1b8] sm:$0x1] }
  0xa2   : > { %v1196_v53 = vpack.c.bf16 %v1124_v40, %v1124_v40  ;;  %v1606_v24 = vrot.slane %v1604_v58, 4  ;;  %v1596_v30 = vor.u32 %v1595_v7, %v1592_v6  ;;  %v526_v31 = vmul.f32 %v4535_v33, %v450_v14  ;;  %v1271_v40 = vld [vmem:[#allocation2 + $0x14] sm:$0x1]  ;;  %v4819_v58 = vld [vmem:[#allocation2 + $0x1c] sm:$0x1] }
  0xa3   : > { %v1224_v60 = vpack.c.bf16 %v1152_v45, %v1152_v45  ;;  %v1222_v61 = vpack.c.bf16 %v1150_v46, %v1150_v46  ;;  %v1582_v29 = vor.u32 %v1581_v5, %v1578_v4  ;;  %v2240_v39 = vsel %vm1459_vm1, %v4125_v34, 0  ;;  %v735_v46 = vld [vmem:[%s6095_s1 + $0x1a8] sm:$0x1]  ;;  %v430_v4 = vld [vmem:[%s4526_s25 + $0x160] sm:$0xff]  ;;  %v452_v5 = vld [vmem:[%s4526_s25 + $0x210] sm:$0xff] }
  0xa4   : > { %1282 = vst.msk [vmem:[#allocation2 + $0x28] sm:$0xf] %vm1258_vm0, %v1196_v53  ;;  %v4792_v43 = vadd.f32 %v4547_v37, %v470_v11  ;;  %v4798_v18 = vadd.f32 %v4547_v37, %v504_v17  ;;  %2249 = vmatpush.bf16.msra.mxu3 %v2240_v39  ;;  %v664_v51 = vmax.f32 %v4767_v9, 0.0  ;;  %v4810_v52 = vadd.f32 %v4547_v37, %v526_v31  ;;  %v395_v53 = vld [vmem:[%s4526_s25 + $0x48] sm:$0x1]  ;;  %v446_v31 = vld [vmem:[%s4526_s25 + $0x1e0] sm:$0xff] }
  0xa5   : > { %1338 = vst.msk [vmem:[#allocation2 + $0x98] sm:$0xf] %vm1258_vm0, %v1224_v60  ;;  %931 = vperm.xlu2 %4346, %v717_v48   ;;  %v1559_v10 = vld [vmem:[#allocation2 + $0xc] sm:$0x1]  ;;  %v1583_v55 = vrot.slane %v1582_v29, 4  ;;  %v1597_v56 = vrot.slane %v1596_v30, 4  ;;  %v4817_v57 = vadd.f32 %v4547_v37, %v473_v38 }
  0xa6   : > { %1334 = vst.msk [vmem:[#allocation2 + $0x90] sm:$0xf] %vm1258_vm0, %v1222_v61  ;;  %921 = vperm.xlu1 %4345, %v715_v47   ;;  %911 = vperm.xlu0 %4344, %v713_v49   ;;  %v1599_v23 = vshll.u32 %v1559_v10, 16  ;;  %v734_v47 = vld [vmem:[%s6095_s1 + $0x1a0] sm:$0xff]  ;;  %v1610_v49 = vor.u32 %v1609_v25, %v1606_v24  ;;  %v1587_v60 = vrot.slane %v1585_v16, 5  ;;  %v618_v61 = vmax.f32 %v4792_v43, 0.0 }
  0xa7   : > { %4030 = vmatmul.msk.bf16.gmra.mxu3 %vm1446_vm5, %v4023_v54  ;;  %v1047_v21 = vpop.permute.xlu2 %1046  ;;  %v623_v0 = vmax.f32 %v4795_v44, 0.0  ;;  %v674_v9 = vmax.f32 %v4810_v52, 0.0  ;;  %v471_v10 = vmul.f32 %v4535_v33, %v395_v53  ;;  %v1627_v11 = vshll.u32 %v4819_v58, 16  ;;  %v4026_v16 = vld [vmem:[#allocation2 + $0x78] sm:$0xf] }
  0xa8   : > { %4048 = vmatmul.msk.bf16.vlgmr.msrb.gmra.mxu0 %vm1446_vm5, %v4035_v15  ;;  %v782_v26 = vpop.permute.xlu1 %781  ;;  %v1172_v27 = vmul.f32 %v1047_v21, %v668_v50  ;;  %v787_v28 = vpop.permute.xlu0 %786  ;;  %v1601_v48 = vrot.slane %v1599_v23, 5  ;;  %v656_v50 = vmax.f32 %v4758_v1, 0.0  ;;  %v652_v1 = vmax.f32 %v4798_v18, 0.0  ;;  %v4298_v17 = vld [vmem:[#allocation2 + $0x7c] sm:$0xf0] }
  0xa9   : > { %v1119_v35 = vmul.f32 %v782_v26, %v615_v32  ;;  %v1120_v36 = vmul.f32 %v787_v28, %v616_v8  ;;  %1889 = vmatpush.bf16.msrb.mxu0 %v1880_v19  ;;  %v4832_v2 = vrot.slane %v1610_v49, 4  ;;  %v1588_v19 = vsel %vm4823_vm8, %v1583_v55, %v1587_v60  ;;  %v741_v23 = vld [vmem:[%s6095_s1 + $0x1d8] sm:$0x1]  ;;  %v743_v24 = vld [vmem:[%s6095_s1 + $0x1e8] sm:$0x1]  ;;  %v400_v60 = vld [vmem:[%s4526_s25 + $0x70] sm:$0xff] }
  0xaa   : > { %v1244_v41 = vpack.c.bf16 %v1172_v27, %v1172_v27  ;;  %v1602_v63 = vsel %vm4823_vm8, %v1597_v56, %v1601_v48  ;;  %v621_v20 = vmax.f32 %v4817_v57, 0.0  ;;  %v4038_v25 = vld [vmem:[#allocation2 + $0x10] sm:$0xf]  ;;  %v506_v27 = vmul.f32 %v4535_v33, %v430_v4  ;;  %v749_v43 = vld [vmem:[%s6095_s1 + $0x218] sm:$0x1] }
  0xab   : > { %v1191_v32 = vpack.c.bf16 %v1119_v35, %v1119_v35  ;;  %v1192_v45 = vpack.c.bf16 %v1120_v36, %v1120_v36  ;;  %v4839_v12 = vld [vmem:[#allocation2 + $0x28] sm:$0xf]  ;;  %v1690_v26 = vunpack.c.l.b16 %v1602_v63  ;;  %v528_v28 = vmul.f32 %v4535_v33, %v452_v5  ;;  %v4146_v34 = vld [vmem:[%s6097_s3 + $0x10] sm:$0x3]  ;;  %v753_v52 = vld [vmem:[%s6095_s1 + $0x238] sm:$0x1] }
  0xac   : > { %1378 = vst.msk [vmem:[#allocation2 + $0xe8] sm:$0xf] %vm1258_vm0, %v1244_v41  ;;  %v1646_v35 = vshrl.u32 %v4839_v12, 16  ;;  %v1649_v36 = vshll.u32 %v4839_v12, 16  ;;  %v4027_v38 = vor.u32 %v4298_v17, %v4026_v16  ;;  %v4864_v44 = vadd.f32 %v4547_v37, %v471_v10  ;;  %v4885_v10 = vld [vmem:[#allocation2 + $0x10] sm:$0xf] }
  0xad   : > { %v1272_v54 = vsel %vm4600_vm4, %v1191_v32, %v1271_v40  ;;  %1274 = vst.msk [vmem:[#allocation2 + $0x18] sm:$0xf] %vm1258_vm0, %v1192_v45  ;;  %1031 = vperm.xlu2 %4346, %v737_v42   ;;  %v1689_v40 = vunpack.c.l.b16 %v1588_v19  ;;  %v522_v49 = vmul.f32 %v4535_v33, %v446_v31  ;;  %v4872_v55 = vadd.f32 %v4547_v37, %v506_v27  ;;  %v747_v16 = vld [vmem:[%s6095_s1 + $0x208] sm:$0x1] }
  0xae   : > { %1273 = vst [vmem:[#allocation2 + $0x14] sm:$0x1] %v1272_v54  ;;  %1021 = vperm.xlu1 %4345, %v735_v46   ;;  %1016 = vperm.xlu0 %4344, %v734_v47   ;;  %v4875_v56 = vadd.f32 %v4547_v37, %v528_v28  ;;  %v4894_v17 = vrot.slane %v1649_v36, 5  ;;  %v1629_v18 = vrot.slane %v1627_v11, 5  ;;  %v425_v11 = vld [vmem:[%s4526_s25 + $0x138] sm:$0x1] }
  0xaf   : > { %v987_v62 = vpop.permute.xlu2 %986  ;;  %v1697_v47 = vpack.c.b16 %v1690_v26, %v1689_v40  ;;  %v619_v27 = vmax.f32 %v4864_v44, 0.0  ;;  %v654_v28 = vmax.f32 %v4872_v55, 0.0  ;;  %v2310_v31 = vshrl.u32 %v4885_v10, 16  ;;  %v431_v36 = vld [vmem:[%s4526_s25 + $0x168] sm:$0x1] }
  0xb0   : > { %v1037_v6 = vpop.permute.xlu1 %1036  ;;  %v1160_v7 = vmul.f32 %v987_v62, %v656_v50  ;;  %v1027_v8 = vpop.permute.xlu0 %1026  ;;  %v2434_v50 = vsel %vm1459_vm1, %v4146_v34, 0  ;;  %v4104_v62 = vld [vmem:[%s6097_s3 + $0xc] sm:$0x3]  ;;  %v4933_v44 = vld [vmem:[#allocation2 + $0x98] sm:$0xf] }
  0xb1   : > { %v1170_v14 = vmul.f32 %v1037_v6, %v666_v22  ;;  %v1168_v15 = vmul.f32 %v1027_v8, %v664_v51  ;;  %v739_v22 = vld [vmem:[%s6095_s1 + $0x1c8] sm:$0x1]  ;;  %v4883_v8 = vrot.slane %v1646_v35, 4 }
  0xb2   : > { %v1232_v21 = vpack.c.bf16 %v1160_v7, %v1160_v7  ;;  %v2157_v7 = vsel %vm1459_vm1, %v4104_v62, 0  ;;  %v751_v57 = vld [vmem:[%s6095_s1 + $0x228] sm:$0x1] }
  0xb3   : > { %v1242_v29 = vpack.c.bf16 %v1170_v14, %v1170_v14  ;;  %v1240_v30 = vpack.c.bf16 %v1168_v15, %v1168_v15  ;;  %v1287_v14 = vld [vmem:[#allocation2 + $0x34] sm:$0x1]  ;;  %2166 = vmatpush.bf16.msrb.mxu2 %v2157_v7  ;;  %v1652_v35 = vor.u32 %v4894_v17, %v4883_v8 }
  0xb4   : > { %1354 = vst.msk [vmem:[#allocation2 + $0xb8] sm:$0xf] %vm1258_vm0, %v1232_v21  ;;  %v4292_v39 = vld [vmem:[#allocation2 + $0x14] sm:$0xf0]  ;;  %v4905_v21 = vld [vmem:[#allocation2 + $0x90] sm:$0xf] }
  0xb5   : > { %v1562_v41 = vld [vmem:[#allocation2 + $0x18] sm:$0xf]  ;;  %1374 = vst.msk [vmem:[#allocation2 + $0xe0] sm:$0xf] %vm1258_vm0, %v1242_v29  ;;  %1061 = vperm.xlu2 %4346, %v743_v24   ;;  %v4039_v42 = vor.u32 %v4292_v39, %v4038_v25  ;;  %v1561_v32 = vld [vmem:[#allocation2 + $0x14] sm:$0x1] }
  0xb6   : > { %v1618_v45 = vshrl.u32 %v1562_v41, 16  ;;  %v1621_v46 = vshll.u32 %v1562_v41, 16  ;;  %1370 = vst.msk [vmem:[#allocation2 + $0xd8] sm:$0xf] %vm1258_vm0, %v1240_v30  ;;  %1051 = vperm.xlu1 %4345, %v741_v23   ;;  %1041 = vperm.xlu0 %4344, %v739_v22   ;;  %v1613_v48 = vshll.u32 %v1561_v32, 16  ;;  %v398_v29 = vld [vmem:[%s4526_s25 + $0x60] sm:$0xff] }
  0xb7   : > { %4031 = vmatmul.msk.bf16.gmra.mxu3 %vm1446_vm5, %v4027_v38  ;;  %4049 = vmatmul.msk.bf16.vlgmr.msra.gmra.mxu1 %vm1446_vm5, %v4039_v42  ;;  %v822_v51 = vpop.permute.xlu2 %821  ;;  %v745_v22 = vld [vmem:[%s6095_s1 + $0x1f8] sm:$0x1]  ;;  %v448_v30 = vld [vmem:[%s4526_s25 + $0x1f0] sm:$0xff]  ;;  %v1936_v38 = vshrl.u32 %v4905_v21, 16  ;;  %v501_v42 = vmul.f32 %v4535_v33, %v425_v11 }
  0xb8   : > { %v1620_v53 = vrot.slane %v1618_v45, 4  ;;  %v1623_v54 = vrot.slane %v1621_v46, 5  ;;  %4053 = vmatmul.msk.bf16.vlgmr.msra.gmra.mxu0 %vm1446_vm5, %v1697_v47  ;;  %v797_v63 = vpop.permute.xlu1 %796  ;;  %v1127_v4 = vmul.f32 %v822_v51, %v623_v0  ;;  %v967_v5 = vpop.permute.xlu0 %966  ;;  %v1615_v6 = vrot.slane %v1613_v48, 5  ;;  %v4099_v48 = vld [vmem:[%s6097_s3 + $0xa] sm:$0x3] }
  0xb9   : > { %v1122_v12 = vmul.f32 %v797_v63, %v618_v61  ;;  %v1156_v15 = vmul.f32 %v967_v5, %v652_v1  ;;  %2443 = vmatpush.bf16.msra.mxu0 %v2434_v50  ;;  %v4902_v61 = vadd.f32 %v4547_v37, %v522_v49  ;;  %v476_v1 = vmul.f32 %v4535_v33, %v400_v60  ;;  %v1283_v50 = vld [vmem:[#allocation2 + $0x2c] sm:$0x1]  ;;  %v752_v63 = vld [vmem:[%s6095_s1 + $0x230] sm:$0xff] }
  0xba   : > { %v1624_v0 = vor.u32 %v1623_v54, %v1620_v53  ;;  %v1199_v19 = vpack.c.bf16 %v1127_v4, %v1127_v4  ;;  %v1616_v25 = vsel %vm4823_vm8, %v4832_v2, %v1615_v6  ;;  %v676_v2 = vmax.f32 %v4875_v56, 0.0  ;;  %v1279_v54 = vld [vmem:[#allocation2 + $0x24] sm:$0x1]  ;;  %v4299_v4 = vld [vmem:[#allocation2 + $0x94] sm:$0xf0] }
  0xbb   : > { %v1194_v23 = vpack.c.bf16 %v1122_v12, %v1122_v12  ;;  %v1228_v24 = vpack.c.bf16 %v1156_v15, %v1156_v15  ;;  %v1691_v39 = vunpack.c.l.b16 %v1616_v25  ;;  %v4930_v41 = vadd.f32 %v4547_v37, %v476_v1  ;;  %v401_v12 = vld [vmem:[%s4526_s25 + $0x78] sm:$0x1] }
  0xbc   : > { %v1625_v58 = vrot.slane %v1624_v0, 4  ;;  %v1288_v26 = vsel %vm4600_vm4, %v1199_v19, %v1287_v14  ;;  %v670_v45 = vmax.f32 %v4902_v61, 0.0  ;;  %v474_v46 = vmul.f32 %v4535_v33, %v398_v29 }
  0xbd   : > { %1278 = vst.msk [vmem:[#allocation2 + $0x20] sm:$0xf] %vm1258_vm0, %v1194_v23  ;;  %1091 = vperm.xlu2 %4346, %v749_v43   ;;  %v524_v47 = vmul.f32 %v4535_v33, %v448_v30  ;;  %v1939_v49 = vshll.u32 %v4905_v21, 16  ;;  %v507_v5 = vmul.f32 %v4535_v33, %v431_v36  ;;  %v2074_v6 = vsel %vm1459_vm1, %v4099_v48, 0  ;;  %v4081_v1 = vld [vmem:[#allocation2 + $0xd8] sm:$0xf] }
  0xbe   : > { %v1630_v34 = vsel %vm4823_vm8, %v1625_v58, %v1629_v18  ;;  %1289 = vst [vmem:[#allocation2 + $0x34] sm:$0x1] %v1288_v26  ;;  %1081 = vperm.xlu1 %4345, %v747_v16   ;;  %1071 = vperm.xlu0 %4344, %v745_v22   ;;  %v4956_v14 = vrot.slane %v1936_v38, 4  ;;  %v1950_v15 = vshrl.u32 %v4933_v44, 16  ;;  %v624_v0 = vmax.f32 %v4930_v41, 0.0 }
  0xbf   : > { %v1692_v40 = vunpack.c.l.b16 %v1630_v34  ;;  %1346 = vst.msk [vmem:[#allocation2 + $0xa8] sm:$0xf] %vm1258_vm0, %v1228_v24  ;;  %v1077_v32 = vpop.permute.xlu2 %1076  ;;  %2083 = vmatpush.bf16.msrb.mxu1 %v2074_v6  ;;  %v4965_v17 = vadd.f32 %v4547_v37, %v501_v42  ;;  %v4967_v19 = vrot.slane %v1652_v35, 4  ;;  %v4303_v21 = vld [vmem:[#allocation2 + $0xdc] sm:$0xf0]  ;;  %v4970_v23 = vadd.f32 %v4547_v37, %v474_v46  ;;  %v436_v24 = vld [vmem:[%s4526_s25 + $0x190] sm:$0xff] }
  0xc0   : > { %v812_v51 = vpop.permute.xlu1 %811  ;;  %v1178_v53 = vmul.f32 %v1077_v32, %v674_v9  ;;  %v802_v60 = vpop.permute.xlu0 %801  ;;  %v4060_v9 = vld [vmem:[#allocation2 + $0x90] sm:$0xf]  ;;  %v1941_v22 = vrot.slane %v1939_v49, 5  ;;  %v4975_v26 = vadd.f32 %v4547_v37, %v524_v47  ;;  %v477_v29 = vmul.f32 %v4535_v33, %v401_v12  ;;  %v4985_v38 = vld [vmem:[#allocation2 + $0x8] sm:$0xf] }
  0xc1   : > { %v1698_v62 = vpack.c.b16 %v1692_v40, %v1691_v39  ;;  %v1125_v7 = vmul.f32 %v812_v51, %v621_v20  ;;  %v1123_v8 = vmul.f32 %v802_v60, %v619_v27  ;;  %v4293_v20 = vld [vmem:[#allocation2 + $0x24] sm:$0xf0]  ;;  %v4061_v58 = vor.u32 %v4299_v4, %v4060_v9  ;;  %v4995_v46 = vld [vmem:[%s6100_s6] ss:$0 sm:$0xff]  ;;  %v437_v48 = vld [vmem:[%s4526_s25 + $0x198] sm:$0x1] }
  0xc2   : > { %v1250_v16 = vpack.c.bf16 %v1178_v53, %v1178_v53  ;;  %v4978_v27 = vadd.f32 %v4547_v37, %v507_v5  ;;  %v4082_v39 = vor.u32 %v4303_v21, %v4081_v1  ;;  %v649_v37 = vmax.f32 %v4965_v17, 0.0  ;;  %v434_v4 = vld [vmem:[%s4526_s25 + $0x180] sm:$0xff] }
  0xc3   : > { %4054 = vmatmul.msk.bf16.vlgmr.msra.gmra.mxu2 %vm1446_vm5, %v1698_v62  ;;  %v1197_v43 = vpack.c.bf16 %v1125_v7, %v1125_v7  ;;  %v1195_v18 = vpack.c.bf16 %v1123_v8, %v1123_v8  ;;  %v1953_v33 = vshll.u32 %v4933_v44, 16  ;;  %v622_v32 = vmax.f32 %v4970_v23, 0.0  ;;  %v5010_v62 = vld [vmem:[%s6101_s7] ss:$0 sm:$0xff] }
  0xc4   : > { %1390 = vst.msk [vmem:[#allocation2 + $0x100] sm:$0xf] %vm1258_vm0, %v1250_v16  ;;  %v4042_v25 = vld [vmem:[#allocation2 + $0x20] sm:$0xf]  ;;  %v512_v47 = vmul.f32 %v4995_v46, %v436_v24  ;;  %v1942_v49 = vor.u32 %v1941_v22, %v4956_v14  ;;  %v5000_v44 = vrot.slane %v1950_v15, 4  ;;  %v655_v60 = vmax.f32 %v4978_v27, 0.0 }
  0xc5   : > { %v1564_v11 = vld [vmem:[#allocation2 + $0x20] sm:$0xf]  ;;  %v1284_v30 = vsel %vm4600_vm4, %v1197_v43, %v1283_v50  ;;  %v1280_v34 = vsel %vm4600_vm4, %v1195_v18, %v1279_v54  ;;  %1106 = vperm.xlu2 %4346, %v752_v63   ;;  %v4043_v35 = vor.u32 %v4293_v20, %v4042_v25  ;;  %v672_v54 = vmax.f32 %v4975_v26, 0.0  ;;  %v420_v20 = vld [vmem:[%s4526_s25 + $0x110] sm:$0xff] }
  0xc6   : > { %v1632_v36 = vshrl.u32 %v1564_v11, 16  ;;  %1285 = vst [vmem:[#allocation2 + $0x2c] sm:$0x1] %v1284_v30  ;;  %1111 = vperm.xlu1 %4345, %v753_v52   ;;  %1101 = vperm.xlu0 %4344, %v751_v57   ;;  %v1635_v40 = vshll.u32 %v1564_v11, 16  ;;  %v5013_v63 = vadd.f32 %v5010_v62, %v477_v29  ;;  %v513_v8 = vmul.f32 %v4995_v46, %v437_v48  ;;  %v454_v17 = vld [vmem:[%s4526_s25 + $0x220] sm:$0xff] }
  0xc7   : > { %1281 = vst [vmem:[#allocation2 + $0x24] sm:$0x1] %v1280_v34  ;;  %4050 = vmatmul.msk.bf16.gmra.mxu1 %vm1446_vm5, %v4043_v35  ;;  %4074 = vmatmul.msk.bf16.vlgmr.msrb.gmra.mxu3 %vm1446_vm5, %v4061_v58  ;;  %v1087_v42 = vpop.permute.xlu2 %1086  ;;  %v5021_v52 = vrot.slane %v1953_v33, 5  ;;  %v2296_v9 = vshrl.u32 %v4985_v38, 16  ;;  %v5025_v15 = vadd.f32 %v5010_v62, %v512_v47  ;;  %v510_v55 = vmul.f32 %v4995_v46, %v434_v4  ;;  %v4300_v25 = vld [vmem:[#allocation2 + $0xa4] sm:$0xf0] }
  0xc8   : > { %4095 = vmatmul.msk.bf16.vlgmr.msrb.gmra.mxu0 %vm1446_vm5, %v4082_v39  ;;  %v977_v50 = vpop.permute.xlu1 %976  ;;  %v1180_v51 = vmul.f32 %v1087_v42, %v676_v2  ;;  %v1057_v53 = vpop.permute.xlu0 %1056  ;;  %v1634_v2 = vrot.slane %v1632_v36, 4  ;;  %v1637_v6 = vrot.slane %v1635_v40, 5  ;;  %v625_v61 = vmax.f32 %v5013_v63, 0.0  ;;  %v4064_v39 = vld [vmem:[#allocation2 + $0xa0] sm:$0xf] }
  0xc9   : > { %v1158_v5 = vmul.f32 %v977_v50, %v654_v28  ;;  %v1174_v56 = vmul.f32 %v1057_v53, %v670_v45  ;;  %v423_v28 = vld [vmem:[%s4526_s25 + $0x128] sm:$0x1]  ;;  %v5031_v45 = vrot.slane %v1942_v49, 4  ;;  %v5038_v1 = vadd.f32 %v5010_v62, %v513_v8  ;;  %v1339_v47 = vld [vmem:[#allocation2 + $0x9c] sm:$0x1] }
  0xca   : > { %v1252_v7 = vpack.c.bf16 %v1180_v51, %v1180_v51  ;;  %v1638_v57 = vor.u32 %v1637_v6, %v1634_v2  ;;  %v1956_v21 = vor.u32 %v5021_v52, %v5000_v44  ;;  %v5042_v23 = vrot.slane %v2296_v9, 4  ;;  %v1569_v50 = vld [vmem:[#allocation2 + $0x34] sm:$0x1]  ;;  %v4085_v8 = vld [vmem:[#allocation2 + $0xe8] sm:$0xf] }
  0xcb   : > { %v1230_v12 = vpack.c.bf16 %v1158_v5, %v1158_v5  ;;  %v1246_v14 = vpack.c.bf16 %v1174_v56, %v1174_v56  ;;  %v660_v58 = vmax.f32 %v5025_v15, 0.0  ;;  %v5046_v11 = vadd.f32 %v5010_v62, %v510_v55  ;;  %v5066_v9 = vld [vmem:[#allocation2 + $0x8] sm:$0xf]  ;;  %v2282_v26 = vld [vmem:[#allocation2 + $0x14] sm:$0x1] }
  0xcc   : > { %1394 = vst.msk [vmem:[#allocation2 + $0x108] sm:$0xf] %vm1258_vm0, %v1252_v7  ;;  %v499_v29 = vmul.f32 %v4995_v46, %v423_v28  ;;  %v496_v40 = vmul.f32 %v4995_v46, %v420_v20  ;;  %v530_v33 = vmul.f32 %v4995_v46, %v454_v17  ;;  %v1639_v49 = vrot.slane %v1638_v57, 4 }
  0xcd   : > { %1350 = vst.msk [vmem:[#allocation2 + $0xb0] sm:$0xf] %vm1258_vm0, %v1230_v12  ;;  %v1567_v16 = vld [vmem:[#allocation2 + $0x2c] sm:$0x1]  ;;  %v4065_v53 = vor.u32 %v4300_v25, %v4064_v39  ;;  %v661_v4 = vmax.f32 %v5038_v1, 0.0  ;;  %v1669_v52 = vshll.u32 %v1569_v50, 16 }
  0xce   : > { %1382 = vst.msk [vmem:[#allocation2 + $0xf0] sm:$0xf] %vm1258_vm0, %v1246_v14  ;;  %v1565_v43 = vld [vmem:[#allocation2 + $0x24] sm:$0x1]  ;;  %v1655_v18 = vshll.u32 %v1567_v16, 16  ;;  %v658_v28 = vmax.f32 %v5046_v11, 0.0  ;;  %v5075_v16 = vadd.f32 %v5010_v62, %v496_v40  ;;  %v5078_v57 = vadd.f32 %v5010_v62, %v530_v33 }
  0xcf   : > { %v952_v24 = vpop.permute.xlu2 %951  ;;  %v1641_v22 = vshll.u32 %v1565_v43, 16  ;;  %v5068_v12 = vld [vmem:[#allocation2 + $0xc] sm:$0xf0]  ;;  %v5070_v14 = vld [vmem:[#allocation2 + $0x54] sm:$0xf0]  ;;  %v5080_v20 = vrot.slane %v1956_v21, 4 }
  0xd0   : > { %v827_v30 = vpop.permute.xlu1 %826  ;;  %v1153_v34 = vmul.f32 %v952_v24, %v649_v37  ;;  %v817_v35 = vpop.permute.xlu0 %816  ;;  %v1657_v36 = vrot.slane %v1655_v18, 5  ;;  %v429_v18 = vld [vmem:[%s4526_s25 + $0x158] sm:$0x1]  ;;  %v2299_v24 = vshll.u32 %v4985_v38, 16  ;;  %v5097_v40 = vrot.slane %v1669_v52, 5 }
  0xd1   : > { %v1128_v42 = vmul.f32 %v827_v30, %v624_v0  ;;  %v1126_v48 = vmul.f32 %v817_v35, %v622_v32  ;;  %v1643_v44 = vrot.slane %v1641_v22, 5  ;;  %v5059_v0 = vld [vmem:[#allocation2 + $0x50] sm:$0xf]  ;;  %v2280_v32 = vld [vmem:[#allocation2 + $0xc] sm:$0x1]  ;;  %v2313_v33 = vshll.u32 %v4885_v10, 16 }
  0xd2   : > { %v1225_v51 = vpack.c.bf16 %v1153_v34, %v1153_v34  ;;  %v1658_v37 = vsel %vm4823_vm8, %v4967_v19, %v1657_v36  ;;  %v5064_v19 = vadd.f32 %v5010_v62, %v499_v29  ;;  %v2305_v22 = vshll.u32 %v2280_v32, 16  ;;  %v409_v29 = vld [vmem:[%s4526_s25 + $0xb8] sm:$0x1]  ;;  %v427_v30 = vld [vmem:[%s4526_s25 + $0x148] sm:$0x1] }
  0xd3   : > { %v1200_v5 = vpack.c.bf16 %v1128_v42, %v1128_v42  ;;  %v1198_v56 = vpack.c.bf16 %v1126_v48, %v1126_v48  ;;  %v1644_v2 = vsel %vm4823_vm8, %v1639_v49, %v1643_v44  ;;  %v1694_v41 = vunpack.c.l.b16 %v1658_v37  ;;  %v5100_v42 = vld [vmem:[#allocation2 + $0x60] sm:$0xf]  ;;  %v1351_v48 = vld [vmem:[#allocation2 + $0xb4] sm:$0x1] }
  0xd4   : > { %v1340_v6 = vsel %vm4600_vm4, %v1225_v51, %v1339_v47  ;;  %v1693_v7 = vunpack.c.l.b16 %v1644_v2  ;;  %v4108_v34 = vor.u32 %v5068_v12, %v5066_v9  ;;  %v4129_v21 = vor.u32 %v5070_v14, %v5059_v0  ;;  %v1291_v51 = vld [vmem:[#allocation2 + $0x3c] sm:$0x1]  ;;  %v5113_v63 = vld [vmem:[#allocation2 + $0xb0] sm:$0xf] }
  0xd5   : > { %1290 = vst.msk [vmem:[#allocation2 + $0x38] sm:$0xf] %vm1258_vm0, %v1200_v5  ;;  %v4304_v55 = vld [vmem:[#allocation2 + $0xec] sm:$0xf0]  ;;  %v647_v39 = vmax.f32 %v5064_v19, 0.0  ;;  %v644_v44 = vmax.f32 %v5075_v16, 0.0  ;;  %v505_v37 = vmul.f32 %v4995_v46, %v429_v18  ;;  %v503_v5 = vmul.f32 %v4995_v46, %v427_v30 }
  0xd6   : > { %1341 = vst [vmem:[#allocation2 + $0x9c] sm:$0x1] %v1340_v6  ;;  %v1699_v17 = vpack.c.b16 %v1694_v41, %v1693_v7  ;;  %v4086_v43 = vor.u32 %v4304_v55, %v4085_v8  ;;  %v678_v27 = vmax.f32 %v5078_v57, 0.0  ;;  %v2301_v2 = vrot.slane %v2299_v24, 5  ;;  %v435_v24 = vld [vmem:[%s4526_s25 + $0x188] sm:$0x1] }
  0xd7   : > { %1286 = vst.msk [vmem:[#allocation2 + $0x30] sm:$0xf] %vm1258_vm0, %v1198_v56  ;;  %4075 = vmatmul.msk.bf16.gmra.mxu3 %vm1446_vm5, %v4065_v53  ;;  %v982_v25 = vpop.permute.xlu2 %981  ;;  %v485_v53 = vmul.f32 %v4995_v46, %v409_v29  ;;  %v5117_v41 = vrot.slane %v2305_v22, 5  ;;  %v2312_v8 = vrot.slane %v2310_v31, 4  ;;  %v2315_v52 = vrot.slane %v2313_v33, 5 }
  0xd8   : > { %4055 = vmatmul.msk.bf16.gmra.mxu2 %vm1446_vm5, %v1699_v17  ;;  %4096 = vmatmul.msk.bf16.gmra.mxu0 %vm1446_vm5, %v4086_v43  ;;  %v1067_v35 = vpop.permute.xlu1 %1066  ;;  %v1159_v38 = vmul.f32 %v982_v25, %v655_v60  ;;  %v832_v36 = vpop.permute.xlu0 %831  ;;  %v5108_v60 = vld [vmem:[#allocation2 + $0x64] sm:$0xf0]  ;;  %v2319_v22 = vshll.u32 %v2282_v26, 16  ;;  %v5132_v29 = vadd.f32 %v5010_v62, %v505_v37 }
  0xd9   : > { %v1176_v47 = vmul.f32 %v1067_v35, %v672_v54  ;;  %v1129_v49 = vmul.f32 %v832_v36, %v625_v61  ;;  %v5115_v61 = vld [vmem:[#allocation2 + $0xb4] sm:$0xf0]  ;;  %v4133_v55 = vor.u32 %v5108_v60, %v5100_v42  ;;  %v5135_v30 = vadd.f32 %v5010_v62, %v485_v53  ;;  %v1395_v42 = vld [vmem:[#allocation2 + $0x10c] sm:$0x1] }
  0xda   : > { %v1231_v50 = vpack.c.bf16 %v1159_v38, %v1159_v38  ;;  %v4069_v10 = vor.u32 %v5115_v61, %v5113_v63  ;;  %v5138_v35 = vadd.f32 %v5010_v62, %v503_v5  ;;  %v2316_v53 = vor.u32 %v2315_v52, %v2312_v8  ;;  %v4305_v52 = vld [vmem:[#allocation2 + $0xfc] sm:$0xf0] }
  0xdb   : > { %v1248_v54 = vpack.c.bf16 %v1176_v47, %v1176_v47  ;;  %v1201_v56 = vpack.c.bf16 %v1129_v49, %v1129_v49  ;;  %v2302_v49 = vor.u32 %v2301_v2, %v5042_v23 }
  0xdc   : > { %v1352_v32 = vsel %vm4600_vm4, %v1231_v50, %v1351_v48  ;;  %v4294_v6 = vld [vmem:[#allocation2 + $0x34] sm:$0xf0]  ;;  %v415_v48 = vld [vmem:[%s4526_s25 + $0xe8] sm:$0x1] }
  0xdd   : > { %v1570_v7 = vld [vmem:[#allocation2 + $0x38] sm:$0xf]  ;;  %1386 = vst.msk [vmem:[#allocation2 + $0xf8] sm:$0xf] %vm1258_vm0, %v1248_v54  ;;  %v1292_v17 = vsel %vm4600_vm4, %v1201_v56, %v1291_v51  ;;  %v1363_v56 = vld [vmem:[#allocation2 + $0xcc] sm:$0x1] }
  0xde   : > { %v1674_v43 = vshrl.u32 %v1570_v7, 16  ;;  %v1677_v18 = vshll.u32 %v1570_v7, 16  ;;  %1353 = vst [vmem:[#allocation2 + $0xb4] sm:$0x1] %v1352_v32  ;;  %v4046_v25 = vld [vmem:[#allocation2 + $0x30] sm:$0xf]  ;;  %v511_v32 = vmul.f32 %v4995_v46, %v435_v24 }
  0xdf   : > { %v1568_v31 = vld [vmem:[#allocation2 + $0x30] sm:$0xf]  ;;  %1293 = vst [vmem:[#allocation2 + $0x3c] sm:$0x1] %v1292_v17  ;;  %v4047_v38 = vor.u32 %v4294_v6, %v4046_v25  ;;  %v1012_v36 = vpop.permute.xlu2 %1011  ;;  %v1922_v2 = vld [vmem:[#allocation2 + $0x9c] sm:$0x1]  ;;  %v491_v6 = vmul.f32 %v4995_v46, %v415_v48 }
  0xe0   : > { %v1660_v33 = vshrl.u32 %v1568_v31, 16  ;;  %v1663_v47 = vshll.u32 %v1568_v31, 16  ;;  %v1007_v50 = vpop.permute.xlu1 %1006  ;;  %v1165_v51 = vmul.f32 %v1012_v36, %v661_v4  ;;  %v997_v37 = vpop.permute.xlu0 %996  ;;  %v1676_v26 = vrot.slane %v1674_v43, 4  ;;  %v5153_v43 = vld [vmem:[#allocation2 + $0xa0] sm:$0xf] }
  0xe1   : > { %v1679_v54 = vrot.slane %v1677_v18, 5  ;;  %4051 = vmatmul.msk.bf16.gmra.mxu1 %vm1446_vm5, %v4047_v38  ;;  %v1164_v5 = vmul.f32 %v1007_v50, %v660_v58  ;;  %v1162_v63 = vmul.f32 %v997_v37, %v658_v28  ;;  %v653_v4 = vmax.f32 %v5132_v29, 0.0  ;;  %v433_v58 = vld [vmem:[%s4526_s25 + $0x178] sm:$0x1]  ;;  %v403_v31 = vld [vmem:[%s4526_s25 + $0x88] sm:$0x1] }
  0xe2   : > { %v1662_v61 = vrot.slane %v1660_v33, 4  ;;  %v1665_v23 = vrot.slane %v1663_v47, 5  ;;  %v1237_v1 = vpack.c.bf16 %v1165_v51, %v1165_v51  ;;  %v2321_v17 = vrot.slane %v2319_v22, 5 }
  0xe3   : > { %v1236_v7 = vpack.c.bf16 %v1164_v5, %v1164_v5  ;;  %v1234_v8 = vpack.c.bf16 %v1162_v63, %v1162_v63  ;;  %v1680_v18 = vor.u32 %v1679_v54, %v1676_v26  ;;  %v1959_v25 = vshll.u32 %v1922_v2, 16  ;;  %v421_v5 = vld [vmem:[%s4526_s25 + $0x118] sm:$0x1] }
  0xe4   : > { %v1666_v15 = vor.u32 %v1665_v23, %v1662_v61  ;;  %v1364_v11 = vsel %vm4600_vm4, %v1237_v1, %v1363_v56  ;;  %v4089_v28 = vld [vmem:[#allocation2 + $0xf8] sm:$0xf]  ;;  %v2303_v38 = vrot.slane %v2302_v49, 4  ;;  %v633_v33 = vmax.f32 %v5135_v30, 0.0 }
  0xe5   : > { %1362 = vst.msk [vmem:[#allocation2 + $0xc8] sm:$0xf] %vm1258_vm0, %v1236_v7  ;;  %v4090_v24 = vor.u32 %v4305_v52, %v4089_v28  ;;  %v2317_v47 = vrot.slane %v2316_v53, 4  ;;  %v651_v48 = vmax.f32 %v5138_v35, 0.0  ;;  %v5162_v50 = vadd.f32 %v5010_v62, %v511_v32  ;;  %v405_v30 = vld [vmem:[%s4526_s25 + $0x98] sm:$0x1] }
  0xe6   : > { %v1667_v36 = vrot.slane %v1666_v15, 4  ;;  %1365 = vst [vmem:[#allocation2 + $0xcc] sm:$0x1] %v1364_v11  ;;  %v1571_v22 = vld [vmem:[#allocation2 + $0x3c] sm:$0x1]  ;;  %v509_v51 = vmul.f32 %v4995_v46, %v433_v58  ;;  %v2308_v49 = vsel %vm4823_vm8, %v2303_v38, %v5117_v41  ;;  %v5171_v54 = vadd.f32 %v5010_v62, %v491_v6  ;;  %v402_v15 = vld [vmem:[%s4526_s25 + $0x80] sm:$0xff] }
  0xe7   : > { %1358 = vst.msk [vmem:[#allocation2 + $0xc0] sm:$0xf] %vm1258_vm0, %v1234_v8  ;;  %4076 = vmatmul.msk.bf16.gmra.mxu3 %vm1446_vm5, %v4069_v10  ;;  %v927_v37 = vpop.permute.xlu2 %926  ;;  %v1683_v26 = vshll.u32 %v1571_v22, 16  ;;  %v479_v53 = vmul.f32 %v4995_v46, %v403_v31  ;;  %v2322_v56 = vsel %vm4823_vm8, %v2317_v47, %v2321_v17  ;;  %v1681_v10 = vrot.slane %v1680_v18, 4  ;;  %v1335_v8 = vld [vmem:[#allocation2 + $0x94] sm:$0x1] }
  0xe8   : > { %4097 = vmatmul.msk.bf16.gmra.mxu0 %vm1446_vm5, %v4090_v24  ;;  %v942_v63 = vpop.permute.xlu1 %941  ;;  %v1148_v41 = vmul.f32 %v927_v37, %v644_v44  ;;  %v1097_v61 = vpop.permute.xlu0 %1096  ;;  %v1961_v23 = vrot.slane %v1959_v25, 5  ;;  %v1964_v2 = vshrl.u32 %v5153_v43, 16  ;;  %v1672_v6 = vsel %vm4823_vm8, %v1667_v36, %v5097_v40  ;;  %v407_v17 = vld [vmem:[%s4526_s25 + $0xa8] sm:$0x1] }
  0xe9   : > { %v1151_v1 = vmul.f32 %v942_v63, %v647_v39  ;;  %v1182_v32 = vmul.f32 %v1097_v61, %v678_v27  ;;  %v1685_v7 = vrot.slane %v1683_v26, 5  ;;  %v5189_v44 = vadd.f32 %v5010_v62, %v509_v51  ;;  %v1925_v38 = vld [vmem:[#allocation2 + $0xa8] sm:$0xf] }
  0xea   : > { %v1220_v16 = vpack.c.bf16 %v1148_v41, %v1148_v41  ;;  %v497_v52 = vmul.f32 %v4995_v46, %v421_v5  ;;  %v1967_v58 = vshll.u32 %v5153_v43, 16  ;;  %v5196_v27 = vunpack.c.l.b16 %v2322_v56  ;;  %v2283_v56 = vld [vmem:[#allocation2 + $0x18] sm:$0xf] }
  0xeb   : > { %v1223_v19 = vpack.c.bf16 %v1151_v1, %v1151_v1  ;;  %v1254_v39 = vpack.c.bf16 %v1182_v32, %v1182_v32  ;;  %v1686_v57 = vsel %vm4823_vm8, %v1681_v10, %v1685_v7  ;;  %v1695_v40 = vunpack.c.l.b16 %v1672_v6 }
  0xec   : > { %1330 = vst.msk [vmem:[#allocation2 + $0x88] sm:$0xf] %vm1258_vm0, %v1220_v16  ;;  %v1696_v11 = vunpack.c.l.b16 %v1686_v57  ;;  %v5201_v28 = vadd.f32 %v5010_v62, %v479_v53  ;;  %v5203_v18 = vunpack.c.l.b16 %v2308_v49  ;;  %v1962_v25 = vsel %vm4823_vm8, %v5080_v20, %v1961_v23  ;;  %v1307_v49 = vld [vmem:[#allocation2 + $0x5c] sm:$0x1]  ;;  %v4302_v10 = vld [vmem:[#allocation2 + $0xc4] sm:$0xf0] }
  0xed   : > { %v1336_v43 = vsel %vm4600_vm4, %v1223_v19, %v1335_v8  ;;  %1398 = vst.msk [vmem:[#allocation2 + $0x110] sm:$0xf] %vm1258_vm0, %v1254_v39  ;;  %v478_v31 = vmul.f32 %v4995_v46, %v402_v15  ;;  %v5212_v24 = vrot.slane %v1964_v2, 4  ;;  %v5215_v47 = vadd.f32 %v5010_v62, %v497_v52  ;;  %v1347_v16 = vld [vmem:[#allocation2 + $0xac] sm:$0x1] }
  0xee   : > { %1337 = vst [vmem:[#allocation2 + $0x94] sm:$0x1] %v1336_v43  ;;  %v1700_v36 = vpack.c.b16 %v1696_v11, %v1695_v40  ;;  %v483_v22 = vmul.f32 %v4995_v46, %v407_v17  ;;  %v5218_v51 = vrot.slane %v1967_v58, 5  ;;  %v659_v26 = vmax.f32 %v5162_v50, 0.0  ;;  %v4072_v7 = vld [vmem:[#allocation2 + $0xc0] sm:$0xf] }
  0xef   : > { %v872_v37 = vpop.permute.xlu2 %871  ;;  %v639_v20 = vmax.f32 %v5171_v54, 0.0  ;;  %v657_v53 = vmax.f32 %v5189_v44, 0.0  ;;  %v2417_v5 = vpack.c.b16 %v5196_v27, %v5203_v18  ;;  %v5228_v23 = vunpack.c.l.b16 %v1962_v25  ;;  %v441_v54 = vld [vmem:[%s4526_s25 + $0x1b8] sm:$0x1]  ;;  %v1343_v15 = vld [vmem:[#allocation2 + $0xa4] sm:$0x1] }
  0xf0   : > { %4056 = vmatmul.msk.bf16.gmra.mxu2 %vm1446_vm5, %v1700_v36  ;;  %v972_v63 = vpop.permute.xlu1 %971  ;;  %v1137_v41 = vmul.f32 %v872_v37, %v633_v33  ;;  %v962_v61 = vpop.permute.xlu0 %961  ;;  %v627_v2 = vmax.f32 %v5201_v28, 0.0  ;;  %v1978_v1 = vshrl.u32 %v1925_v38, 16  ;;  %v5237_v8 = vadd.f32 %v5010_v62, %v478_v31  ;;  %v5247_v57 = vld [vmem:[#allocation2 + $0x1c] sm:$0xf0]  ;;  %v413_v36 = vld [vmem:[%s4526_s25 + $0xd8] sm:$0x1] }
  0xf1   : > { %v1157_v32 = vmul.f32 %v972_v63, %v653_v4  ;;  %v1155_v6 = vmul.f32 %v962_v61, %v651_v48  ;;  %v1981_v33 = vshll.u32 %v1925_v38, 16  ;;  %v645_v58 = vmax.f32 %v5215_v47, 0.0  ;;  %v4093_v48 = vld [vmem:[#allocation2 + $0x108] sm:$0xf]  ;;  %v5252_v38 = vld [vmem:[#allocation2 + $0x18] sm:$0xf] }
  0xf2   : > { %v1209_v52 = vpack.c.bf16 %v1137_v41, %v1137_v41  ;;  %v5242_v19 = vadd.f32 %v5010_v62, %v483_v22  ;;  %v1970_v29 = vor.u32 %v5218_v51, %v5212_v24  ;;  %v517_v39 = vmul.f32 %v4995_v46, %v441_v54 }
  0xf3   : > { %v1229_v35 = vpack.c.bf16 %v1157_v32, %v1157_v32  ;;  %v1227_v4 = vpack.c.bf16 %v1155_v6, %v1155_v6  ;;  %v2324_v17 = vshrl.u32 %v2283_v56, 16  ;;  %v4073_v11 = vor.u32 %v4302_v10, %v4072_v7 }
  0xf4   : > { %v1308_v40 = vsel %vm4600_vm4, %v1209_v52, %v1307_v49  ;;  %v4306_v43 = vld [vmem:[#allocation2 + $0x10c] sm:$0xf0]  ;;  %v481_v25 = vmul.f32 %v4995_v46, %v405_v30  ;;  %v1980_v31 = vrot.slane %v1978_v1, 4  ;;  %v1983_v63 = vrot.slane %v1981_v33, 5  ;;  %v2284_v49 = vld [vmem:[#allocation2 + $0x1c] sm:$0x1] }
  0xf5   : > { %v1348_v24 = vsel %vm4600_vm4, %v1229_v35, %v1347_v16  ;;  %1309 = vst [vmem:[#allocation2 + $0x5c] sm:$0x1] %v1308_v40  ;;  %v1344_v22 = vsel %vm4600_vm4, %v1227_v4, %v1343_v15  ;;  %v4094_v51 = vor.u32 %v4306_v43, %v4093_v48  ;;  %v1920_v37 = vld [vmem:[#allocation2 + $0x94] sm:$0x1]  ;;  %v626_v61 = vmax.f32 %v5237_v8, 0.0 }
  0xf6   : > { %1349 = vst [vmem:[#allocation2 + $0xac] sm:$0x1] %v1348_v24  ;;  %v1945_v41 = vshll.u32 %v1920_v37, 16  ;;  %v631_v10 = vmax.f32 %v5242_v19, 0.0  ;;  %v2327_v54 = vshll.u32 %v2283_v56, 16  ;;  %v5263_v32 = vadd.f32 %v5010_v62, %v517_v39 }
  0xf7   : > { %1345 = vst [vmem:[#allocation2 + $0xa4] sm:$0x1] %v1344_v22  ;;  %4077 = vmatmul.msk.bf16.gmra.mxu3 %vm1446_vm5, %v4073_v11  ;;  %v902_v1 = vpop.permute.xlu2 %901  ;;  %v4112_v6 = vor.u32 %v5247_v57, %v5252_v38  ;;  %v489_v7 = vmul.f32 %v4995_v46, %v413_v36  ;;  %v447_v30 = vld [vmem:[%s4526_s25 + $0x1e8] sm:$0x1]  ;;  %v2326_v33 = vrot.slane %v2324_v17, 4  ;;  %v5271_v35 = vadd.f32 %v5010_v62, %v481_v25 }
  0xf8   : > { %4098 = vmatmul.msk.bf16.gmra.mxu0 %vm1446_vm5, %v4094_v51  ;;  %v1002_v16 = vpop.permute.xlu1 %1001  ;;  %v1143_v52 = vmul.f32 %v902_v1, %v639_v20  ;;  %v992_v15 = vpop.permute.xlu0 %991  ;;  %v1947_v56 = vrot.slane %v1945_v41, 5  ;;  %v2329_v4 = vrot.slane %v2327_v54, 5  ;;  %v1319_v39 = vld [vmem:[#allocation2 + $0x74] sm:$0x1]  ;;  %v5277_v11 = vrot.slane %v1970_v29, 4 }
  0xf9   : > { %v1163_v48 = vmul.f32 %v1002_v16, %v659_v26  ;;  %v1161_v40 = vmul.f32 %v992_v15, %v657_v53  ;;  %v1984_v17 = vor.u32 %v1983_v63, %v1980_v31  ;;  %v1359_v43 = vld [vmem:[#allocation2 + $0xc4] sm:$0x1]  ;;  %v1355_v20 = vld [vmem:[#allocation2 + $0xbc] sm:$0x1]  ;;  %v523_v24 = vmul.f32 %v4995_v46, %v447_v30  ;;  %v411_v37 = vld [vmem:[%s4526_s25 + $0xc8] sm:$0x1] }
  0xfa   : > { %v1215_v36 = vpack.c.bf16 %v1143_v52, %v1143_v52  ;;  %v1948_v25 = vsel %vm4823_vm8, %v5031_v45, %v1947_v56  ;;  %v2333_v22 = vshll.u32 %v2284_v49, 16  ;;  %v2285_v41 = vld [vmem:[#allocation2 + $0x20] sm:$0xf]  ;;  %v2330_v44 = vor.u32 %v2329_v4, %v2326_v33  ;;  %v2286_v45 = vld [vmem:[#allocation2 + $0x24] sm:$0x1] }
  0xfb   : > { %v1235_v51 = vpack.c.bf16 %v1163_v48, %v1163_v48  ;;  %v1233_v50 = vpack.c.bf16 %v1161_v40, %v1161_v40  ;;  %v2049_v26 = vunpack.c.l.b16 %v1948_v25  ;;  %v665_v29 = vmax.f32 %v5263_v32, 0.0 }
  0xfc   : > { %v1320_v53 = vsel %vm4600_vm4, %v1215_v36, %v1319_v39  ;;  %v629_v31 = vmax.f32 %v5271_v35, 0.0  ;;  %v5289_v63 = vadd.f32 %v5010_v62, %v489_v7  ;;  %v5296_v33 = vrot.slane %v1984_v17, 4 }
  0xfd   : > { %v1360_v49 = vsel %vm4600_vm4, %v1235_v51, %v1359_v43  ;;  %1321 = vst [vmem:[#allocation2 + $0x74] sm:$0x1] %v1320_v53  ;;  %v1356_v54 = vsel %vm4600_vm4, %v1233_v50, %v1355_v20  ;;  %v2057_v1 = vpack.c.b16 %v5228_v23, %v2049_v26  ;;  %v1926_v30 = vld [vmem:[#allocation2 + $0xac] sm:$0x1]  ;;  %v5299_v15 = vadd.f32 %v5010_v62, %v523_v24  ;;  %v419_v51 = vld [vmem:[%s4526_s25 + $0x108] sm:$0x1] }
  0xfe   : > { %1361 = vst [vmem:[#allocation2 + $0xc4] sm:$0x1] %v1360_v49  ;;  %v1924_v16 = vld [vmem:[#allocation2 + $0xa4] sm:$0x1]  ;;  %v1987_v52 = vshll.u32 %v1926_v30, 16  ;;  %v487_v7 = vmul.f32 %v4995_v46, %v411_v37  ;;  %v2338_v56 = vshrl.u32 %v2285_v41, 16  ;;  %v495_v8 = vmul.f32 %v4995_v46, %v419_v51 }
  0xff   : > { %1357 = vst [vmem:[#allocation2 + $0xbc] sm:$0x1] %v1356_v54  ;;  %4100 = vmatmul.msk.bf16.vlgmr.msrb.gmra.mxu1 %vm1446_vm5, %v2057_v1  ;;  %v932_v4 = vpop.permute.xlu2 %931  ;;  %v1973_v48 = vshll.u32 %v1924_v16, 16  ;;  %v2331_v39 = vrot.slane %v2330_v44, 4  ;;  %v2335_v23 = vrot.slane %v2333_v22, 5  ;;  %v2341_v40 = vshll.u32 %v2285_v41, 16 }
 0x100   : > { %4121 = vmatmul.msk.bf16.vlgmr.msrb.gmra.mxu2 %vm1446_vm5, %v4108_v34  ;;  %v842_v17 = vpop.permute.xlu1 %841  ;;  %v1149_v43 = vmul.f32 %v932_v4, %v645_v58  ;;  %v837_v36 = vpop.permute.xlu0 %836  ;;  %v1989_v20 = vrot.slane %v1987_v52, 5  ;;  %v2340_v25 = vrot.slane %v2338_v56, 4  ;;  %v2347_v24 = vshll.u32 %v2286_v45, 16  ;;  %v1331_v22 = vld [vmem:[#allocation2 + $0x8c] sm:$0x1] }
 0x101   : > { %v1131_v50 = vmul.f32 %v842_v17, %v627_v2  ;;  %v1130_v9 = vmul.f32 %v837_v36, %v626_v61  ;;  %v1975_v12 = vrot.slane %v1973_v48, 5  ;;  %v2343_v34 = vrot.slane %v2341_v40, 5  ;;  %v1295_v26 = vld [vmem:[#allocation2 + $0x44] sm:$0x1]  ;;  %v1927_v44 = vld [vmem:[#allocation2 + $0xb0] sm:$0xf] }
 0x102   : > { %v1221_v37 = vpack.c.bf16 %v1149_v43, %v1149_v43  ;;  %v637_v47 = vmax.f32 %v5289_v63, 0.0  ;;  %v671_v58 = vmax.f32 %v5299_v15, 0.0  ;;  %v5317_v41 = vadd.f32 %v5010_v62, %v487_v7  ;;  %v453_v61 = vld [vmem:[%s4526_s25 + $0x218] sm:$0x1]  ;;  %v1928_v40 = vld [vmem:[#allocation2 + $0xb4] sm:$0x1] }
 0x103   : > { %v1203_v28 = vpack.c.bf16 %v1131_v50, %v1131_v50  ;;  %v1202_v53 = vpack.c.bf16 %v1130_v9, %v1130_v9  ;;  %v2336_v2 = vsel %vm4823_vm8, %v2331_v39, %v2335_v23  ;;  %v417_v45 = vld [vmem:[%s4526_s25 + $0xf8] sm:$0x1]  ;;  %v1990_v54 = vsel %vm4823_vm8, %v5296_v33, %v1989_v20  ;;  %v2289_v15 = vld [vmem:[#allocation2 + $0x30] sm:$0xf] }
 0x104   : > { %v1332_v49 = vsel %vm4600_vm4, %v1221_v37, %v1331_v22  ;;  %v2344_v1 = vor.u32 %v2343_v34, %v2340_v25  ;;  %v2349_v30 = vrot.slane %v2347_v24, 5  ;;  %v1929_v16 = vld [vmem:[#allocation2 + $0xb8] sm:$0xf]  ;;  %v1976_v7 = vsel %vm4823_vm8, %v5277_v11, %v1975_v12  ;;  %v1299_v12 = vld [vmem:[#allocation2 + $0x4c] sm:$0x1] }
 0x105   : > { %v1296_v52 = vsel %vm4600_vm4, %v1203_v28, %v1295_v26  ;;  %1333 = vst [vmem:[#allocation2 + $0x8c] sm:$0x1] %v1332_v49  ;;  %v1992_v56 = vshrl.u32 %v1927_v44, 16  ;;  %v1995_v4 = vshll.u32 %v1927_v44, 16  ;;  %v635_v48 = vmax.f32 %v5317_v41, 0.0 }
 0x106   : > { %1297 = vst [vmem:[#allocation2 + $0x44] sm:$0x1] %v1296_v52  ;;  %v5335_v39 = vunpack.c.l.b16 %v2336_v2  ;;  %v529_v33 = vmul.f32 %v4995_v46, %v453_v61  ;;  %v493_v23 = vmul.f32 %v4995_v46, %v417_v45  ;;  %v2345_v17 = vrot.slane %v2344_v1, 4  ;;  %v2287_v61 = vld [vmem:[#allocation2 + $0x28] sm:$0xf] }
 0x107   : > { %1294 = vst.msk [vmem:[#allocation2 + $0x40] sm:$0xf] %vm1258_vm0, %v1202_v53  ;;  %4142 = vmatmul.msk.bf16.vlgmr.msra.gmra.mxu3 %vm1446_vm5, %v4129_v21  ;;  %v1032_v11 = vpop.permute.xlu2 %1031  ;;  %v1994_v43 = vrot.slane %v1992_v56, 4  ;;  %v1997_v36 = vrot.slane %v1995_v4, 5  ;;  %v2006_v20 = vshrl.u32 %v1929_v16, 16  ;;  %v2051_v50 = vunpack.c.l.b16 %v1976_v7 }
 0x108   : > { %4147 = vmatmul.msk.bf16.vlgmr.msra.gmra.mxu0 %vm1446_vm5, %v2417_v5  ;;  %v862_v25 = vpop.permute.xlu1 %861  ;;  %v1169_v24 = vmul.f32 %v1032_v11, %v665_v29  ;;  %v852_v51 = vpop.permute.xlu0 %851  ;;  %v2052_v22 = vunpack.c.l.b16 %v1990_v54  ;;  %v5351_v0 = vadd.f32 %v5010_v62, %v495_v8  ;;  %v1371_v21 = vld [vmem:[#allocation2 + $0xdc] sm:$0x1]  ;;  %v2350_v18 = vsel %vm4823_vm8, %v2345_v17, %v2349_v30  ;;  %v1303_v29 = vld [vmem:[#allocation2 + $0x54] sm:$0x1]  ;;  %v5374_v30 = vld [vmem:[#allocation2 + $0x28] sm:$0xf] }
 0x109   : > { %v1135_v14 = vmul.f32 %v862_v25, %v631_v10  ;;  %v1133_v27 = vmul.f32 %v852_v51, %v629_v31  ;;  %v1930_v5 = vld [vmem:[#allocation2 + $0xbc] sm:$0x1]  ;;  %v2001_v32 = vshll.u32 %v1928_v40, 16  ;;  %v5360_v34 = vadd.f32 %v5010_v62, %v529_v33  ;;  %v439_v31 = vld [vmem:[%s4526_s25 + $0x1a8] sm:$0x1] }
 0x10a   : > { %v1241_v9 = vpack.c.bf16 %v1169_v24, %v1169_v24  ;;  %v5363_v26 = vadd.f32 %v5010_v62, %v493_v23  ;;  %v2009_v19 = vshll.u32 %v1929_v16, 16  ;;  %v1998_v44 = vor.u32 %v1997_v36, %v1994_v43  ;;  %v5376_v16 = vld [vmem:[#allocation2 + $0x2c] sm:$0xf0] }
 0x10b   : > { %v1207_v10 = vpack.c.bf16 %v1135_v14, %v1135_v14  ;;  %v1205_v37 = vpack.c.bf16 %v1133_v27, %v1133_v27  ;;  %v2008_v35 = vrot.slane %v2006_v20, 4  ;;  %v5368_v53 = vunpack.c.l.b16 %v2350_v18 }
 0x10c   : > { %v1372_v28 = vsel %vm4600_vm4, %v1241_v9, %v1371_v21  ;;  %v2011_v2 = vrot.slane %v2009_v19, 5  ;;  %v2015_v8 = vshll.u32 %v1930_v5, 16  ;;  %v2058_v54 = vpack.c.b16 %v2052_v22, %v2051_v50  ;;  %v1383_v22 = vld [vmem:[#allocation2 + $0xf4] sm:$0x1]  ;;  %v1311_v21 = vld [vmem:[#allocation2 + $0x64] sm:$0x1] }
 0x10d   : > { %v1304_v45 = vsel %vm4600_vm4, %v1207_v10, %v1303_v29  ;;  %1373 = vst [vmem:[#allocation2 + $0xdc] sm:$0x1] %v1372_v28  ;;  %v1300_v49 = vsel %vm4600_vm4, %v1205_v37, %v1299_v12  ;;  %v2003_v1 = vrot.slane %v2001_v32, 5  ;;  %v643_v52 = vmax.f32 %v5351_v0, 0.0  ;;  %v1931_v10 = vld [vmem:[#allocation2 + $0xc0] sm:$0xf] }
 0x10e   : > { %1305 = vst [vmem:[#allocation2 + $0x54] sm:$0x1] %v1304_v45  ;;  %v677_v7 = vmax.f32 %v5360_v34, 0.0  ;;  %v641_v56 = vmax.f32 %v5363_v26, 0.0  ;;  %v515_v4 = vmul.f32 %v4995_v46, %v439_v31  ;;  %v1999_v23 = vrot.slane %v1998_v44, 4 }
 0x10f   : > { %1301 = vst [vmem:[#allocation2 + $0x4c] sm:$0x1] %v1300_v49  ;;  %4101 = vmatmul.msk.bf16.gmra.mxu1 %vm1446_vm5, %v2058_v54  ;;  %v1062_v33 = vpop.permute.xlu2 %1061  ;;  %v2012_v40 = vor.u32 %v2011_v2, %v2008_v35  ;;  %v2352_v11 = vshrl.u32 %v2287_v61, 16  ;;  %v2355_v17 = vshll.u32 %v2287_v61, 16  ;;  %v2418_v25 = vpack.c.b16 %v5368_v53, %v5335_v39  ;;  %v445_v28 = vld [vmem:[%s4526_s25 + $0x1d8] sm:$0x1] }
 0x110   : > { %4122 = vmatmul.msk.bf16.gmra.mxu2 %vm1446_vm5, %v4112_v6  ;;  %v892_v43 = vpop.permute.xlu1 %891  ;;  %v1175_v36 = vmul.f32 %v1062_v33, %v671_v58  ;;  %v882_v20 = vpop.permute.xlu0 %881  ;;  %v2017_v24 = vrot.slane %v2015_v8, 5  ;;  %v4116_v51 = vor.u32 %v5376_v16, %v5374_v30  ;;  %v2004_v38 = vsel %vm4823_vm8, %v1999_v23, %v2003_v1  ;;  %v2288_v6 = vld [vmem:[#allocation2 + $0x2c] sm:$0x1]  ;;  %v5430_v0 = vld [vmem:[%s6100_s6] ss:$0 sm:$0xff] }
 0x111   : > { %v1141_v50 = vmul.f32 %v892_v43, %v637_v47  ;;  %v1139_v57 = vmul.f32 %v882_v20, %v635_v48  ;;  %v1315_v58 = vld [vmem:[#allocation2 + $0x6c] sm:$0x1]  ;;  %v5400_v39 = vadd.f32 %v5010_v62, %v515_v4  ;;  %v2354_v27 = vrot.slane %v2352_v11, 4  ;;  %v2290_v48 = vld [vmem:[#allocation2 + $0x34] sm:$0x1] }
 0x112   : > { %v1247_v14 = vpack.c.bf16 %v1175_v36, %v1175_v36  ;;  %v2013_v63 = vrot.slane %v2012_v40, 4  ;;  %v2357_v47 = vrot.slane %v2355_v17, 5  ;;  %v2361_v32 = vshll.u32 %v2288_v6, 16  ;;  %v443_v4 = vld [vmem:[%s4526_s25 + $0x1c8] sm:$0x1] }
 0x113   : > { %v1213_v18 = vpack.c.bf16 %v1141_v50, %v1141_v50  ;;  %v1211_v5 = vpack.c.bf16 %v1139_v57, %v1139_v57  ;;  %v2366_v29 = vshrl.u32 %v2289_v15, 16  ;;  %v2369_v9 = vshll.u32 %v2289_v15, 16  ;;  %v1327_v11 = vld [vmem:[#allocation2 + $0x84] sm:$0x1]  ;;  %v1323_v43 = vld [vmem:[#allocation2 + $0x7c] sm:$0x1] }
 0x114   : > { %v1384_v41 = vsel %vm4600_vm4, %v1247_v14, %v1383_v22  ;;  %v2053_v19 = vunpack.c.l.b16 %v2004_v38  ;;  %v2018_v37 = vsel %vm4823_vm8, %v2013_v63, %v2017_v24  ;;  %v2358_v44 = vor.u32 %v2357_v47, %v2354_v27  ;;  %v4136_v38 = vld [vmem:[#allocation2 + $0x70] sm:$0xf]  ;;  %v4313_v6 = vld [vmem:[#allocation2 + $0x74] sm:$0xf0]  ;;  %v2293_v30 = vld [vmem:[#allocation2 + $0x40] sm:$0xf] }
 0x115   : > { %v1316_v12 = vsel %vm4600_vm4, %v1213_v18, %v1315_v58  ;;  %1385 = vst [vmem:[#allocation2 + $0xf4] sm:$0x1] %v1384_v41  ;;  %v1312_v62 = vsel %vm4600_vm4, %v1211_v5, %v1311_v21  ;;  %v5408_v34 = vpop.f32.mrf.mxu0  ;;  %v2368_v35 = vrot.slane %v2366_v29, 4  ;;  %v2371_v31 = vrot.slane %v2369_v9, 5  ;;  %v1934_v18 = vld [vmem:[#allocation2 + $0xcc] sm:$0x1] }
 0x116   : > { %1317 = vst [vmem:[#allocation2 + $0x6c] sm:$0x1] %v1316_v12  ;;  %v663_v2 = vmax.f32 %v5400_v39, 0.0  ;;  %v2363_v8 = vrot.slane %v2361_v32, 5  ;;  %v2375_v61 = vshll.u32 %v2290_v48, 16  ;;  %v2020_v33 = vshrl.u32 %v1931_v10, 16 }
 0x117   : > { %1313 = vst [vmem:[#allocation2 + $0x64] sm:$0x1] %v1312_v62  ;;  %4143 = vmatmul.msk.bf16.gmra.mxu3 %vm1446_vm5, %v4133_v55  ;;  %v1092_v53 = vpop.permute.xlu2 %1091  ;;  %v2372_v1 = vor.u32 %v2371_v31, %v2368_v35  ;;  %v2023_v23 = vshll.u32 %v1931_v10, 16  ;;  %v2054_v55 = vunpack.c.l.b16 %v2018_v37  ;;  %v2359_v20 = vrot.slane %v2358_v44, 4  ;;  %v5449_v9 = vld [vmem:[%s6101_s7] ss:$0 sm:$0xff] }
 0x118   : > { %4148 = vmatmul.msk.bf16.gmra.mxu0 %vm1446_vm5, %v2418_v25  ;;  %v922_v45 = vpop.permute.xlu1 %921  ;;  %v1181_v49 = vmul.f32 %v1092_v53, %v677_v7  ;;  %v912_v54 = vpop.permute.xlu0 %911  ;;  %v521_v25 = vmul.f32 %v4995_v46, %v445_v28  ;;  %v2377_v22 = vrot.slane %v2375_v61, 5  ;;  %v519_v26 = vmul.f32 %v5430_v0, %v443_v4  ;;  %v449_v28 = vld [vmem:[%s4526_s25 + $0x1f8] sm:$0x1] }
 0x119   : > { %v1147_v40 = vmul.f32 %v922_v45, %v643_v52  ;;  %v1145_v60 = vmul.f32 %v912_v54, %v641_v56  ;;  %v2373_v7 = vrot.slane %v2372_v1, 4  ;;  %v1932_v52 = vld [vmem:[#allocation2 + $0xc4] sm:$0x1]  ;;  %v1933_v56 = vld [vmem:[#allocation2 + $0xc8] sm:$0xf]  ;;  %v2364_v46 = vsel %vm4823_vm8, %v2359_v20, %v2363_v8 }
 0x11a   : > { %v1253_v17 = vpack.c.bf16 %v1181_v49, %v1181_v49  ;;  %v5424_v36 = vpop.f32.mrf.mxu3  ;;  %v2022_v15 = vrot.slane %v2020_v33, 4  ;;  %v2025_v58 = vrot.slane %v2023_v23, 5  ;;  %v2059_v27 = vpack.c.b16 %v2054_v55, %v2053_v19  ;;  %v451_v19 = vld [vmem:[%s4526_s25 + $0x208] sm:$0x1]  ;;  %v2291_v45 = vld [vmem:[#allocation2 + $0x38] sm:$0xf] }
 0x11b   : > { %v1219_v24 = vpack.c.bf16 %v1147_v40, %v1147_v40  ;;  %v1217_v50 = vpack.c.bf16 %v1145_v60, %v1145_v60  ;;  %v2378_v5 = vsel %vm4823_vm8, %v2373_v7, %v2377_v22  ;;  %v2029_v63 = vshll.u32 %v1932_v52, 16  ;;  %v1367_v49 = vld [vmem:[#allocation2 + $0xd4] sm:$0x1]  ;;  %v2294_v52 = vld [vmem:[#allocation2 + $0x44] sm:$0x1] }
 0x11c   : > { %v1396_v57 = vsel %vm4600_vm4, %v1253_v17, %v1395_v42  ;;  %v2034_v47 = vshrl.u32 %v1933_v56, 16  ;;  %v2037_v41 = vshll.u32 %v1933_v56, 16  ;;  %v4137_v32 = vor.u32 %v4313_v6, %v4136_v38 }
 0x11d   : > { %v1328_v14 = vsel %vm4600_vm4, %v1219_v24, %v1327_v11  ;;  %1397 = vst [vmem:[#allocation2 + $0x10c] sm:$0x1] %v1396_v57  ;;  %v1324_v21 = vsel %vm4600_vm4, %v1217_v50, %v1323_v43  ;;  %v5441_v39 = vpop.f32.mrf.mxu0  ;;  %v2413_v29 = vunpack.c.l.b16 %v2364_v46  ;;  %v597_v12 = vadd.f32 %v5449_v9, %v521_v25  ;;  %v2292_v43 = vld [vmem:[#allocation2 + $0x3c] sm:$0x1] }
 0x11e   : > { %1329 = vst [vmem:[#allocation2 + $0x84] sm:$0x1] %v1328_v14  ;;  %v595_v62 = vadd.f32 %v5449_v9, %v519_v26  ;;  %v2026_v44 = vor.u32 %v2025_v58, %v2022_v15  ;;  %v2036_v35 = vrot.slane %v2034_v47, 4  ;;  %v2039_v31 = vrot.slane %v2037_v41, 5  ;;  %v1379_v14 = vld [vmem:[#allocation2 + $0xec] sm:$0x1] }
 0x11f   : > { %1325 = vst [vmem:[#allocation2 + $0x7c] sm:$0x1] %v1324_v21  ;;  %4102 = vmatmul.msk.bf16.gmra.mxu1 %vm1446_vm5, %v2059_v27  ;;  %v1107_v48 = vpop.permute.xlu2 %1106  ;;  %v2414_v8 = vunpack.c.l.b16 %v2378_v5  ;;  %v2043_v61 = vshll.u32 %v1934_v18, 16  ;;  %v2031_v1 = vrot.slane %v2029_v63, 5  ;;  %v527_v33 = vmul.f32 %v5430_v0, %v451_v19  ;;  %v1375_v27 = vld [vmem:[#allocation2 + $0xe4] sm:$0x1] }
 0x120   : > { %4123 = vmatmul.msk.bf16.gmra.mxu2 %vm1446_vm5, %v4116_v51  ;;  %v1022_v10 = vpop.permute.xlu1 %1021  ;;  %v1017_v37 = vpop.permute.xlu0 %1016  ;;  %v2040_v4 = vor.u32 %v2039_v31, %v2036_v35  ;;  %v669_v51 = vmax.f32 %v597_v12, 0.0  ;;  %v525_v23 = vmul.f32 %v5430_v0, %v449_v28  ;;  %v667_v40 = vmax.f32 %v595_v62, 0.0  ;;  %v457_v63 = vld [vmem:[%s4526_s25 + $0x238] sm:$0x1] }
 0x121   : > { %v1167_v53 = vmul.f32 %v1022_v10, %v663_v2  ;;  %v2027_v42 = vrot.slane %v2026_v44, 4  ;;  %v2380_v55 = vshrl.u32 %v2291_v45, 16  ;;  %v2419_v17 = vpack.c.b16 %v2414_v8, %v2413_v29  ;;  %v455_v29 = vld [vmem:[%s4526_s25 + $0x228] sm:$0x1]  ;;  %v4310_v10 = vld [vmem:[#allocation2 + $0x3c] sm:$0xf0] }
 0x122   : > { %v5459_v54 = vpop.f32.mrf.mxu3  ;;  %v2041_v60 = vrot.slane %v2040_v4, 4  ;;  %v2383_v20 = vshll.u32 %v2291_v45, 16  ;;  %v2394_v7 = vshrl.u32 %v2293_v30, 16  ;;  %v2045_v50 = vrot.slane %v2043_v61, 5 }
 0x123   : > { %v1239_v16 = vpack.c.bf16 %v1167_v53, %v1167_v53  ;;  %v2032_v24 = vsel %vm4823_vm8, %v2027_v42, %v2031_v1  ;;  %v603_v22 = vadd.f32 %v5449_v9, %v527_v33  ;;  %v601_v26 = vadd.f32 %v5449_v9, %v525_v23 }
 0x124   : > { %v2382_v56 = vrot.slane %v2380_v55, 4  ;;  %v2385_v57 = vrot.slane %v2383_v20, 5  ;;  %v2046_v6 = vsel %vm4823_vm8, %v2041_v60, %v2045_v50  ;;  %v2389_v46 = vshll.u32 %v2292_v43, 16  ;;  %v1387_v43 = vld [vmem:[#allocation2 + $0xfc] sm:$0x1] }
 0x125   : > { %v1368_v2 = vsel %vm4600_vm4, %v1239_v16, %v1367_v49  ;;  %v1536_v11 = vpop.f32.mrf.mxu0  ;;  %v2396_v15 = vrot.slane %v2394_v7, 4  ;;  %v2397_v58 = vshll.u32 %v2293_v30, 16  ;;  %v2055_v5 = vunpack.c.l.b16 %v2032_v24  ;;  %v4119_v49 = vld [vmem:[#allocation2 + $0x38] sm:$0xf] }
 0x126   : > { %1369 = vst [vmem:[#allocation2 + $0xd4] sm:$0x1] %v1368_v2  ;;  %v5466_v25 = vadd.f32 %v1536_v11, %v5408_v34  ;;  %v675_v41 = vmax.f32 %v603_v22, 0.0  ;;  %v2056_v19 = vunpack.c.l.b16 %v2046_v6  ;;  %v2386_v37 = vor.u32 %v2385_v57, %v2382_v56  ;;  %v4140_v22 = vld [vmem:[#allocation2 + $0x80] sm:$0xf] }
 0x127   : > { %4144 = vmatmul.msk.bf16.gmra.mxu3 %vm1446_vm5, %v4137_v32  ;;  %v2399_v48 = vrot.slane %v2397_v58, 5  ;;  %v2403_v32 = vshll.u32 %v2294_v52, 16  ;;  %v673_v44 = vmax.f32 %v601_v26, 0.0  ;;  %v2391_v35 = vrot.slane %v2389_v46, 5 }
 0x128   : > { %4149 = vmatmul.msk.bf16.gmra.mxu0 %vm1446_vm5, %v2419_v17  ;;  %v1052_v38 = vpop.permute.xlu1 %1051  ;;  %v1042_v34 = vpop.permute.xlu0 %1041  ;;  %v533_v28 = vmul.f32 %v5430_v0, %v457_v63  ;;  %v2060_v45 = vpack.c.b16 %v2056_v19, %v2055_v5  ;;  %v531_v1 = vmul.f32 %v5430_v0, %v455_v29  ;;  %v4120_v4 = vor.u32 %v4310_v10, %v4119_v49  ;;  %v4314_v0 = vld [vmem:[#allocation2 + $0x84] sm:$0xf0]  ;;  %v1391_v17 = vld [vmem:[#allocation2 + $0x104] sm:$0x1] }
 0x129   : > { %v1173_v21 = vmul.f32 %v1052_v38, %v669_v51  ;;  %v1171_v18 = vmul.f32 %v1042_v34, %v667_v40  ;;  %v2400_v31 = vor.u32 %v2399_v48, %v2396_v15  ;;  %v2405_v30 = vrot.slane %v2403_v32, 5 }
 0x12a   : > { %v5477_v47 = vpop.f32.mrf.mxu3  ;;  %v2387_v16 = vrot.slane %v2386_v37, 4  ;;  %v609_v42 = vadd.f32 %v5449_v9, %v533_v28  ;;  %v607_v11 = vadd.f32 %v5449_v9, %v531_v1  ;;  %v4141_v26 = vor.u32 %v4314_v0, %v4140_v22  ;;  %v2677_v37 = vld [vmem:[%s6098_s4] sm:$0xf]  ;;  %v4151_v28 = vld [vmem:[%s6098_s4 + $0x4] sm:$0xf] }
 0x12b   : > { %v1245_v12 = vpack.c.bf16 %v1173_v21, %v1173_v21  ;;  %v1243_v62 = vpack.c.bf16 %v1171_v18, %v1171_v18  ;;  %v2401_v33 = vrot.slane %v2400_v31, 4  ;;  %v1399_v18 = vld [vmem:[#allocation2 + $0x114] sm:$0x1]  ;;  %v2891_v13 = vsel %vm2825_vm9, %v2677_v37, 0 }
 0x12c   : > { %v2392_v2 = vsel %vm4823_vm8, %v2387_v16, %v2391_v35  ;;  %v681_v34 = vmax.f32 %v609_v42, 0.0  ;;  %v679_v6 = vmax.f32 %v607_v11, 0.0  ;;  %2900 = vmatpush.bf16.msra.mxu2 %v2891_v13  ;;  %vm2947_vm0 = vcmask 1046532  }
 0x12d   : > { %v1380_v53 = vsel %vm4600_vm4, %v1245_v12, %v1379_v14  ;;  %v1376_v8 = vsel %vm4600_vm4, %v1243_v62, %v1375_v27  ;;  %v5485_v61 = vpop.f32.mrf.mxu0  ;;  %v2406_v40 = vsel %vm4823_vm8, %v2401_v33, %v2405_v30  ;;  %v2415_v52 = vunpack.c.l.b16 %v2392_v2  ;;  %v1403_v27 = vld [vmem:[#allocation2 + $0x11c] sm:$0x1]  ;;  %vm5677_vm2 = vmor %vm2946_vm15, %vm2947_vm0 }
 0x12e   : > { %1381 = vst [vmem:[#allocation2 + $0xec] sm:$0x1] %v1380_v53  ;;  %v2416_v7 = vunpack.c.l.b16 %v2406_v40 }
 0x12f   : > { %1377 = vst [vmem:[#allocation2 + $0xe4] sm:$0x1] %v1376_v8  ;;  %4103 = vmatmul.msk.bf16.gmra.mxu1 %vm1446_vm5, %v2060_v45  ;;  %v2827_v8 = vsel %vm2825_vm9, %v4151_v28, 0 }
 0x130   : > { %4124 = vmatmul.msk.bf16.gmra.mxu2 %vm1446_vm5, %v4120_v4  ;;  %v1082_v51 = vpop.permute.xlu1 %1081  ;;  %v1072_v23 = vpop.permute.xlu0 %1071  ;;  %v2420_v46 = vpack.c.b16 %v2416_v7, %v2415_v52  ;;  %2836 = vmatpush.bf16.msra.mxu1 %v2827_v8 }
 0x131   : > { %v1179_v60 = vmul.f32 %v1082_v51, %v675_v41  ;;  %v1177_v55 = vmul.f32 %v1072_v23, %v673_v44 }
 0x132   : > { %v5496_v20 = vpop.f32.mrf.mxu3 }
 0x133   : > { %v1251_v24 = vpack.c.bf16 %v1179_v60, %v1179_v60  ;;  %v1249_v50 = vpack.c.bf16 %v1177_v55, %v1177_v55 }
 0x134   : > { %v5517_v12 = vpop.f32.mrf.mxu1 }
 0x135   : > { %v1392_v56 = vsel %vm4600_vm4, %v1251_v24, %v1391_v17  ;;  %v1388_v57 = vsel %vm4600_vm4, %v1249_v50, %v1387_v43  ;;  %v1725_v38 = vpop.f32.mrf.mxu0 }
 0x136   : > { %1393 = vst [vmem:[#allocation2 + $0x104] sm:$0x1] %v1392_v56  ;;  %v5503_v9 = vadd.f32 %v1725_v38, %v5466_v25  ;;  %v1539_v56 = vadd.f32 %v5485_v61, %v5441_v39  ;;  %v5622_v39 = vld [vmem:[%s6102_s8] ss:$0 sm:$0xff] }
 0x137   : > { %1389 = vst [vmem:[#allocation2 + $0xfc] sm:$0x1] %v1388_v57  ;;  %4145 = vmatmul.msk.bf16.gmra.mxu3 %vm1446_vm5, %v4141_v26 }
 0x138   : > { %4150 = vmatmul.msk.bf16.gmra.mxu0 %vm1446_vm5, %v2420_v46  ;;  %v1112_v15 = vpop.permute.xlu1 %1111  ;;  %v1102_v58 = vpop.permute.xlu0 %1101 }
 0x139   : > { %v1185_v14 = vmul.f32 %v1112_v15, %v681_v34  ;;  %v1183_v21 = vmul.f32 %v1102_v58, %v679_v6 }
 0x13a   : > { %v5507_v5 = vpop.f32.mrf.mxu3 }
 0x13b   : > { %v1257_v63 = vpack.c.bf16 %v1185_v14, %v1185_v14  ;;  %v1255_v41 = vpack.c.bf16 %v1183_v21, %v1183_v21  ;;  %v1542_v21 = vadd.f32 %v5517_v12, %v5424_v36 }
 0x13c   : > { %v5524_v44 = vpop.f32.mrf.mxu1 }
 0x13d   : > { %v1404_v25 = vsel %vm4600_vm4, %v1257_v63, %v1403_v27  ;;  %v1400_v48 = vsel %vm4600_vm4, %v1255_v41, %v1399_v18  ;;  %v5513_v32 = vpop.f32.mrf.mxu0  ;;  %v1544_v13 = vadd.f32 %v5524_v44, %v5459_v54 }
 0x13e   : > { %1405 = vst [vmem:[#allocation2 + $0x11c] sm:$0x1] %v1404_v25  ;;  %v1746_v34 = vadd.f32 %v5513_v32, %v1539_v56  ;;  %v4184_v56 = vld [vmem:[%s6098_s4 + $0x8] sm:$0xf] }
 0x13f   : > { %1401 = vst [vmem:[#allocation2 + $0x114] sm:$0x1] %v1400_v48  ;;  %v3008_v54 = vsel %vm2825_vm9, %v4184_v56, 0 }
 0x140   : > { %3017 = vmatpush.bf16.msrb.mxu3 %v3008_v54 }
 0x142   : > { %v5515_v29 = vpop.f32.mrf.mxu3 }
 0x144   : > { %v5535_v45 = vpop.f32.mrf.mxu1 }
 0x145   : > { %v1891_v62 = vpop.f32.mrf.mxu0 }
 0x146   : > { %v5527_v35 = vpop.f32.mrf.mxu2 }
 0x147   : > { %v1747_v41 = vadd.f32 %v5527_v35, %v1542_v21 }
 0x14a   : > { %v1808_v19 = vpop.f32.mrf.mxu3 }
 0x14b   : > { %v1828_v50 = vadd.f32 %v1808_v19, %v5503_v9 }
 0x14c   : > { %v5545_v30 = vpop.f32.mrf.mxu1 }
 0x14d   : > { %v5519_v10 = vpop.f32.mrf.mxu0  ;;  %v1911_v57 = vadd.f32 %v1891_v62, %v1828_v50 }
 0x14e   : > { %v5537_v49 = vpop.f32.mrf.mxu2 }
 0x14f   : > { %v1748_v50 = vadd.f32 %v5537_v49, %v1544_v13 }
 0x152   : > { %v1810_v31 = vpop.f32.mrf.mxu3 }
 0x153   : > { %v1829_v9 = vadd.f32 %v1810_v31, %v1746_v34 }
 0x155   : > { %v5532_v53 = vpop.f32.mrf.mxu0  ;;  %v1912_v27 = vadd.f32 %v5519_v10, %v1829_v9  ;;  %v2619_v9 = vld [vmem:[#allocation3 + $0x8] sm:$0xf] }
 0x15a   : > { %v5539_v1 = vpop.f32.mrf.mxu3 }
 0x15b   : > { %v5543_v33 = vpop.f32.mrf.mxu2  ;;  %v1830_v32 = vadd.f32 %v5539_v1, %v1747_v41 }
 0x15d   : > { %v5541_v4 = vpop.f32.mrf.mxu0  ;;  %v1913_v8 = vadd.f32 %v5532_v53, %v1830_v32 }
 0x15e   : > { %v5551_v23 = vpop.f32.mrf.mxu1 }
 0x162   : > { %v5547_v16 = vpop.f32.mrf.mxu3 }
 0x163   : > { %v5555_v42 = vpop.f32.mrf.mxu2 }
 0x165   : > { %v5549_v51 = vpop.f32.mrf.mxu0 }
 0x166   : > { %v5563_v2 = vpop.f32.mrf.mxu1 }
 0x16a   : > { %v5553_v40 = vpop.f32.mrf.mxu3 }
 0x16d   : > { %v5557_v60 = vpop.f32.mrf.mxu0 }
 0x172   : > { %v5559_v55 = vpop.f32.mrf.mxu3 }
 0x173   : > { %v5561_v0 = vpop.f32.mrf.mxu2 }
 0x175   : > { %v5567_v11 = vpop.f32.mrf.mxu0 }
 0x17a   : > { %v5579_v17 = vpop.f32.mrf.mxu3 }
 0x17b   : > { %v5583_v43 = vpop.f32.mrf.mxu2 }
 0x17c   : > { %v2085_v7 = vpop.f32.mrf.mxu1 }
 0x17d   : > { %v5589_v24 = vpop.f32.mrf.mxu0  ;;  %v2105_v6 = vadd.f32 %v2085_v7, %v1911_v57  ;;  %v1831_v57 = vadd.f32 %v5547_v16, %v1748_v50  ;;  %v2627_v50 = vld [vmem:[#allocation3 + $0x10] sm:$0xf] }
 0x182   : > { %v5602_v22 = vpop.f32.mrf.mxu3 }
 0x183   : > { %v2168_v26 = vpop.f32.mrf.mxu2 }
 0x184   : > { %v2087_v52 = vpop.f32.mrf.mxu1  ;;  %v2188_v46 = vadd.f32 %v2168_v26, %v2105_v6  ;;  %v1547_v6 = vadd.f32 %v5535_v45, %v5477_v47  ;;  %v1914_v47 = vadd.f32 %v5541_v4, %v1831_v57 }
 0x185   : > { %v2445_v38 = vpop.f32.mrf.mxu0  ;;  %v2106_v25 = vadd.f32 %v2087_v52, %v1912_v27 }
 0x18a   : > { %v2251_v15 = vpop.f32.mrf.mxu3 }
 0x18b   : > { %v2170_v58 = vpop.f32.mrf.mxu2  ;;  %v2271_v14 = vadd.f32 %v2251_v15, %v2188_v46  ;;  %v2624_v46 = vld [vmem:[#allocation3 + $0xc] sm:$0x1] }
 0x18c   : > { %v2090_v61 = vpop.f32.mrf.mxu1  ;;  %v2189_v62 = vadd.f32 %v2170_v58, %v2106_v25 }
 0x18d   : > { %v2465_v18 = vadd.f32 %v2445_v38, %v2271_v14  ;;  %v2447_v63 = vpop.f32.mrf.mxu0  ;;  %v2107_v26 = vadd.f32 %v2090_v61, %v1913_v8  ;;  %v4223_v8 = vld [vmem:[%s6098_s4 + $0x14] sm:$0xf] }
 0x18e   : > { %v3406_v56 = vsel %vm2825_vm9, %v4223_v8, 0 }
 0x18f   : > { %v2477_v48 = vmul.f32 %v5622_v39, %v2465_v18  ;;  %v1549_v18 = vadd.f32 %v5545_v30, %v5496_v20  ;;  %3415 = vmatpush.bf16.msrb.mxu2 %v3406_v56 }
 0x191   : > { %v2489_v19 = vadd.f32 %v5630_v3, %v2477_v48 }
 0x192   : > { %v2253_v36 = vpop.f32.mrf.mxu3 }
 0x193   : > { %v2497_v12 = vmax.f32 %v2489_v19, 0.0  ;;  %v2173_v10 = vpop.f32.mrf.mxu2  ;;  %v2272_v37 = vadd.f32 %v2253_v36, %v2189_v62  ;;  %v1552_v19 = vadd.f32 %v5551_v23, %v5507_v5  ;;  %v1750_v36 = vadd.f32 %v5555_v42, %v1549_v18 }
 0x194   : > { %v2092_v31 = vpop.f32.mrf.mxu1  ;;  %v2190_v49 = vadd.f32 %v2173_v10, %v2107_v26 }
 0x195   : > { %v2527_v28 = vpack.c.bf16 %v2497_v12, %v2497_v12  ;;  %v2466_v35 = vadd.f32 %v2447_v63, %v2272_v37  ;;  %v2450_v7 = vpop.f32.mrf.mxu0  ;;  %v1749_v63 = vadd.f32 %v5543_v33, %v1547_v6  ;;  %v2108_v33 = vadd.f32 %v2092_v31, %v1914_v47  ;;  %v5673_v12 = vld [vmem:[#allocation3 + $0x4] sm:$0x1]  ;;  %v2922_v37 = vld [vmem:[#allocation3] sm:$0xe]  ;;  %v4189_v31 = vld [vmem:[%s6098_s4 + $0xc] sm:$0xf] }
 0x196   : > { %v2951_v13 = vrot.slane %v5673_v12, 5  ;;  %v1751_v6 = vadd.f32 %v5561_v0, %v1552_v19  ;;  %v2669_v19 = vld [vmem:[#allocation3] sm:$0xf] }
 0x197   : > { %v2536_v1 = vshrl.u32 %v2527_v28, 16  ;;  %v2478_v52 = vmul.f32 %v5622_v39, %v2466_v35  ;;  %v2539_v38 = vshll.u32 %v2527_v28, 16  ;;  %v1832_v20 = vadd.f32 %v5553_v40, %v1749_v63 }
 0x198   : > { %v4176_v40 = vrot.slane %v2922_v37, 9  ;;  %v1554_v35 = vadd.f32 %v5563_v2, %v5515_v29  ;;  %v1834_v47 = vadd.f32 %v5579_v17, %v1751_v6 }
 0x199   : > { %v2538_v44 = vrot.slane %v2536_v1, 7  ;;  %v2490_v34 = vadd.f32 %v5630_v3, %v2478_v52  ;;  %v2630_v1 = vld [vmem:[#allocation3 + $0x14] sm:$0x1]  ;;  %v3090_v52 = vsel %vm2825_vm9, %v4189_v31, 0  ;;  %v1915_v29 = vadd.f32 %v5549_v51, %v1832_v20 }
 0x19a   : > { %v2256_v15 = vpop.f32.mrf.mxu3  ;;  %3099 = vmatpush.bf16.msrb.mxu0 %v3090_v52  ;;  %v2952_v2 = vsel %vm5677_vm2, %v4176_v40, %v2951_v13  ;;  %v1752_v0 = vadd.f32 %v5583_v43, %v1554_v35 }
 0x19b   : > { %v2541_v58 = vor.u32 %v2539_v38, %v2538_v44  ;;  %v2542_v14 = vrot.slane %v2538_v44, 4  ;;  %v2498_v61 = vmax.f32 %v2490_v34, 0.0  ;;  %v2175_v21 = vpop.f32.mrf.mxu2  ;;  %v2273_v27 = vadd.f32 %v2256_v15, %v2190_v49  ;;  %v4158_v34 = vld [vmem:[#allocation3] sm:$0xf] }
 0x19c   : > { %v2095_v45 = vpop.f32.mrf.mxu1  ;;  %v2191_v5 = vadd.f32 %v2175_v21, %v2108_v33 }
 0x19d   : > { %v2620_v41 = vsel %vm5647_vm13, %v2541_v58, %v2619_v9  ;;  %v2625_v25 = vsel %vm5656_vm14, %v2542_v14, %v2624_v46  ;;  %v2528_v48 = vpack.c.bf16 %v2498_v61, %v2498_v61  ;;  %v2467_v32 = vadd.f32 %v2450_v7, %v2273_v27  ;;  %v2452_v62 = vpop.f32.mrf.mxu0 }
 0x19e   : > { %2621 = vst [vmem:[#allocation3 + $0x8] sm:$0xf] %v2620_v41  ;;  %v1833_v7 = vadd.f32 %v5559_v55, %v1750_v36  ;;  %v2109_v51 = vadd.f32 %v2095_v45, %v1915_v29  ;;  %v2983_v45 = vunpack.c.l.b16 %v2952_v2 }
 0x19f   : > { %2626 = vst [vmem:[#allocation3 + $0xc] sm:$0x1] %v2625_v25  ;;  %v2544_v4 = vshrl.u32 %v2528_v48, 16  ;;  %v2479_v30 = vmul.f32 %v5622_v39, %v2467_v32  ;;  %v2547_v10 = vshll.u32 %v2528_v48, 16  ;;  %v5709_v32 = vadd.f32 %v5602_v22, %v1752_v0 }
 0x1a0   : > { %v2690_v22 = vshll.u32 %v2669_v19, 16 }
 0x1a1   : > { %v2546_v28 = vrot.slane %v2544_v4, 7  ;;  %v2491_v23 = vadd.f32 %v5630_v3, %v2479_v30  ;;  %v2633_v4 = vld [vmem:[#allocation3 + $0x18] sm:$0xf]  ;;  %v2687_v30 = vshrl.u32 %v2669_v19, 16 }
 0x1a2   : > { %v2258_v26 = vpop.f32.mrf.mxu3  ;;  %v2692_v56 = vrot.slane %v2690_v22, 5 }
 0x1a3   : > { %v2549_v57 = vor.u32 %v2547_v10, %v2546_v28  ;;  %v2550_v54 = vrot.slane %v2546_v28, 4  ;;  %v2499_v44 = vmax.f32 %v2491_v23, 0.0  ;;  %v2178_v38 = vpop.f32.mrf.mxu2  ;;  %v2274_v49 = vadd.f32 %v2258_v26, %v2191_v5  ;;  %v2636_v10 = vld [vmem:[#allocation3 + $0x1c] sm:$0x1] }
 0x1a4   : > { %v5694_v55 = vpop.f32.mrf.mxu1  ;;  %v2192_v43 = vadd.f32 %v2178_v38, %v2109_v51  ;;  %v2696_v28 = vshll.u32 %v5673_v12, 16  ;;  %v2689_v52 = vrot.slane %v2687_v30, 4 }
 0x1a5   : > { %v2628_v9 = vsel %vm5647_vm13, %v2549_v57, %v2627_v50  ;;  %v2631_v46 = vsel %vm5656_vm14, %v2550_v54, %v2630_v1  ;;  %v2529_v15 = vpack.c.bf16 %v2499_v44, %v2499_v44  ;;  %v2468_v58 = vadd.f32 %v2452_v62, %v2274_v49  ;;  %v4315_v14 = vld [vmem:[#allocation3 + $0x4] sm:$0xf0]  ;;  %v2455_v21 = vpop.f32.mrf.mxu0 }
 0x1a6   : > { %v2923_v61 = vld [vmem:[#allocation3 + $0x8] sm:$0xe]  ;;  %2629 = vst [vmem:[#allocation3 + $0x10] sm:$0xf] %v2628_v9  ;;  %v4159_v27 = vor.u32 %v4315_v14, %v4158_v34  ;;  %v5703_v18 = vld [vmem:[#allocation3 + $0xc] sm:$0x1]  ;;  %v1916_v50 = vadd.f32 %v5557_v60, %v1833_v7  ;;  %v1917_v60 = vadd.f32 %v5567_v11, %v1834_v47  ;;  %v2693_v6 = vor.u32 %v2692_v56, %v2689_v52 }
 0x1a7   : > { %v4177_v63 = vrot.slane %v2923_v61, 9  ;;  %2632 = vst [vmem:[#allocation3 + $0x14] sm:$0x1] %v2631_v46  ;;  %v2552_v41 = vshrl.u32 %v2529_v15, 16  ;;  %v2480_v25 = vmul.f32 %v5622_v39, %v2468_v58  ;;  %v2955_v48 = vrot.slane %v5703_v18, 5 }
 0x1a8   : > { %v2555_v62 = vshll.u32 %v2529_v15, 16  ;;  %4172 = vmatmul.msk.bf16.vlgmr.msra.gmra.mxu2 %vm2812_vm3, %v4159_v27  ;;  %v2670_v36 = vld [vmem:[#allocation3 + $0x8] sm:$0xf]  ;;  %v4210_v34 = vld [vmem:[%s6098_s4 + $0x10] sm:$0xf]  ;;  %v2698_v29 = vrot.slane %v2696_v28, 5  ;;  %v2110_v9 = vadd.f32 %v5694_v55, %v1916_v50 }
 0x1a9   : > { %v2554_v20 = vrot.slane %v2552_v41, 7  ;;  %v2492_v17 = vadd.f32 %v5630_v3, %v2480_v25  ;;  %v2956_v33 = vsel %vm5677_vm2, %v4177_v63, %v2955_v48  ;;  %v2701_v5 = vshrl.u32 %v2670_v36, 16  ;;  %v4192_v38 = vld [vmem:[#allocation3 + $0x8] sm:$0xf]  ;;  %v2639_v41 = vld [vmem:[#allocation3 + $0x20] sm:$0xf] }
 0x1aa   : > { %v2261_v37 = vpop.f32.mrf.mxu3  ;;  %v2984_v13 = vunpack.c.l.b16 %v2956_v33  ;;  %v2694_v14 = vrot.slane %v2693_v6, 4  ;;  %v2704_v61 = vshll.u32 %v2670_v36, 16  ;;  %v2710_v0 = vshll.u32 %v5703_v18, 16  ;;  %v2642_v25 = vld [vmem:[#allocation3 + $0x24] sm:$0x1] }
 0x1ab   : > { %v2557_v23 = vor.u32 %v2555_v62, %v2554_v20  ;;  %v2558_v40 = vrot.slane %v2554_v20, 4  ;;  %v2500_v31 = vmax.f32 %v2492_v17, 0.0  ;;  %v2180_v8 = vpop.f32.mrf.mxu2  ;;  %v2275_v35 = vadd.f32 %v2261_v37, %v2192_v43 }
 0x1ac   : > { %v2100_v1 = vpop.f32.mrf.mxu1  ;;  %v2991_v26 = vpack.c.b16 %v2984_v13, %v2983_v45  ;;  %v2703_v15 = vrot.slane %v2701_v5, 4  ;;  %v3284_v11 = vsel %vm2825_vm9, %v4210_v34, 0  ;;  %v2193_v27 = vadd.f32 %v2180_v8, %v2110_v9  ;;  %v2648_v9 = vld [vmem:[#allocation3 + $0x2c] sm:$0x1] }
 0x1ad   : > { %v2634_v57 = vsel %vm5647_vm13, %v2557_v23, %v2633_v4  ;;  %v2637_v54 = vsel %vm5656_vm14, %v2558_v40, %v2636_v10  ;;  %v2530_v44 = vpack.c.bf16 %v2500_v31, %v2500_v31  ;;  %v2469_v12 = vadd.f32 %v2455_v21, %v2275_v35  ;;  %v4319_v49 = vld [vmem:[#allocation3 + $0xc] sm:$0xf0]  ;;  %v2457_v58 = vpop.f32.mrf.mxu0  ;;  %3293 = vmatpush.bf16.msrb.mxu1 %v3284_v11 }
 0x1ae   : > { %2635 = vst [vmem:[#allocation3 + $0x18] sm:$0xf] %v2634_v57  ;;  %4185 = vmatmul.msk.bf16.vlgmr.msrb.gmra.mxu3 %vm2812_vm3, %v2991_v26  ;;  %v4193_v7 = vor.u32 %v4319_v49, %v4192_v38  ;;  %v5732_v47 = vld [vmem:[#allocation3 + $0x14] sm:$0x1]  ;;  %v2924_v55 = vld [vmem:[#allocation3 + $0x10] sm:$0xe]  ;;  %v2699_v62 = vsel %vm4823_vm8, %v2694_v14, %v2698_v29  ;;  %v1918_v18 = vadd.f32 %v5589_v24, %v5709_v32 }
 0x1af   : > { %2638 = vst [vmem:[#allocation3 + $0x1c] sm:$0x1] %v2637_v54  ;;  %v2560_v2 = vshrl.u32 %v2530_v44, 16  ;;  %v2481_v46 = vmul.f32 %v5622_v39, %v2469_v12  ;;  %v2563_v21 = vshll.u32 %v2530_v44, 16  ;;  %v2706_v43 = vrot.slane %v2704_v61, 5 }
 0x1b0   : > { %4206 = vmatmul.msk.bf16.vlgmr.msrb.gmra.mxu0 %vm2812_vm3, %v4193_v7  ;;  %v4178_v45 = vrot.slane %v2924_v55, 9  ;;  %v2111_v33 = vadd.f32 %v2100_v1, %v1917_v60  ;;  %v2712_v10 = vrot.slane %v2710_v0, 5  ;;  %v2959_v37 = vrot.slane %v5732_v47, 5  ;;  %v4162_v32 = vld [vmem:[#allocation3 + $0x10] sm:$0xf] }
 0x1b1   : > { %v2562_v51 = vrot.slane %v2560_v2, 7  ;;  %v2493_v63 = vadd.f32 %v5630_v3, %v2481_v46  ;;  %v2707_v30 = vor.u32 %v2706_v43, %v2703_v15  ;;  %v2800_v35 = vunpack.c.l.b16 %v2699_v62  ;;  %v2671_v49 = vld [vmem:[#allocation3 + $0x10] sm:$0xf]  ;;  %v2645_v2 = vld [vmem:[#allocation3 + $0x28] sm:$0xf] }
 0x1b2   : > { %v2263_v48 = vpop.f32.mrf.mxu3  ;;  %v2960_v56 = vsel %vm5677_vm2, %v4178_v45, %v2959_v37  ;;  %v2715_v29 = vshrl.u32 %v2671_v49, 16  ;;  %v2718_v61 = vshll.u32 %v2671_v49, 16 }
 0x1b3   : > { %v2565_v19 = vor.u32 %v2563_v21, %v2562_v51  ;;  %v2566_v36 = vrot.slane %v2562_v51, 4  ;;  %v2501_v20 = vmax.f32 %v2493_v63, 0.0  ;;  %v2183_v4 = vpop.f32.mrf.mxu2  ;;  %v2276_v17 = vadd.f32 %v2263_v48, %v2193_v27 }
 0x1b4   : > { %v2102_v24 = vpop.f32.mrf.mxu1  ;;  %v2194_v31 = vadd.f32 %v2183_v4, %v2111_v33  ;;  %v2708_v8 = vrot.slane %v2707_v30, 4  ;;  %v2985_v14 = vunpack.c.l.b16 %v2960_v56 }
 0x1b5   : > { %v2640_v13 = vsel %vm5647_vm13, %v2565_v19, %v2639_v41  ;;  %v2643_v22 = vsel %vm5656_vm14, %v2566_v36, %v2642_v25  ;;  %v2531_v28 = vpack.c.bf16 %v2501_v20, %v2501_v20  ;;  %v2470_v5 = vadd.f32 %v2457_v58, %v2276_v17  ;;  %v4316_v23 = vld [vmem:[#allocation3 + $0x14] sm:$0xf0]  ;;  %v2460_v46 = vpop.f32.mrf.mxu0 }
 0x1b6   : > { %v2925_v40 = vld [vmem:[#allocation3 + $0x18] sm:$0xe]  ;;  %2641 = vst [vmem:[#allocation3 + $0x20] sm:$0xf] %v2640_v13  ;;  %v4163_v50 = vor.u32 %v4316_v23, %v4162_v32  ;;  %v5743_v1 = vld [vmem:[#allocation3 + $0x1c] sm:$0x1]  ;;  %v2713_v44 = vsel %vm4823_vm8, %v2708_v8, %v2712_v10  ;;  %v2112_v12 = vadd.f32 %v2102_v24, %v1918_v18 }
 0x1b7   : > { %2644 = vst [vmem:[#allocation3 + $0x24] sm:$0x1] %v2643_v22  ;;  %v2568_v26 = vshrl.u32 %v2531_v28, 16  ;;  %v2482_v52 = vmul.f32 %v5622_v39, %v2470_v5  ;;  %v4179_v57 = vrot.slane %v2925_v40, 9  ;;  %v2571_v54 = vshll.u32 %v2531_v28, 16 }
 0x1b8   : > { %4173 = vmatmul.msk.bf16.gmra.mxu2 %vm2812_vm3, %v4163_v50  ;;  %v2963_v38 = vrot.slane %v5743_v1, 5  ;;  %v2801_v7 = vunpack.c.l.b16 %v2713_v44  ;;  %v2672_v6 = vld [vmem:[#allocation3 + $0x18] sm:$0xf]  ;;  %v2717_v41 = vrot.slane %v2715_v29, 4  ;;  %v2724_v25 = vshll.u32 %v5732_v47, 16 }
 0x1b9   : > { %v2570_v34 = vrot.slane %v2568_v26, 7  ;;  %v2494_v60 = vadd.f32 %v5630_v3, %v2482_v52  ;;  %v2729_v0 = vshrl.u32 %v2672_v6, 16  ;;  %v4196_v45 = vld [vmem:[#allocation3 + $0x18] sm:$0xf]  ;;  %v2720_v36 = vrot.slane %v2718_v61, 5 }
 0x1ba   : > { %v2266_v15 = vpop.f32.mrf.mxu3  ;;  %v2964_v58 = vsel %vm5677_vm2, %v4179_v57, %v2963_v38  ;;  %v2808_v27 = vpack.c.b16 %v2801_v7, %v2800_v35  ;;  %v2732_v13 = vshll.u32 %v2672_v6, 16  ;;  %v2738_v5 = vshll.u32 %v5743_v1, 16  ;;  %v2651_v50 = vld [vmem:[#allocation3 + $0x30] sm:$0xf]  ;;  %v2654_v26 = vld [vmem:[#allocation3 + $0x34] sm:$0x1] }
 0x1bb   : > { %v2573_v11 = vor.u32 %v2571_v54, %v2570_v34  ;;  %v2574_v51 = vrot.slane %v2570_v34, 4  ;;  %v2502_v21 = vmax.f32 %v2494_v60, 0.0  ;;  %v2277_v63 = vadd.f32 %v2266_v15, %v2194_v31  ;;  %v2185_v18 = vpop.f32.mrf.mxu2 }
 0x1bc   : > { %v2986_v55 = vunpack.c.l.b16 %v2964_v58  ;;  %4152 = vmatmul.msk.bf16.vlgmr.msra.gmra.mxu1 %vm2812_vm3, %v2808_v27  ;;  %v2731_v33 = vrot.slane %v2729_v0, 4  ;;  %v2721_v37 = vor.u32 %v2720_v36, %v2717_v41  ;;  %v2195_v22 = vadd.f32 %v2185_v18, %v2112_v12 }
 0x1bd   : > { %v2646_v48 = vsel %vm5647_vm13, %v2573_v11, %v2645_v2  ;;  %v2649_v62 = vsel %vm5656_vm14, %v2574_v51, %v2648_v9  ;;  %v2532_v43 = vpack.c.bf16 %v2502_v21, %v2502_v21  ;;  %v4320_v19 = vld [vmem:[#allocation3 + $0x1c] sm:$0xf0]  ;;  %v2471_v20 = vadd.f32 %v2460_v46, %v2277_v63  ;;  %v2462_v34 = vpop.f32.mrf.mxu0 }
 0x1be   : > { %2647 = vst [vmem:[#allocation3 + $0x28] sm:$0xf] %v2646_v48  ;;  %v2992_v4 = vpack.c.b16 %v2986_v55, %v2985_v14  ;;  %v4197_v17 = vor.u32 %v4320_v19, %v4196_v45  ;;  %v5761_v30 = vld [vmem:[#allocation3 + $0x24] sm:$0x1]  ;;  %v2926_v24 = vld [vmem:[#allocation3 + $0x20] sm:$0xe] }
 0x1bf   : > { %2650 = vst [vmem:[#allocation3 + $0x2c] sm:$0x1] %v2649_v62  ;;  %v2576_v47 = vshrl.u32 %v2532_v43, 16  ;;  %v2579_v10 = vshll.u32 %v2532_v43, 16  ;;  %v2483_v28 = vmul.f32 %v5622_v39, %v2471_v20  ;;  %v2967_v32 = vrot.slane %v5761_v30, 5 }
 0x1c0   : > { %4186 = vmatmul.msk.bf16.gmra.mxu3 %vm2812_vm3, %v2992_v4  ;;  %4207 = vmatmul.msk.bf16.gmra.mxu0 %vm2812_vm3, %v4197_v17  ;;  %v2673_v23 = vld [vmem:[#allocation3 + $0x20] sm:$0xf]  ;;  %v2722_v31 = vrot.slane %v2721_v37, 4  ;;  %v2734_v8 = vrot.slane %v2732_v13, 5  ;;  %v4180_v35 = vrot.slane %v2926_v24, 9  ;;  %v2726_v57 = vrot.slane %v2724_v25, 5 }
 0x1c1   : > { %v2578_v40 = vrot.slane %v2576_v47, 7  ;;  %v2495_v52 = vadd.f32 %v5630_v3, %v2483_v28  ;;  %v2740_v54 = vrot.slane %v2738_v5, 5  ;;  %v2743_v49 = vshrl.u32 %v2673_v23, 16  ;;  %v4166_v46 = vld [vmem:[#allocation3 + $0x20] sm:$0xf] }
 0x1c2   : > { %v2268_v56 = vpop.f32.mrf.mxu3  ;;  %v2727_v60 = vsel %vm4823_vm8, %v2722_v31, %v2726_v57  ;;  %v2735_v7 = vor.u32 %v2734_v8, %v2731_v33  ;;  %v2746_v6 = vshll.u32 %v2673_v23, 16  ;;  %v2968_v14 = vsel %vm5677_vm2, %v4180_v35, %v2967_v32  ;;  %v2657_v33 = vld [vmem:[#allocation3 + $0x38] sm:$0xf]  ;;  %v2660_v47 = vld [vmem:[#allocation3 + $0x3c] sm:$0x1] }
 0x1c3   : > { %v2581_v44 = vor.u32 %v2579_v10, %v2578_v40  ;;  %v2582_v12 = vrot.slane %v2578_v40, 4  ;;  %v2278_v38 = vadd.f32 %v2268_v56, %v2195_v22  ;;  %v2503_v1 = vmax.f32 %v2495_v52, 0.0 }
 0x1c4   : > { %v2736_v0 = vrot.slane %v2735_v7, 4  ;;  %v2745_v41 = vrot.slane %v2743_v49, 4  ;;  %v2802_v62 = vunpack.c.l.b16 %v2727_v60  ;;  %v2748_v43 = vrot.slane %v2746_v6, 5  ;;  %v2663_v60 = vld [vmem:[#allocation3 + $0x40] sm:$0xf] }
 0x1c5   : > { %v2652_v29 = vsel %vm5647_vm13, %v2581_v44, %v2651_v50  ;;  %v2655_v2 = vsel %vm5656_vm14, %v2582_v12, %v2654_v26  ;;  %v2472_v9 = vadd.f32 %v2462_v34, %v2278_v38  ;;  %v4317_v15 = vld [vmem:[#allocation3 + $0x24] sm:$0xf0]  ;;  %v2533_v61 = vpack.c.bf16 %v2503_v1, %v2503_v1 }
 0x1c6   : > { %v2927_v58 = vld [vmem:[#allocation3 + $0x28] sm:$0xe]  ;;  %2653 = vst [vmem:[#allocation3 + $0x30] sm:$0xf] %v2652_v29  ;;  %v4167_v11 = vor.u32 %v4317_v15, %v4166_v46  ;;  %v2683_v51 = vld [vmem:[#allocation3 + $0x2c] sm:$0x1]  ;;  %v2741_v48 = vsel %vm4823_vm8, %v2736_v0, %v2740_v54  ;;  %v2987_v36 = vunpack.c.l.b16 %v2968_v14  ;;  %v2749_v13 = vor.u32 %v2748_v43, %v2745_v41 }
 0x1c7   : > { %v4181_v21 = vrot.slane %v2927_v58, 9  ;;  %2656 = vst [vmem:[#allocation3 + $0x34] sm:$0x1] %v2655_v2  ;;  %v2484_v27 = vmul.f32 %v5622_v39, %v2472_v9  ;;  %v2971_v63 = vrot.slane %v2683_v51, 5  ;;  %v2674_v55 = vld [vmem:[#allocation3 + $0x28] sm:$0xf]  ;;  %v2803_v45 = vunpack.c.l.b16 %v2741_v48 }
 0x1c8   : > { %v2584_v25 = vshrl.u32 %v2533_v61, 16  ;;  %4174 = vmatmul.msk.bf16.gmra.mxu2 %vm2812_vm3, %v4167_v11  ;;  %v2587_v39 = vshll.u32 %v2533_v61, 16  ;;  %v2757_v17 = vshrl.u32 %v2674_v55, 16  ;;  %v2760_v22 = vshll.u32 %v2674_v55, 16  ;;  %v4200_v32 = vld [vmem:[#allocation3 + $0x28] sm:$0xf] }
 0x1c9   : > { %v2496_v18 = vadd.f32 %v5630_v3, %v2484_v27  ;;  %v2972_v19 = vsel %vm5677_vm2, %v4181_v21, %v2971_v63  ;;  %v2809_v37 = vpack.c.b16 %v2803_v45, %v2802_v62  ;;  %v2766_v8 = vshll.u32 %v2683_v51, 16  ;;  %v5796_v27 = vld [vmem:[#allocation3 + $0xc] sm:$0x1]  ;;  %v3324_v48 = vld [vmem:[#allocation3 + $0x10] sm:$0xe] }
 0x1ca   : > { %v2586_v20 = vrot.slane %v2584_v25, 7  ;;  %v2988_v4 = vunpack.c.l.b16 %v2972_v19  ;;  %v2759_v40 = vrot.slane %v2757_v17, 4  ;;  %v2762_v31 = vrot.slane %v2760_v22, 5  ;;  %v5802_v25 = vld [vmem:[#allocation3 + $0x14] sm:$0x1] }
 0x1cb   : > { %v2504_v10 = vmax.f32 %v2496_v18, 0.0  ;;  %v2752_v52 = vshll.u32 %v5761_v30, 16  ;;  %v2750_v54 = vrot.slane %v2749_v13, 4  ;;  %v2768_v49 = vrot.slane %v2766_v8, 5  ;;  %v2666_v30 = vld [vmem:[#allocation3 + $0x44] sm:$0x1] }
 0x1cc   : > { %v2589_v28 = vor.u32 %v2587_v39, %v2586_v20  ;;  %v2590_v5 = vrot.slane %v2586_v20, 4  ;;  %v2993_v24 = vpack.c.b16 %v2988_v4, %v2987_v36  ;;  %4153 = vmatmul.msk.bf16.gmra.mxu1 %vm2812_vm3, %v2809_v37  ;;  %v2763_v44 = vor.u32 %v2762_v31, %v2759_v40  ;;  %v4228_v62 = vld [vmem:[%s6098_s4 + $0x18] sm:$0xf]  ;;  %v3323_v20 = vld [vmem:[#allocation3 + $0x8] sm:$0xe] }
 0x1cd   : > { %v2534_v3 = vpack.c.bf16 %v2504_v10, %v2504_v10  ;;  %v4321_v23 = vld [vmem:[#allocation3 + $0x2c] sm:$0xf0]  ;;  %v2754_v2 = vrot.slane %v2752_v52, 5 }
 0x1ce   : > { %v2658_v35 = vsel %vm5647_vm13, %v2589_v28, %v2657_v33  ;;  %v2661_v50 = vsel %vm5656_vm14, %v2590_v5, %v2660_v47  ;;  %v4201_v26 = vor.u32 %v4321_v23, %v4200_v32  ;;  %v2684_v56 = vld [vmem:[#allocation3 + $0x34] sm:$0x1]  ;;  %v2928_v12 = vld [vmem:[#allocation3 + $0x30] sm:$0xe]  ;;  %v2764_v7 = vrot.slane %v2763_v44, 4 }
 0x1cf   : > { %2659 = vst [vmem:[#allocation3 + $0x38] sm:$0xf] %v2658_v35  ;;  %v2592_v57 = vshrl.u32 %v2534_v3, 16  ;;  %v2595_v38 = vshll.u32 %v2534_v3, 16  ;;  %v2675_v1 = vld [vmem:[#allocation3 + $0x30] sm:$0xf]  ;;  %v2755_v61 = vsel %vm4823_vm8, %v2750_v54, %v2754_v2 }
 0x1d0   : > { %2662 = vst [vmem:[#allocation3 + $0x3c] sm:$0x1] %v2661_v50  ;;  %4187 = vmatmul.msk.bf16.gmra.mxu3 %vm2812_vm3, %v2993_v24  ;;  %4208 = vmatmul.msk.bf16.gmra.mxu0 %vm2812_vm3, %v4201_v26  ;;  %v2771_v6 = vshrl.u32 %v2675_v1, 16  ;;  %v2774_v29 = vshll.u32 %v2675_v1, 16  ;;  %v4182_v9 = vrot.slane %v2928_v12, 9  ;;  %v2975_v46 = vrot.slane %v2684_v56, 5 }
 0x1d1   : > { %v2594_v34 = vrot.slane %v2592_v57, 7  ;;  %v2769_v14 = vsel %vm4823_vm8, %v2764_v7, %v2768_v49  ;;  %v4170_v0 = vld [vmem:[#allocation3 + $0x30] sm:$0xf]  ;;  %v2780_v21 = vshll.u32 %v2684_v56, 16  ;;  %v2804_v53 = vunpack.c.l.b16 %v2755_v61  ;;  %v4249_v28 = vld [vmem:[%s6098_s4 + $0x1c] sm:$0xf] }
 0x1d2   : > { %v2773_v11 = vrot.slane %v2771_v6, 4  ;;  %v2776_v51 = vrot.slane %v2774_v29, 5  ;;  %v2805_v41 = vunpack.c.l.b16 %v2769_v14  ;;  %v2976_v45 = vsel %vm5677_vm2, %v4182_v9, %v2975_v46  ;;  %v3852_v5 = vld [vmem:[%s6099_s5] sm:$0x3]  ;;  %v3528_v40 = vld [vmem:[#allocation3 + $0x10] sm:$0xf] }
 0x1d3   : > { %v2597_v15 = vor.u32 %v2595_v38, %v2594_v34  ;;  %v2598_v58 = vrot.slane %v2594_v34, 4  ;;  %v5809_v33 = vrot.slane %v2780_v21, 5  ;;  %v3349_v47 = vrot.slane %v5796_v27, 5  ;;  %v3530_v26 = vld [vmem:[#allocation3 + $0x18] sm:$0xf] }
 0x1d4   : > { %v2777_v17 = vor.u32 %v2776_v51, %v2773_v11  ;;  %v2810_v10 = vpack.c.b16 %v2805_v41, %v2804_v53  ;;  %v2989_v37 = vunpack.c.l.b16 %v2976_v45  ;;  %v4216_v32 = vrot.slane %v3324_v48, 9  ;;  %v5828_v6 = vld [vmem:[#allocation3 + $0x1c] sm:$0x1]  ;;  %v5830_v46 = vld [vmem:[#allocation3 + $0x14] sm:$0x1] }
 0x1d5   : > { %v2664_v63 = vsel %vm5647_vm13, %v2597_v15, %v2663_v60  ;;  %v2667_v55 = vsel %vm5656_vm14, %v2598_v58, %v2666_v30  ;;  %v3353_v3 = vrot.slane %v5802_v25, 5  ;;  %v3489_v23 = vsel %vm2825_vm9, %v4228_v62, 0  ;;  %v3131_v11 = vld [vmem:[#allocation3 + $0x10] sm:$0xf] }
 0x1d6   : > { %2665 = vst [vmem:[#allocation3 + $0x40] sm:$0xf] %v2664_v63  ;;  %v4318_v43 = vld [vmem:[#allocation3 + $0x34] sm:$0xf0]  ;;  %3498 = vmatpush.bf16.msra.mxu3 %v3489_v23  ;;  %v2778_v52 = vrot.slane %v2777_v17, 4  ;;  %v4215_v56 = vrot.slane %v3323_v20, 9 }
 0x1d7   : > { %v2929_v18 = vld [vmem:[#allocation3 + $0x38] sm:$0xe]  ;;  %2668 = vst [vmem:[#allocation3 + $0x44] sm:$0x1] %v2667_v55  ;;  %v4171_v19 = vor.u32 %v4318_v43, %v4170_v0  ;;  %v2685_v36 = vld [vmem:[#allocation3 + $0x3c] sm:$0x1]  ;;  %v3354_v7 = vsel %vm5677_vm2, %v4216_v32, %v3353_v3 }
 0x1d8   : > { %v4183_v16 = vrot.slane %v2929_v18, 9  ;;  %v2979_v39 = vrot.slane %v2685_v36, 5  ;;  %v2676_v4 = vld [vmem:[#allocation3 + $0x38] sm:$0xf]  ;;  %v2794_v50 = vshll.u32 %v2685_v36, 16  ;;  %v3683_v57 = vsel %vm2825_vm9, %v4249_v28, 0 }
 0x1d9   : > { %4175 = vmatmul.msk.bf16.gmra.mxu2 %vm2812_vm3, %v4171_v19  ;;  %v2785_v13 = vshrl.u32 %v2676_v4, 16  ;;  %v2788_v22 = vshll.u32 %v2676_v4, 16  ;;  %v3886_v54 = vsel %vm1459_vm1, %v3852_v5, 0  ;;  %v4204_v12 = vld [vmem:[#allocation3 + $0x38] sm:$0xf]  ;;  %3692 = vmatpush.bf16.msra.mxu0 %v3683_v57  ;;  %v3545_v1 = vshrl.u32 %v3528_v40, 16 }
 0x1da   : > { %v2980_v24 = vsel %vm5677_vm2, %v4183_v16, %v2979_v39  ;;  %v3548_v34 = vshll.u32 %v3528_v40, 16  ;;  %3895 = vmatpush.bf16.msra.mxu2 %v3886_v54  ;;  %v3559_v29 = vshrl.u32 %v3530_v26, 16  ;;  %v3562_v30 = vshll.u32 %v3530_v26, 16  ;;  %v3129_v0 = vld [vmem:[#allocation3 + $0x8] sm:$0xf] }
 0x1db   : > { %v2990_v31 = vunpack.c.l.b16 %v2980_v24  ;;  %v2787_v8 = vrot.slane %v2785_v13, 4  ;;  %v2790_v35 = vrot.slane %v2788_v22, 5  ;;  %v2796_v9 = vrot.slane %v2794_v50, 5  ;;  %v4262_v36 = vld [vmem:[%s6098_s4 + $0x20] sm:$0xf] }
 0x1dc   : > { %4154 = vmatmul.msk.bf16.gmra.mxu1 %vm2812_vm3, %v2810_v10  ;;  %v3547_v15 = vrot.slane %v3545_v1, 4  ;;  %v3550_v58 = vrot.slane %v3548_v34, 5  ;;  %v3561_v14 = vrot.slane %v3559_v29, 4  ;;  %v3564_v61 = vrot.slane %v3562_v30, 5  ;;  %v3532_v22 = vld [vmem:[#allocation3 + $0x20] sm:$0xf] }
 0x1dd   : > { %v2994_v44 = vpack.c.b16 %v2990_v31, %v2989_v37  ;;  %v4322_v38 = vld [vmem:[#allocation3 + $0x3c] sm:$0xf0]  ;;  %v2791_v49 = vor.u32 %v2790_v35, %v2787_v8  ;;  %v2783_v51 = vsel %vm4823_vm8, %v2778_v52, %v5809_v33  ;;  %v3350_v21 = vsel %vm5677_vm2, %v4215_v56, %v3349_v47  ;;  %v5851_v40 = vld [vmem:[#allocation3 + $0x24] sm:$0x1]  ;;  %v3534_v50 = vld [vmem:[#allocation3 + $0x28] sm:$0xf] }
 0x1de   : > { %v4205_v60 = vor.u32 %v4322_v38, %v4204_v12  ;;  %v3551_v63 = vor.u32 %v3550_v58, %v3547_v15  ;;  %v3568_v55 = vshll.u32 %v5828_v6, 16  ;;  %v3382_v48 = vunpack.c.l.b16 %v3354_v7  ;;  %v3326_v31 = vld [vmem:[#allocation3 + $0x20] sm:$0xe]  ;;  %v4323_v52 = vld [vmem:[#allocation3 + $0x14] sm:$0xf0] }
 0x1df   : > { %v2792_v2 = vrot.slane %v2791_v49, 4  ;;  %v3554_v62 = vshll.u32 %v5830_v46, 16  ;;  %v3565_v43 = vor.u32 %v3564_v61, %v3561_v14  ;;  %v3146_v18 = vshrl.u32 %v3129_v0, 16  ;;  %v5856_v38 = vld [vmem:[#allocation3 + $0x1c] sm:$0x1] }
 0x1e0   : > { %4188 = vmatmul.msk.bf16.gmra.mxu3 %vm2812_vm3, %v2994_v44  ;;  %4209 = vmatmul.msk.bf16.gmra.mxu0 %vm2812_vm3, %v4205_v60  ;;  %v3149_v45 = vshll.u32 %v3129_v0, 16  ;;  %v3160_v53 = vshrl.u32 %v3131_v11, 16  ;;  %v3163_v19 = vshll.u32 %v3131_v11, 16  ;;  %v3381_v16 = vunpack.c.l.b16 %v3350_v21  ;;  %v3325_v49 = vld [vmem:[#allocation3 + $0x18] sm:$0xe] }
 0x1e1   : > { %v2797_v41 = vsel %vm4823_vm8, %v2792_v2, %v2796_v9  ;;  %v3552_v20 = vrot.slane %v3551_v63, 4  ;;  %v3566_v39 = vrot.slane %v3565_v43, 4  ;;  %v3570_v17 = vrot.slane %v3568_v55, 5  ;;  %v4231_v60 = vld [vmem:[#allocation3 + $0x10] sm:$0xf] }
 0x1e2   : > { %v2807_v4 = vunpack.c.l.b16 %v2797_v41  ;;  %v3162_v33 = vrot.slane %v3160_v53, 4  ;;  %v3165_v47 = vrot.slane %v3163_v19, 5  ;;  %v2806_v10 = vunpack.c.l.b16 %v2783_v51  ;;  %v5860_v15 = vld [vmem:[#allocation3 + $0x2c] sm:$0x1]  ;;  %v3133_v11 = vld [vmem:[#allocation3 + $0x18] sm:$0xf] }
 0x1e3   : > { %v3556_v37 = vrot.slane %v3554_v62, 5  ;;  %v3805_v13 = vsel %vm2825_vm9, %v4262_v36, 0  ;;  %v3389_v28 = vpack.c.b16 %v3382_v48, %v3381_v16  ;;  %v3571_v5 = vsel %vm4823_vm8, %v3566_v39, %v3570_v17  ;;  %v5863_v21 = vld [vmem:[#allocation3 + $0x24] sm:$0x1]  ;;  %v3135_v55 = vld [vmem:[#allocation3 + $0x20] sm:$0xf] }
 0x1e4   : > { %v3148_v24 = vrot.slane %v3146_v18, 4  ;;  %v3151_v32 = vrot.slane %v3149_v45, 5  ;;  %3814 = vmatpush.bf16.msra.mxu1 %v3805_v13  ;;  %v3166_v23 = vor.u32 %v3165_v47, %v3162_v33  ;;  %v2811_v8 = vpack.c.b16 %v2807_v4, %v2806_v10 }
 0x1e5   : > { %v3557_v3 = vsel %vm4823_vm8, %v3552_v20, %v3556_v37  ;;  %v3169_v35 = vshll.u32 %v5802_v25, 16  ;;  %v3573_v26 = vshrl.u32 %v3532_v22, 16  ;;  %v3659_v56 = vunpack.c.l.b16 %v3571_v5  ;;  %v3536_v5 = vld [vmem:[#allocation3 + $0x30] sm:$0xf] }
 0x1e6   : > { %v3155_v57 = vshll.u32 %v5796_v27, 16  ;;  %v3576_v54 = vshll.u32 %v3532_v22, 16  ;;  %v3658_v44 = vunpack.c.l.b16 %v3557_v3  ;;  %v3152_v12 = vor.u32 %v3151_v32, %v3148_v24 }
 0x1e7   : > { %v4218_v1 = vrot.slane %v3326_v31, 9  ;;  %v3361_v34 = vrot.slane %v5851_v40, 5  ;;  %v3167_v7 = vrot.slane %v3166_v23, 4  ;;  %v3575_v29 = vrot.slane %v3573_v26, 4  ;;  %v3538_v31 = vld [vmem:[#allocation3 + $0x38] sm:$0xf] }
 0x1e8   : > { %v3578_v30 = vrot.slane %v3576_v54, 5  ;;  %v3587_v25 = vshrl.u32 %v3534_v50, 16  ;;  %v4232_v2 = vor.u32 %v4323_v52, %v4231_v60  ;;  %v3171_v9 = vrot.slane %v3169_v35, 5 }
 0x1e9   : > { %4224 = vmatmul.msk.bf16.vlgmr.msrb.gmra.mxu2 %vm2812_vm3, %v3389_v28  ;;  %v3590_v27 = vshll.u32 %v3534_v50, 16  ;;  %v3666_v58 = vpack.c.b16 %v3659_v56, %v3658_v44  ;;  %v4217_v14 = vrot.slane %v3325_v49, 9  ;;  %v3357_v61 = vrot.slane %v5856_v38, 5  ;;  %v3327_v50 = vld [vmem:[#allocation3 + $0x28] sm:$0xe] }
 0x1ea   : > { %v3589_v0 = vrot.slane %v3587_v25, 4  ;;  %v3153_v51 = vrot.slane %v3152_v12, 4  ;;  %v3157_v41 = vrot.slane %v3155_v57, 5  ;;  %v3172_v48 = vsel %vm4823_vm8, %v3167_v7, %v3171_v9  ;;  %v5881_v56 = vld [vmem:[#allocation3 + $0x34] sm:$0x1] }
 0x1eb   : > { %v3592_v63 = vrot.slane %v3590_v27, 5  ;;  %v3362_v62 = vsel %vm5677_vm2, %v4218_v1, %v3361_v34  ;;  %v3579_v43 = vor.u32 %v3578_v30, %v3575_v29  ;;  %v3596_v45 = vshll.u32 %v5860_v15, 16  ;;  %v3328_v57 = vld [vmem:[#allocation3 + $0x30] sm:$0xe]  ;;  %v5886_v34 = vld [vmem:[#allocation3 + $0x2c] sm:$0x1] }
 0x1ec   : > { %4155 = vmatmul.msk.bf16.gmra.mxu1 %vm2812_vm3, %v2811_v8  ;;  %v3174_v53 = vshrl.u32 %v3133_v11, 16  ;;  %v3177_v19 = vshll.u32 %v3133_v11, 16  ;;  %v3358_v36 = vsel %vm5677_vm2, %v4217_v14, %v3357_v61  ;;  %v3582_v16 = vshll.u32 %v5863_v21, 16  ;;  %v4324_v7 = vld [vmem:[#allocation3 + $0x24] sm:$0xf0] }
 0x1ed   : > { %v3593_v18 = vor.u32 %v3592_v63, %v3589_v0  ;;  %v3188_v20 = vshrl.u32 %v3135_v55, 16  ;;  %v3191_v39 = vshll.u32 %v3135_v55, 16  ;;  %v3158_v4 = vsel %vm4823_vm8, %v3153_v51, %v3157_v41  ;;  %v3137_v61 = vld [vmem:[#allocation3 + $0x28] sm:$0xf]  ;;  %v4235_v0 = vld [vmem:[#allocation3 + $0x20] sm:$0xf] }
 0x1ee   : > { %v3384_v17 = vunpack.c.l.b16 %v3362_v62  ;;  %v3260_v47 = vunpack.c.l.b16 %v3172_v48  ;;  %v3580_v10 = vrot.slane %v3579_v43, 4  ;;  %v3383_v37 = vunpack.c.l.b16 %v3358_v36  ;;  %v5891_v41 = vld [vmem:[#allocation3 + $0x34] sm:$0x1]  ;;  %v5893_v48 = vld [vmem:[#allocation3 + $0x3c] sm:$0x1] }
 0x1ef   : > { %v3594_v33 = vrot.slane %v3593_v18, 4  ;;  %v3598_v13 = vrot.slane %v3596_v45, 5  ;;  %v3176_v22 = vrot.slane %v3174_v53, 4  ;;  %v3179_v28 = vrot.slane %v3177_v19, 5 }
 0x1f0   : > { %4245 = vmatmul.msk.bf16.vlgmr.msra.gmra.mxu3 %vm2812_vm3, %v4232_v2  ;;  %4250 = vmatmul.msk.bf16.vlgmr.msra.gmra.mxu0 %vm2812_vm3, %v3666_v58  ;;  %v3259_v24 = vunpack.c.l.b16 %v3158_v4  ;;  %v3584_v32 = vrot.slane %v3582_v16, 5  ;;  %v3190_v3 = vrot.slane %v3188_v20, 4  ;;  %v3193_v23 = vrot.slane %v3191_v39, 5 }
 0x1f1   : > { %v3390_v8 = vpack.c.b16 %v3384_v17, %v3383_v37  ;;  %v3599_v35 = vsel %vm4823_vm8, %v3594_v33, %v3598_v13  ;;  %v3601_v54 = vshrl.u32 %v3536_v5, 16  ;;  %v3604_v44 = vshll.u32 %v3536_v5, 16  ;;  %v3139_v33 = vld [vmem:[#allocation3 + $0x30] sm:$0xf] }
 0x1f2   : > { %v3267_v26 = vpack.c.b16 %v3260_v47, %v3259_v24  ;;  %v3585_v52 = vsel %vm4823_vm8, %v3580_v10, %v3584_v32  ;;  %v3180_v12 = vor.u32 %v3179_v28, %v3176_v22  ;;  %v3183_v49 = vshll.u32 %v5856_v38, 16  ;;  %v3540_v28 = vld [vmem:[#allocation3 + $0x40] sm:$0xf] }
 0x1f3   : > { %v3197_v1 = vshll.u32 %v5851_v40, 16  ;;  %v3615_v60 = vshrl.u32 %v3538_v31, 16  ;;  %v3661_v29 = vunpack.c.l.b16 %v3599_v35  ;;  %v3194_v30 = vor.u32 %v3193_v23, %v3190_v3  ;;  %v3542_v35 = vld [vmem:[#allocation3 + $0x48] sm:$0xf] }
 0x1f4   : > { %v4219_v25 = vrot.slane %v3327_v50, 9  ;;  %v3618_v2 = vshll.u32 %v3538_v31, 16  ;;  %v3660_v9 = vunpack.c.l.b16 %v3585_v52  ;;  %v4220_v27 = vrot.slane %v3328_v57, 9  ;;  %v5907_v52 = vld [vmem:[#allocation3 + $0x3c] sm:$0x1] }
 0x1f5   : > { %v3369_v58 = vrot.slane %v5881_v56, 5  ;;  %v3617_v14 = vrot.slane %v3615_v60, 4  ;;  %v3365_v11 = vrot.slane %v5886_v34, 5  ;;  %v3603_v38 = vrot.slane %v3601_v54, 4  ;;  %v3329_v57 = vld [vmem:[#allocation3 + $0x38] sm:$0xe] }
 0x1f6   : > { %v3606_v51 = vrot.slane %v3604_v44, 5  ;;  %v3620_v40 = vrot.slane %v3618_v2, 5  ;;  %v4236_v63 = vor.u32 %v4324_v7, %v4235_v0  ;;  %v3181_v55 = vrot.slane %v3180_v12, 4  ;;  %v5911_v7 = vld [vmem:[#allocation3 + $0x44] sm:$0x1] }
 0x1f7   : > { %v3667_v62 = vpack.c.b16 %v3661_v29, %v3660_v9  ;;  %v3195_v43 = vrot.slane %v3194_v30, 4  ;;  %v3202_v18 = vshrl.u32 %v3137_v61, 16  ;;  %v3205_v45 = vshll.u32 %v3137_v61, 16  ;;  %v3330_v29 = vld [vmem:[#allocation3 + $0x40] sm:$0xe] }
 0x1f8   : > { %v3185_v53 = vrot.slane %v3183_v49, 5  ;;  %v3199_v19 = vrot.slane %v3197_v1, 5  ;;  %v3370_v36 = vsel %vm5677_vm2, %v4220_v27, %v3369_v58  ;;  %v3621_v16 = vor.u32 %v3620_v40, %v3617_v14  ;;  %v4325_v30 = vld [vmem:[#allocation3 + $0x34] sm:$0xf0]  ;;  %v4239_v58 = vld [vmem:[#allocation3 + $0x30] sm:$0xf] }
 0x1f9   : > { %4225 = vmatmul.msk.bf16.gmra.mxu2 %vm2812_vm3, %v3390_v8  ;;  %v3366_v20 = vsel %vm5677_vm2, %v4219_v25, %v3365_v11  ;;  %v3607_v39 = vor.u32 %v3606_v51, %v3603_v38  ;;  %v3610_v4 = vshll.u32 %v5891_v41, 16  ;;  %v3624_v17 = vshll.u32 %v5893_v48, 16  ;;  %v3722_v40 = vld [vmem:[#allocation3 + $0x10] sm:$0xe] }
 0x1fa   : > { %v3186_v47 = vsel %vm4823_vm8, %v3181_v55, %v3185_v53  ;;  %v3200_v10 = vsel %vm4823_vm8, %v3195_v43, %v3199_v19  ;;  %v3386_v37 = vunpack.c.l.b16 %v3370_v36  ;;  %v3204_v13 = vrot.slane %v3202_v18, 4 }
 0x1fb   : > { %v3207_v22 = vrot.slane %v3205_v45, 5  ;;  %v3385_v5 = vunpack.c.l.b16 %v3366_v20  ;;  %v3622_v24 = vrot.slane %v3621_v16, 4  ;;  %v3216_v32 = vshrl.u32 %v3139_v33, 16  ;;  %v5922_v45 = vld [vmem:[#allocation3 + $0x44] sm:$0x1] }
 0x1fc   : > { %4211 = vmatmul.msk.bf16.vlgmr.msrb.gmra.mxu1 %vm2812_vm3, %v3267_v26  ;;  %v3608_v3 = vrot.slane %v3607_v39, 4  ;;  %v3612_v23 = vrot.slane %v3610_v4, 5  ;;  %v3626_v31 = vrot.slane %v3624_v17, 5  ;;  %v3219_v8 = vshll.u32 %v3139_v33, 16  ;;  %v3724_v4 = vld [vmem:[#allocation3 + $0x20] sm:$0xe] }
 0x1fd   : > { %v3261_v50 = vunpack.c.l.b16 %v3186_v47  ;;  %v3262_v26 = vunpack.c.l.b16 %v3200_v10  ;;  %v3629_v54 = vshrl.u32 %v3540_v28, 16  ;;  %v3632_v44 = vshll.u32 %v3540_v28, 16  ;;  %v5929_v10 = vld [vmem:[#allocation3 + $0x4c] sm:$0x1] }
 0x1fe   : > { %v3391_v12 = vpack.c.b16 %v3386_v37, %v3385_v5  ;;  %v3208_v49 = vor.u32 %v3207_v22, %v3204_v13  ;;  %v3211_v1 = vshll.u32 %v5886_v34, 16  ;;  %v3225_v60 = vshll.u32 %v5881_v56, 16 }
 0x1ff   : > { %v3627_v25 = vsel %vm4823_vm8, %v3622_v24, %v3626_v31  ;;  %v3218_v2 = vrot.slane %v3216_v32, 4  ;;  %v3643_v9 = vshrl.u32 %v3542_v35, 16  ;;  %v3646_v27 = vshll.u32 %v3542_v35, 16  ;;  %v3725_v24 = vld [vmem:[#allocation3 + $0x28] sm:$0xe] }
 0x200   : > { %4246 = vmatmul.msk.bf16.gmra.mxu3 %vm2812_vm3, %v4236_v63  ;;  %4251 = vmatmul.msk.bf16.gmra.mxu0 %vm2812_vm3, %v3667_v62  ;;  %v3613_v14 = vsel %vm4823_vm8, %v3608_v3, %v3612_v23  ;;  %v3221_v61 = vrot.slane %v3219_v8, 5  ;;  %v4221_v0 = vrot.slane %v3329_v57, 9  ;;  %v3373_v34 = vrot.slane %v5907_v52, 5  ;;  %v3723_v62 = vld [vmem:[#allocation3 + $0x18] sm:$0xe] }
 0x201   : > { %v4222_v56 = vrot.slane %v3330_v29, 9  ;;  %v3377_v11 = vrot.slane %v5911_v7, 5  ;;  %v3631_v38 = vrot.slane %v3629_v54, 4  ;;  %v3634_v51 = vrot.slane %v3632_v44, 5  ;;  %v3143_v54 = vld [vmem:[#allocation3 + $0x40] sm:$0xf] }
 0x202   : > { %v4240_v63 = vor.u32 %v4325_v30, %v4239_v58  ;;  %v3663_v55 = vunpack.c.l.b16 %v3627_v25  ;;  %v3268_v43 = vpack.c.b16 %v3262_v26, %v3261_v50  ;;  %v5920_v18 = vrot.slane %v3211_v1, 5  ;;  %v3141_v1 = vld [vmem:[#allocation3 + $0x38] sm:$0xf] }
 0x203   : > { %v3645_v53 = vrot.slane %v3643_v9, 4  ;;  %v3648_v19 = vrot.slane %v3646_v27, 5  ;;  %v3662_v36 = vunpack.c.l.b16 %v3613_v14  ;;  %v3209_v16 = vrot.slane %v3208_v49, 4 }
 0x204   : > { %v3222_v20 = vor.u32 %v3221_v61, %v3218_v2  ;;  %v4254_v39 = vrot.slane %v3722_v40, 9  ;;  %v3227_v17 = vrot.slane %v3225_v60, 5  ;;  %v3374_v33 = vsel %vm5677_vm2, %v4221_v0, %v3373_v34 }
 0x205   : > { %v3378_v47 = vsel %vm5677_vm2, %v4222_v56, %v3377_v11  ;;  %v3635_v37 = vor.u32 %v3634_v51, %v3631_v38  ;;  %v3668_v13 = vpack.c.b16 %v3663_v55, %v3662_v36  ;;  %v3638_v22 = vshll.u32 %v5922_v45, 16 }
 0x206   : > { %v3748_v28 = vrot.slane %v5830_v46, 5  ;;  %v4255_v5 = vrot.slane %v3723_v62, 9  ;;  %v3649_v32 = vor.u32 %v3648_v19, %v3645_v53  ;;  %v3652_v3 = vshll.u32 %v5929_v10, 16 }
 0x207   : > { %v3752_v23 = vrot.slane %v5828_v6, 5  ;;  %v4256_v31 = vrot.slane %v3724_v4, 9  ;;  %v3214_v8 = vsel %vm4823_vm8, %v3209_v16, %v5920_v18  ;;  %v3223_v35 = vrot.slane %v3222_v20, 4 }
 0x208   : > { %v3749_v46 = vsel %vm5677_vm2, %v4254_v39, %v3748_v28  ;;  %v3756_v50 = vrot.slane %v5863_v21, 5  ;;  %v3387_v26 = vunpack.c.l.b16 %v3374_v33  ;;  %v3636_v57 = vrot.slane %v3635_v37, 4  ;;  %v3726_v21 = vld [vmem:[#allocation3 + $0x30] sm:$0xe]  ;;  %v3727_v39 = vld [vmem:[#allocation3 + $0x38] sm:$0xe] }
 0x209   : > { %4226 = vmatmul.msk.bf16.gmra.mxu2 %vm2812_vm3, %v3391_v12  ;;  %v3753_v6 = vsel %vm5677_vm2, %v4255_v5, %v3752_v23  ;;  %v4257_v44 = vrot.slane %v3725_v24, 9  ;;  %v3388_v12 = vunpack.c.l.b16 %v3378_v47  ;;  %v3640_v49 = vrot.slane %v3638_v22, 5  ;;  %v4243_v37 = vld [vmem:[#allocation3 + $0x40] sm:$0xf] }
 0x20a   : > { %v3780_v60 = vunpack.c.l.b16 %v3749_v46  ;;  %v3781_v29 = vunpack.c.l.b16 %v3753_v6  ;;  %v3650_v30 = vrot.slane %v3649_v32, 4  ;;  %v3654_v25 = vrot.slane %v3652_v3, 5 }
 0x20b   : > { %v3757_v2 = vsel %vm5677_vm2, %v4256_v31, %v3756_v50  ;;  %v3760_v9 = vrot.slane %v5860_v15, 5  ;;  %v3228_v27 = vsel %vm4823_vm8, %v3223_v35, %v3227_v17  ;;  %v3244_v58 = vshrl.u32 %v3143_v54, 16 }
 0x20c   : > { %4212 = vmatmul.msk.bf16.gmra.mxu1 %vm2812_vm3, %v3268_v43  ;;  %v3247_v14 = vshll.u32 %v3143_v54, 16  ;;  %v5950_v61 = vpack.c.b16 %v3781_v29, %v3780_v60  ;;  %v3641_v0 = vsel %vm4823_vm8, %v3636_v57, %v3640_v49  ;;  %v3230_v34 = vshrl.u32 %v3141_v1, 16  ;;  %v3729_v57 = vld [vmem:[#allocation3 + $0x48] sm:$0xe]  ;;  %v4327_v60 = vld [vmem:[%s5982_s30] sm:$0xff] }
 0x20d   : > { %v3233_v56 = vshll.u32 %v3141_v1, 16  ;;  %v3761_v11 = vsel %vm5677_vm2, %v4257_v44, %v3760_v9  ;;  %v3782_v38 = vunpack.c.l.b16 %v3757_v2  ;;  %v4258_v15 = vrot.slane %v3726_v21, 9 }
 0x20e   : > { %v3783_v51 = vunpack.c.l.b16 %v3761_v11  ;;  %v3764_v40 = vrot.slane %v5891_v41, 5  ;;  %v3392_v55 = vpack.c.b16 %v3388_v12, %v3387_v26  ;;  %v3655_v62 = vsel %vm4823_vm8, %v3650_v30, %v3654_v25  ;;  %v3728_v26 = vld [vmem:[#allocation3 + $0x40] sm:$0xe]  ;;  %v4329_v11 = vld [vmem:[%s5982_s30 + $0x10] sm:$0xff] }
 0x20f   : > { %v3246_v43 = vrot.slane %v3244_v58, 4  ;;  %v3249_v18 = vrot.slane %v3247_v14, 5  ;;  %v3263_v19 = vunpack.c.l.b16 %v3214_v8  ;;  %v3664_v36 = vunpack.c.l.b16 %v3641_v0  ;;  %v4328_v58 = vld [vmem:[%s5982_s30 + $0x8] sm:$0xff] }
 0x210   : > { %4247 = vmatmul.msk.bf16.gmra.mxu3 %vm2812_vm3, %v4240_v63  ;;  %4252 = vmatmul.msk.bf16.gmra.mxu0 %vm2812_vm3, %v3668_v13  ;;  %v3264_v63 = vunpack.c.l.b16 %v3228_v27  ;;  %v5960_v53 = vpack.c.b16 %v3783_v51, %v3782_v38  ;;  %v3232_v16 = vrot.slane %v3230_v34, 4  ;;  %v3235_v20 = vrot.slane %v3233_v56, 5  ;;  %v4326_v13 = vld [vmem:[#allocation3 + $0x44] sm:$0xf0] }
 0x211   : > { %v3665_v41 = vunpack.c.l.b16 %v3655_v62  ;;  %v3765_v4 = vsel %vm5677_vm2, %v4258_v15, %v3764_v40  ;;  %v4259_v17 = vrot.slane %v3727_v39, 9  ;;  %v3768_v33 = vrot.slane %v5893_v48, 5  ;;  %v4330_v62 = vld [vmem:[%s5982_s30 + $0x18] sm:$0xff] }
 0x212   : > { %v3269_v47 = vpack.c.b16 %v3264_v63, %v3263_v19  ;;  %v3250_v22 = vor.u32 %v3249_v18, %v3246_v43  ;;  %v3236_v5 = vor.u32 %v3235_v20, %v3232_v16  ;;  %v3253_v24 = vshll.u32 %v5911_v7, 16 }
 0x213   : > { %v3769_v28 = vsel %vm5677_vm2, %v4259_v17, %v3768_v33  ;;  %v3784_v32 = vunpack.c.l.b16 %v3765_v4  ;;  %v4244_v23 = vor.u32 %v4326_v13, %v4243_v37  ;;  %v3669_v48 = vpack.c.b16 %v3665_v41, %v3664_v36 }
 0x214   : > { %v3785_v3 = vunpack.c.l.b16 %v3769_v28  ;;  %v3239_v8 = vshll.u32 %v5907_v52, 16  ;;  %v3251_v35 = vrot.slane %v3250_v22, 4  ;;  %v3237_v46 = vrot.slane %v3236_v5, 4 }
 0x215   : > { %v3255_v50 = vrot.slane %v3253_v24, 5  ;;  %v4260_v7 = vrot.slane %v3728_v26, 9  ;;  %v3772_v54 = vrot.slane %v5922_v45, 5  ;;  %v4261_v6 = vrot.slane %v3729_v57, 9 }
 0x216   : > { %v3790_v31 = vpack.c.b16 %v3785_v3, %v3784_v32  ;;  %v3776_v44 = vrot.slane %v5929_v10, 5  ;;  %v3241_v12 = vrot.slane %v3239_v8, 5 }
 0x217   : > { %v3256_v52 = vsel %vm4823_vm8, %v3251_v35, %v3255_v50  ;;  %v3773_v49 = vsel %vm5677_vm2, %v4260_v7, %v3772_v54 }
 0x218   : > { %v3777_v1 = vsel %vm5677_vm2, %v4261_v6, %v3776_v44  ;;  %v3786_v29 = vunpack.c.l.b16 %v3773_v49  ;;  %v3242_v45 = vsel %vm4823_vm8, %v3237_v46, %v3241_v12  ;;  %v3266_v25 = vunpack.c.l.b16 %v3256_v52 }
 0x219   : > { %4227 = vmatmul.msk.bf16.gmra.mxu2 %vm2812_vm3, %v3392_v55  ;;  %v3787_v30 = vunpack.c.l.b16 %v3777_v1  ;;  %v3265_v10 = vunpack.c.l.b16 %v3242_v45 }
 0x21b   : > { %v3791_v2 = vpack.c.b16 %v3787_v30, %v3786_v29  ;;  %v3270_v9 = vpack.c.b16 %v3266_v25, %v3265_v10 }
 0x21c   : > { %4213 = vmatmul.msk.bf16.gmra.mxu1 %vm2812_vm3, %v3269_v47 }
 0x220   : > { %4248 = vmatmul.msk.bf16.gmra.mxu3 %vm2812_vm3, %v4244_v23  ;;  %4253 = vmatmul.msk.bf16.gmra.mxu0 %vm2812_vm3, %v3669_v48 }
 0x229   : > { %4283 = vmatmul.msk.bf16.vlgmr.msra.gmra.mxu2 %vm1446_vm5, %v4327_v60 }
 0x22b   : > { %v2902_v21 = vpop.f32.mrf.mxu2 }
 0x22c   : > { %4214 = vmatmul.msk.bf16.gmra.mxu1 %vm2812_vm3, %v3270_v9 }
 0x231   : > { %v3019_v43 = vpop.f32.mrf.mxu3 }
 0x233   : > { %v2904_v27 = vpop.f32.mrf.mxu2 }
 0x239   : > { %4284 = vmatmul.msk.bf16.gmra.mxu2 %vm1446_vm5, %v4328_v58  ;;  %v2838_v42 = vpop.f32.mrf.mxu1  ;;  %v3021_v16 = vpop.f32.mrf.mxu3 }
 0x23a   : > { %v2903_v14 = vadd.f32 %v2902_v21, %v2838_v42 }
 0x23b   : > { %v2907_v0 = vpop.f32.mrf.mxu2 }
 0x23c   : > { %4263 = vmatmul.msk.bf16.vlgmr.msra.gmra.mxu1 %vm2812_vm3, %v5950_v61  ;;  %v3101_v61 = vpop.f32.mrf.mxu0  ;;  %v3039_v30 = vadd.f32 %v3019_v43, %v2903_v14 }
 0x241   : > { %v2840_v59 = vpop.f32.mrf.mxu1 }
 0x242   : > { %v2905_v34 = vadd.f32 %v2904_v27, %v2840_v59 }
 0x243   : > { %v2909_v56 = vpop.f32.mrf.mxu2  ;;  %v3024_v4 = vpop.f32.mrf.mxu3 }
 0x244   : > { %v3040_v21 = vadd.f32 %v3021_v16, %v2905_v34 }
 0x249   : > { %4285 = vmatmul.msk.bf16.gmra.mxu2 %vm1446_vm5, %v4329_v11  ;;  %v2843_v38 = vpop.f32.mrf.mxu1 }
 0x24a   : > { %v6003_v51 = vadd.f32 %v2907_v0, %v2843_v38 }
 0x24b   : > { %v2912_v15 = vpop.f32.mrf.mxu2  ;;  %v3026_v28 = vpop.f32.mrf.mxu3 }
 0x24c   : > { %4264 = vmatmul.msk.bf16.gmra.mxu1 %vm2812_vm3, %v5960_v53  ;;  %v3103_v53 = vpop.f32.mrf.mxu0  ;;  %v3041_v38 = vadd.f32 %v3024_v4, %v6003_v51 }
 0x24d   : > { %v3122_v0 = vadd.f32 %v3103_v53, %v3040_v21 }
 0x251   : > { %v2845_v40 = vpop.f32.mrf.mxu1 }
 0x252   : > { %v6007_v63 = vadd.f32 %v2909_v56, %v2845_v40 }
 0x253   : > { %v2914_v55 = vpop.f32.mrf.mxu2  ;;  %v3029_v23 = vpop.f32.mrf.mxu3 }
 0x254   : > { %v3106_v37 = vpop.f32.mrf.mxu0  ;;  %v3042_v51 = vadd.f32 %v3026_v28, %v6007_v63 }
 0x255   : > { %v3123_v43 = vadd.f32 %v3106_v37, %v3041_v38 }
 0x259   : > { %4286 = vmatmul.msk.bf16.gmra.mxu2 %vm1446_vm5, %v4330_v62  ;;  %v2848_v18 = vpop.f32.mrf.mxu1 }
 0x25a   : > { %v6011_v19 = vadd.f32 %v2912_v15, %v2848_v18 }
 0x25b   : > { %v6023_v35 = vpop.f32.mrf.mxu3 }
 0x25c   : > { %v2917_v36 = vpop.f32.mrf.mxu2  ;;  %4265 = vmatmul.msk.bf16.gmra.mxu1 %vm2812_vm3, %v3790_v31  ;;  %v3108_v24 = vpop.f32.mrf.mxu0 }
 0x261   : > { %v2850_v20 = vpop.f32.mrf.mxu1 }
 0x262   : > { %v6014_v39 = vadd.f32 %v2914_v55, %v2850_v20 }
 0x263   : > { %v6029_v57 = vpop.f32.mrf.mxu3 }
 0x264   : > { %v2919_v41 = vpop.f32.mrf.mxu2  ;;  %v6021_v48 = vpop.f32.mrf.mxu0 }
 0x269   : > { %v2853_v17 = vpop.f32.mrf.mxu1 }
 0x26a   : > { %v6016_v33 = vadd.f32 %v2917_v36, %v2853_v17  ;;  %v3124_v17 = vadd.f32 %v3108_v24, %v3042_v51 }
 0x26b   : > { %v6035_v12 = vpop.f32.mrf.mxu3 }
 0x26c   : > { %v3417_v47 = vpop.f32.mrf.mxu2  ;;  %4266 = vmatmul.msk.bf16.gmra.mxu1 %vm2812_vm3, %v3791_v2  ;;  %v6025_v50 = vpop.f32.mrf.mxu0  ;;  %v3121_v2 = vadd.f32 %v3101_v61, %v3039_v30 }
 0x271   : > { %v2855_v13 = vpop.f32.mrf.mxu1 }
 0x272   : > { %v6019_v22 = vadd.f32 %v2919_v41, %v2855_v13 }
 0x273   : > { %v3500_v29 = vpop.f32.mrf.mxu3 }
 0x274   : > { %v3419_v5 = vpop.f32.mrf.mxu2  ;;  %v6033_v6 = vpop.f32.mrf.mxu0 }
 0x279   : > { %v3295_v32 = vpop.f32.mrf.mxu1 }
 0x27a   : > { %v3315_v10 = vadd.f32 %v3295_v32, %v3121_v2 }
 0x27b   : > { %v3502_v27 = vpop.f32.mrf.mxu3 }
 0x27c   : > { %v3422_v3 = vpop.f32.mrf.mxu2  ;;  %v6039_v49 = vpop.f32.mrf.mxu0  ;;  %v3437_v58 = vadd.f32 %v3417_v47, %v3315_v10 }
 0x27e   : > { %v3520_v56 = vadd.f32 %v3500_v29, %v3437_v58 }
 0x281   : > { %v3297_v31 = vpop.f32.mrf.mxu1 }
 0x282   : > { %v3316_v11 = vadd.f32 %v3297_v31, %v3122_v0  ;;  %v3043_v31 = vadd.f32 %v3029_v23, %v6011_v19 }
 0x283   : > { %v3505_v55 = vpop.f32.mrf.mxu3 }
 0x284   : > { %v3424_v8 = vpop.f32.mrf.mxu2  ;;  %v3694_v45 = vpop.f32.mrf.mxu0  ;;  %v3438_v14 = vadd.f32 %v3419_v5, %v3316_v11 }
 0x285   : > { %v3714_v40 = vadd.f32 %v3694_v45, %v3520_v56  ;;  %v3045_v56 = vadd.f32 %v6029_v57, %v6016_v33 }
 0x286   : > { %v3521_v34 = vadd.f32 %v3502_v27, %v3438_v14 }
 0x287   : > { %v3127_v38 = vadd.f32 %v6033_v6, %v3045_v56 }
 0x289   : > { %v3300_v46 = vpop.f32.mrf.mxu1 }
 0x28a   : > { %v3317_v18 = vadd.f32 %v3300_v46, %v3123_v43 }
 0x28b   : > { %v3507_v37 = vpop.f32.mrf.mxu3 }
 0x28c   : > { %v6027_v26 = vpop.f32.mrf.mxu2  ;;  %v3696_v59 = vpop.f32.mrf.mxu0  ;;  %v3439_v20 = vadd.f32 %v3422_v3, %v3317_v18  ;;  %v3125_v3 = vadd.f32 %v6021_v48, %v3043_v31 }
 0x28d   : > { %v3715_v53 = vadd.f32 %v3696_v59, %v3521_v34 }
 0x28e   : > { %v3522_v13 = vadd.f32 %v3505_v55, %v3439_v20  ;;  %v3046_v55 = vadd.f32 %v6035_v12, %v6019_v22 }
 0x290   : > { %v3128_v6 = vadd.f32 %v6039_v49, %v3046_v55 }
 0x291   : > { %v3302_v7 = vpop.f32.mrf.mxu1 }
 0x292   : > { %v3318_v5 = vadd.f32 %v3302_v7, %v3124_v17  ;;  %v3044_v7 = vadd.f32 %v6023_v35, %v6014_v39 }
 0x294   : > { %v6031_v54 = vpop.f32.mrf.mxu2  ;;  %v3699_v16 = vpop.f32.mrf.mxu0  ;;  %v3440_v29 = vadd.f32 %v3424_v8, %v3318_v5  ;;  %v3126_v27 = vadd.f32 %v6025_v50, %v3044_v7 }
 0x295   : > { %v3716_v63 = vadd.f32 %v3699_v16, %v3522_v13 }
 0x296   : > { %v3523_v2 = vadd.f32 %v3507_v37, %v3440_v29 }
 0x299   : > { %v3305_v44 = vpop.f32.mrf.mxu1 }
 0x29a   : > { %v3319_v24 = vadd.f32 %v3305_v44, %v3125_v3 }
 0x29c   : > { %v6037_v52 = vpop.f32.mrf.mxu2  ;;  %v3701_v46 = vpop.f32.mrf.mxu0  ;;  %v3441_v19 = vadd.f32 %v6027_v26, %v3319_v24 }
 0x29d   : > { %v3717_v23 = vadd.f32 %v3701_v46, %v3523_v2 }
 0x2a1   : > { %v6041_v1 = vpop.f32.mrf.mxu1 }
 0x2a2   : > { %v3320_v0 = vadd.f32 %v6041_v1, %v3126_v27 }
 0x2a4   : > { %v6043_v60 = vpop.f32.mrf.mxu2  ;;  %v3704_v8 = vpop.f32.mrf.mxu0  ;;  %v3442_v35 = vadd.f32 %v6031_v54, %v3320_v0 }
 0x2a9   : > { %v6045_v25 = vpop.f32.mrf.mxu1 }
 0x2aa   : > { %v3321_v1 = vadd.f32 %v6045_v25, %v3127_v38 }
 0x2ac   : > { %v3897_v9 = vpop.f32.mrf.mxu2  ;;  %v3443_v57 = vadd.f32 %v6037_v52, %v3321_v1 }
 0x2b1   : > { %v6047_v42 = vpop.f32.mrf.mxu1 }
 0x2b2   : > { %v3322_v18 = vadd.f32 %v6047_v42, %v3128_v6 }
 0x2b4   : > { %v3899_v15 = vpop.f32.mrf.mxu2  ;;  %v3444_v22 = vadd.f32 %v6043_v60, %v3322_v18 }
 0x2b9   : > { %v3816_v62 = vpop.f32.mrf.mxu1 }
 0x2ba   : > { %v3836_v61 = vadd.f32 %v3816_v62, %v3714_v40 }
 0x2bc   : > { %v3917_v36 = vadd.f32 %v3897_v9, %v3836_v61  ;;  %v3902_v4 = vpop.f32.mrf.mxu2  ;;  %v3510_v9 = vpop.f32.mrf.mxu3 }
 0x2bd   : > { %v3524_v58 = vadd.f32 %v3510_v9, %v3441_v19 }
 0x2be   : > { %3925 = vst.msk [vmem:[%s6054_s15] sm:$0xff] %vm2812_vm3, %v3917_v36 }
 0x2bf   : > { %v3718_v26 = vadd.f32 %v3704_v8, %v3524_v58 }
 0x2c1   : > { %v3818_v41 = vpop.f32.mrf.mxu1 }
 0x2c2   : > { %v3837_v47 = vadd.f32 %v3818_v41, %v3715_v53 }
 0x2c4   : > { %v3918_v32 = vadd.f32 %v3899_v15, %v3837_v47  ;;  %v3904_v45 = vpop.f32.mrf.mxu2  ;;  %v3512_v39 = vpop.f32.mrf.mxu3 }
 0x2c5   : > { %v3706_v15 = vpop.f32.mrf.mxu0  ;;  %v3525_v14 = vadd.f32 %v3512_v39, %v3442_v35 }
 0x2c6   : > { %3926 = vst.msk [vmem:[%s6054_s15 + $0x8] sm:$0xff] %vm2812_vm3, %v3918_v32 }
 0x2c7   : > { %v3719_v54 = vadd.f32 %v3706_v15, %v3525_v14 }
 0x2c9   : > { %v3821_v28 = vpop.f32.mrf.mxu1 }
 0x2ca   : > { %v3838_v30 = vadd.f32 %v3821_v28, %v3716_v63 }
 0x2cc   : > { %v3919_v10 = vadd.f32 %v3902_v4, %v3838_v30  ;;  %v3907_v59 = vpop.f32.mrf.mxu2  ;;  %v3515_v62 = vpop.f32.mrf.mxu3 }
 0x2cd   : > { %v3526_v34 = vadd.f32 %v3515_v62, %v3443_v57  ;;  %v3709_v36 = vpop.f32.mrf.mxu0 }
 0x2ce   : > { %3927 = vst.msk [vmem:[%s6054_s15 + $0x10] sm:$0xff] %vm2812_vm3, %v3919_v10 }
 0x2cf   : > { %v3720_v12 = vadd.f32 %v3709_v36, %v3526_v34 }
 0x2d1   : > { %v3823_v21 = vpop.f32.mrf.mxu1 }
 0x2d2   : > { %v3839_v48 = vadd.f32 %v3823_v21, %v3717_v23 }
 0x2d4   : > { %v3920_v44 = vadd.f32 %v3904_v45, %v3839_v48  ;;  %v3909_v33 = vpop.f32.mrf.mxu2  ;;  %v3517_v20 = vpop.f32.mrf.mxu3 }
 0x2d5   : > { %v3527_v53 = vadd.f32 %v3517_v20, %v3444_v22  ;;  %v3711_v49 = vpop.f32.mrf.mxu0 }
 0x2d6   : > { %3928 = vst.msk [vmem:[%s6054_s15 + $0x18] sm:$0xff] %vm2812_vm3, %v3920_v44 }
 0x2d7   : > { %v3721_v4 = vadd.f32 %v3711_v49, %v3527_v53 }
 0x2d9   : > { %v3826_v11 = vpop.f32.mrf.mxu1 }
 0x2da   : > { %v3840_v50 = vadd.f32 %v3826_v11, %v3718_v26 }
 0x2dc   : > { %v3921_v40 = vadd.f32 %v3907_v59, %v3840_v50  ;;  %v3912_v16 = vpop.f32.mrf.mxu2 }
 0x2de   : > { %3929 = vst.msk [vmem:[%s6054_s15 + $0x20] sm:$0xff] %vm2812_vm3, %v3921_v40 }
 0x2e1   : > { %v3828_v43 = vpop.f32.mrf.mxu1 }
 0x2e2   : > { %v3841_v61 = vadd.f32 %v3828_v43, %v3719_v54 }
 0x2e4   : > { %v3922_v25 = vadd.f32 %v3909_v33, %v3841_v61  ;;  %v3914_v47 = vpop.f32.mrf.mxu2 }
 0x2e6   : > { %3930 = vst.msk [vmem:[%s6054_s15 + $0x28] sm:$0xff] %vm2812_vm3, %v3922_v25 }
 0x2e9   : > { %v3831_v52 = vpop.f32.mrf.mxu1 }
 0x2ea   : > { %v3842_v51 = vadd.f32 %v3831_v52, %v3720_v12 }
 0x2ec   : > { %v3923_v41 = vadd.f32 %v3912_v16, %v3842_v51 }
 0x2ee   : > { %3931 = vst.msk [vmem:[%s6054_s15 + $0x30] sm:$0xff] %vm2812_vm3, %v3923_v41 }
 0x2f1   : > { %v3833_v17 = vpop.f32.mrf.mxu1 }
 0x2f2   : > { %v3843_v42 = vadd.f32 %v3833_v17, %v3721_v4 }
 0x2f4   : > { %v3924_v37 = vadd.f32 %v3914_v47, %v3843_v42 }
 0x2f6   : > { %3932 = vst.msk [vmem:[%s6054_s15 + $0x38] sm:$0xff] %vm2812_vm3, %v3924_v37 }
 0x2f7 PF: > { %s20_s13 = sadd.s32 1, %s4361_s13  }
 0x2f8   : > { %p17_p5 = scmp.ge.s32.totalorder %s20_s13, 4  }
 0x2fa   :  { %19 = sbr.rel (!%p17_p5) target bundleno = 1 (0x1), region = 116 }

</bundles_post_ra>
